<compile_context>
chip_gen: v7x
topology: tpu7x:2x2x1
jax: 0.10.0
libtpu: 0.0.40
codegen_flags: <defaults>
</compile_context>

<pallas_src>
import functools

import jax
import jax.numpy as jnp
from jax.experimental import pallas as pl
from jax.experimental.pallas import tpu as pltpu


# --------------------------- fused attention-block kernel -------------------
def _fused_block_kernel(
    x_ref,
    w1q_ref, s1q_ref, t1q_ref, dwq_ref, w2q_ref, s2q_ref, t2q_ref,
    mask_ref,
    w1p_ref, s1p_ref, t1p_ref, dwp_ref, w2p_ref, s2p_ref, t2p_ref,
    o_ref,
    v_head, v_q, v_k, v_v, v_attn, pad_q, pad_p,
    *, B, H, W, C, scale,
):
    t = pl.program_id(0)
    M = B * H * W
    N = H * W
    C3 = 3 * C

    @pl.when(t == 0)
    def _init():
        # LIF membranes start at 0.
        v_head[...] = jnp.zeros_like(v_head)
        v_q[...] = jnp.zeros_like(v_q)
        v_k[...] = jnp.zeros_like(v_k)
        v_v[...] = jnp.zeros_like(v_v)
        v_attn[...] = jnp.zeros_like(v_attn)
        # BNAndPadLayer border value == BN(0) == shift; grid-invariant, so fill
        # the whole padded scratch once.  The interior is overwritten each step.
        pad_q[...] = jnp.broadcast_to(
            t1q_ref[...].reshape(1, 1, 1, C3), (B, H + 2, W + 2, C3))
        pad_p[...] = jnp.broadcast_to(
            t1p_ref[...].reshape(1, 1, 1, C), (B, H + 2, W + 2, C))

    def lif_step(x, v_ref, vth):
        # tau = 2.0, decay_input=True, v_reset = 0 (hard reset)
        v = v_ref[...]
        h = v + (x - v) * 0.5
        s = (h >= vth).astype(jnp.float32)
        v_ref[...] = h * (1.0 - s)
        return s

    def dw3x3(pad_ref, y4, dw_ref, ch):
        # depthwise 3x3, valid, on the pre-filled padded scratch
        pad_ref[:, 1:H + 1, 1:W + 1, :] = y4
        acc = jnp.zeros((B, H, W, ch), jnp.float32)
        for dh in range(3):
            for dwi in range(3):
                acc = acc + (pad_ref[:, dh:dh + H, dwi:dwi + W, :] *
                             dw_ref[dh:dh + 1, dwi:dwi + 1, :])
        return acc

    # ---- head_lif --------------------------------------------------------
    xs = lif_step(x_ref[0].astype(jnp.float32), v_head, 1.0)          # (M, C)

    # ---- fused q/k/v RepConv (+ folded outer BN) --------------------------
    y = jnp.dot(xs, w1q_ref[...], preferred_element_type=jnp.float32)  # (M, 3C)
    y = y * s1q_ref[...] + t1q_ref[...]
    acc = dw3x3(pad_q, y.reshape(B, H, W, C3), dwq_ref, C3).reshape(M, C3)

    spikes = []
    for i, vmem in enumerate((v_q, v_k, v_v)):
        # zero-extended (3C, C) second 1x1: identical math, no lane slicing
        z = jnp.dot(acc, w2q_ref[i], preferred_element_type=jnp.float32)
        z = z * s2q_ref[i] + t2q_ref[i]
        spikes.append(lif_step(z, vmem, 1.0).reshape(B, N, C))         # q/k/v LIF
    q, k, v = spikes

    # ---- attention: per-head kv = k^T v ; out = q @ kv * scale ------------
    # block-diagonal head mask over the C channel axis == per-head attention
    kv = jnp.einsum("bnc,bnd->bcd", k, v, preferred_element_type=jnp.float32)
    kv = kv * mask_ref[...]
    attn = jnp.einsum("bnc,bcd->bnd", q, kv,
                      preferred_element_type=jnp.float32) * scale

    # ---- attn_lif (v_threshold = 0.5); elementwise, layout-agnostic --------
    a = lif_step(attn.reshape(M, C), v_attn, 0.5)

    # ---- proj RepConv (+ folded outer BN) ----------------------------------
    y2 = jnp.dot(a, w1p_ref[...], preferred_element_type=jnp.float32)
    y2 = y2 * s1p_ref[...] + t1p_ref[...]
    acc2 = dw3x3(pad_p, y2.reshape(B, H, W, C), dwp_ref, C).reshape(M, C)
    z2 = jnp.dot(acc2, w2p_ref[...], preferred_element_type=jnp.float32)
    o_ref[0] = z2 * s2p_ref[...] + t2p_ref[...]


# --------------------------- host-side packing ------------------------------
def _pack_qkv(pq, pk, pv, C):
    """Fuse the three RepConv branches (q/k/v) into stacked weights."""
    w1 = jnp.concatenate([pq["w1"], pk["w1"], pv["w1"]], axis=1)        # (C, 3C)
    s1 = jnp.concatenate([pq["s1"], pk["s1"], pv["s1"]]).reshape(1, 3 * C)
    t1 = jnp.concatenate([pq["t1"], pk["t1"], pv["t1"]]).reshape(1, 3 * C)
    dw = jnp.concatenate([pq["dw"], pk["dw"], pv["dw"]], axis=2)        # (3,3,3C)

    def ext(w2, i):  # second 1x1 only sees its own channel group
        z = jnp.zeros((3 * C, C), jnp.float32)
        return z.at[i * C:(i + 1) * C, :].set(w2)

    w2 = jnp.stack([ext(pq["w2"], 0), ext(pk["w2"], 1), ext(pv["w2"], 2)])
    s2 = jnp.stack([pq["s2"], pk["s2"], pv["s2"]]).reshape(3, 1, C)
    t2 = jnp.stack([pq["t2"], pk["t2"], pv["t2"]]).reshape(3, 1, C)
    return w1, s1, t1, dw, w2, s2, t2


def _full_spec(shape):
    zeros = (0,) * len(shape)
    return pl.BlockSpec(shape, lambda t, _z=zeros: _z)


def ms_attention_forward(x, params, num_heads):
    """x: (T, B, C, H, W) float32 -> (T, B, C, H, W)."""
    T, B, C, H, W = x.shape
    M = B * H * W
    C3 = 3 * C
    Dh = C // num_heads

    # channels-last, one (M, C) slab per time step (reshape/transpose is free
    # relative to the fused kernel work; C rides on the lane axis)
    xn = jnp.transpose(x, (0, 1, 3, 4, 2)).reshape(T, M, C)

    w1q, s1q, t1q, dwq, w2q, s2q, t2q = _pack_qkv(
        params["q"], params["k"], params["v"], C)
    pp = params["proj"]
    head_mask = (jnp.arange(C)[:, None] // Dh ==
                 jnp.arange(C)[None, :] // Dh).astype(jnp.float32)      # (C, C)

    kernel = functools.partial(_fused_block_kernel,
                               B=B, H=H, W=W, C=C, scale=0.125)

    out = pl.pallas_call(
        kernel,
        out_shape=jax.ShapeDtypeStruct((T, M, C), jnp.float32),
        grid_spec=pltpu.PrefetchScalarGridSpec(
            num_scalar_prefetch=0,
            grid=(T,),
            in_specs=[
                pl.BlockSpec((1, M, C), lambda t: (t, 0, 0)),   # x (spikes src)
                _full_spec((C, C3)),                            # fused w1
                _full_spec((1, C3)), _full_spec((1, C3)),       # s1, t1
                _full_spec((3, 3, C3)),                         # fused dw 3x3
                _full_spec((3, C3, C)),                         # w2 (q/k/v, 0-ext)
                _full_spec((3, 1, C)), _full_spec((3, 1, C)),   # s2, t2
                _full_spec((C, C)),                             # head mask
                _full_spec((C, C)),                             # proj w1
                _full_spec((1, C)), _full_spec((1, C)),         # proj s1, t1
                _full_spec((3, 3, C)),                          # proj dw 3x3
                _full_spec((C, C)),                             # proj w2
                _full_spec((1, C)), _full_spec((1, C)),         # proj s2, t2
            ],
            out_specs=pl.BlockSpec((1, M, C), lambda t: (t, 0, 0)),
            scratch_shapes=[
                pltpu.VMEM((M, C), jnp.float32),                # head_lif membrane
                pltpu.VMEM((M, C), jnp.float32),                # q_lif membrane
                pltpu.VMEM((M, C), jnp.float32),                # k_lif membrane
                pltpu.VMEM((M, C), jnp.float32),                # v_lif membrane
                pltpu.VMEM((M, C), jnp.float32),                # attn_lif membrane
                pltpu.VMEM((B, H + 2, W + 2, C3), jnp.float32),  # qkv padded
                pltpu.VMEM((B, H + 2, W + 2, C), jnp.float32),   # proj padded
            ],
        ),
        # T carries LIF state -> sequential.  TODO(synk): for v7x (2 TCs) add a
        # parallel grid axis over B chunks; B=2 here so it is left serial.
        compiler_params=pltpu.CompilerParams(
            dimension_semantics=("arbitrary",)),
    )(xn, w1q, s1q, t1q, dwq, w2q, s2q, t2q, head_mask,
      pp["w1"], pp["s1"].reshape(1, C), pp["t1"].reshape(1, C), pp["dw"],
      pp["w2"], pp["s2"].reshape(1, C), pp["t2"].reshape(1, C))

    out = out.reshape(T, B, H, W, C)
    return jnp.transpose(out, (0, 1, 4, 2, 3))


# --------------------------- deterministic parameters ----------------------
def _make_bn(key, C, eps=1e-5):
    k1, k2, k3, k4 = jax.random.split(key, 4)
    w = jax.random.uniform(k1, (C,), minval=0.5, maxval=1.5)
    b = jax.random.normal(k2, (C,)) * 0.1
    mean = jax.random.normal(k3, (C,)) * 0.1
    var = jax.random.uniform(k4, (C,), minval=0.5, maxval=1.5)
    scale = w / jnp.sqrt(var + eps)
    shift = b - mean * scale
    return scale.astype(jnp.float32), shift.astype(jnp.float32)


def make_repconv_params(key, C):
    ks = jax.random.split(key, 6)
    w1 = (jax.random.normal(ks[0], (C, C)) / jnp.sqrt(C)).astype(jnp.float32)
    s1, t1 = _make_bn(ks[1], C)                     # BNAndPadLayer (pad value = t1)
    dw = (jax.random.normal(ks[2], (3, 3, C)) * 0.2).astype(jnp.float32)
    w2 = (jax.random.normal(ks[3], (C, C)) / jnp.sqrt(C)).astype(jnp.float32)
    s2a, t2a = _make_bn(ks[4], C)                   # BN inside conv3x3 sequential
    s2b, t2b = _make_bn(ks[5], C)                   # outer BN after RepConv
    return dict(w1=w1, s1=s1, t1=t1, dw=dw, w2=w2,
                s2=(s2a * s2b).astype(jnp.float32),
                t2=(t2a * s2b + t2b).astype(jnp.float32))


# --------------------------- pure-JAX reference (for checking) -------------
def _lif_ref(x, tau, vth):
    def step(v, xt):
        h = v + (xt - v) / tau
        s = (h >= vth).astype(jnp.float32)
        return h * (1.0 - s), s
    _, out = jax.lax.scan(step, jnp.zeros_like(x[0]), x)
    return out


def _repconv_ref(x, p):
    TB, H, W, C = x.shape
    hp = jax.lax.Precision.HIGHEST
    y = jnp.einsum("bhwc,cd->bhwd", x, p["w1"], precision=hp)
    y = y * p["s1"] + p["t1"]
    padded = jnp.broadcast_to(p["t1"].reshape(1, 1, 1, C), (TB, H + 2, W + 2, C))
    padded = padded.at[:, 1:H + 1, 1:W + 1, :].set(y)
    acc = jnp.zeros((TB, H, W, C), jnp.float32)
    for dh in range(3):
        for dw in range(3):
            acc = acc + padded[:, dh:dh + H, dw:dw + W, :] * p["dw"][dh, dw]
    z = jnp.einsum("bhwc,cd->bhwd", acc, p["w2"], precision=hp)
    return z * p["s2"] + p["t2"]


def _attn_ref(q, k, v, scale):
    hp = jax.lax.Precision.HIGHEST
    kv = jnp.einsum("bhnd,bhne->bhde", k, v, precision=hp)
    return jnp.einsum("bhnd,bhde->bhne", q, kv, precision=hp) * scale


def _reference_forward(x, params, num_heads):
    T, B, C, H, W = x.shape
    N = H * W
    Dh = C // num_heads
    scale = 0.125
    xn = jnp.transpose(x, (0, 1, 3, 4, 2))                 # (T, B, H, W, C)
    xs = _lif_ref(xn.reshape(T, B * N, C), 2.0, 1.0)       # head_lif
    xs = xs.reshape(T * B, H, W, C)
    q = _repconv_ref(xs, params["q"])
    k = _repconv_ref(xs, params["k"])
    v = _repconv_ref(xs, params["v"])
    q = _lif_ref(q.reshape(T, B * N, C), 2.0, 1.0)
    k = _lif_ref(k.reshape(T, B * N, C), 2.0, 1.0)
    v = _lif_ref(v.reshape(T, B * N, C), 2.0, 1.0)

    def to_heads(a):  # (T, B*N, C) -> (T*B, heads, N, Dh)
        a = a.reshape(T * B, N, num_heads, Dh)
        return jnp.transpose(a, (0, 2, 1, 3))

    attn = _attn_ref(to_heads(q), to_heads(k), to_heads(v), scale)
    attn = jnp.transpose(attn, (0, 1, 3, 2)).reshape(T, B, C, N)
    attn = _lif_ref(attn.reshape(T, B * C, N), 2.0, 0.5)    # attn_lif (v_th=0.5)
    attn = jnp.transpose(attn.reshape(T * B, C, H, W), (0, 2, 3, 1))
    out = _repconv_ref(attn, params["proj"])
    return jnp.transpose(out.reshape(T, B, H, W, C), (0, 1, 4, 2, 3))


# --------------------------- main -------------------------------------------
if __name__ == "__main__":
    T, B, C, H, W = 2, 2, 32, 8, 8
    num_heads = 4

    key = jax.random.PRNGKey(0)
    kx, kq, kk, kv, kp = jax.random.split(key, 5)
    x = (jax.random.normal(kx, (T, B, C, H, W)) * 2.0).astype(jnp.float32)
    params = {
        "q": make_repconv_params(kq, C),
        "k": make_repconv_params(kk, C),
        "v": make_repconv_params(kv, C),
        "proj": make_repconv_params(kp, C),
    }

    fwd = jax.jit(functools.partial(ms_attention_forward, num_heads=num_heads))
    out = jax.block_until_ready(fwd(x, params))

    # correctness check vs plain-JAX reference (original per-branch math)
    ref = _reference_forward(x, params, num_heads)
    diff = jnp.abs(out - ref)
    # tolerate (very rare) LIF spike flips from sub-ulp matmul ordering diffs
    frac_bad = float(jnp.mean((diff > 1e-2).astype(jnp.float32)))

    assert out.shape == (T, B, C, H, W)
    assert bool(jnp.all(jnp.isfinite(out)))
    assert frac_bad < 0.005, f"mismatch fraction {frac_bad}"
    print("KERNEL_OK")
</pallas_src>

<mosaic_0001>
module attributes {stable_mosaic.version = 11 : i64} {
  func.func @_fused_block_kernel(%arg0: i32, %arg1: memref<1x128x32xf32, #tpu.memory_space<vmem>>, %arg2: memref<32x96xf32, #tpu.memory_space<vmem>>, %arg3: memref<1x96xf32, #tpu.memory_space<vmem>>, %arg4: memref<1x96xf32, #tpu.memory_space<vmem>>, %arg5: memref<3x3x96xf32, #tpu.memory_space<vmem>>, %arg6: memref<3x96x32xf32, #tpu.memory_space<vmem>>, %arg7: memref<3x1x32xf32, #tpu.memory_space<vmem>>, %arg8: memref<3x1x32xf32, #tpu.memory_space<vmem>>, %arg9: memref<32x32xf32, #tpu.memory_space<vmem>>, %arg10: memref<32x32xf32, #tpu.memory_space<vmem>>, %arg11: memref<1x32xf32, #tpu.memory_space<vmem>>, %arg12: memref<1x32xf32, #tpu.memory_space<vmem>>, %arg13: memref<3x3x32xf32, #tpu.memory_space<vmem>>, %arg14: memref<32x32xf32, #tpu.memory_space<vmem>>, %arg15: memref<1x32xf32, #tpu.memory_space<vmem>>, %arg16: memref<1x32xf32, #tpu.memory_space<vmem>>, %arg17: memref<1x128x32xf32, #tpu.memory_space<vmem>>, %arg18: memref<128x32xf32, #tpu.memory_space<vmem>>, %arg19: memref<128x32xf32, #tpu.memory_space<vmem>>, %arg20: memref<128x32xf32, #tpu.memory_space<vmem>>, %arg21: memref<128x32xf32, #tpu.memory_space<vmem>>, %arg22: memref<128x32xf32, #tpu.memory_space<vmem>>, %arg23: memref<2x10x10x96xf32, #tpu.memory_space<vmem>>, %arg24: memref<2x10x10x32xf32, #tpu.memory_space<vmem>>) attributes {dimension_semantics = [#tpu.dimension_semantics<arbitrary>], iteration_bounds = array<i64: 2>, scalar_prefetch = 0 : i64, scratch_operands = 7 : i64, tpu.core_type = #tpu.core_type<tc>, window_params = [{transform_indices = @transform_0, window_bounds = array<i64: 1, 128, 32>}, {pipeline_mode = #tpu.pipeline_mode<synchronous>, transform_indices = @transform_1, window_bounds = array<i64: 32, 96>}, {pipeline_mode = #tpu.pipeline_mode<synchronous>, transform_indices = @transform_2, window_bounds = array<i64: 1, 96>}, {pipeline_mode = #tpu.pipeline_mode<synchronous>, transform_indices = @transform_3, window_bounds = array<i64: 1, 96>}, {pipeline_mode = #tpu.pipeline_mode<synchronous>, transform_indices = @transform_4, window_bounds = array<i64: 3, 3, 96>}, {pipeline_mode = #tpu.pipeline_mode<synchronous>, transform_indices = @transform_5, window_bounds = array<i64: 3, 96, 32>}, {pipeline_mode = #tpu.pipeline_mode<synchronous>, transform_indices = @transform_6, window_bounds = array<i64: 3, 1, 32>}, {pipeline_mode = #tpu.pipeline_mode<synchronous>, transform_indices = @transform_7, window_bounds = array<i64: 3, 1, 32>}, {pipeline_mode = #tpu.pipeline_mode<synchronous>, transform_indices = @transform_8, window_bounds = array<i64: 32, 32>}, {pipeline_mode = #tpu.pipeline_mode<synchronous>, transform_indices = @transform_9, window_bounds = array<i64: 32, 32>}, {pipeline_mode = #tpu.pipeline_mode<synchronous>, transform_indices = @transform_10, window_bounds = array<i64: 1, 32>}, {pipeline_mode = #tpu.pipeline_mode<synchronous>, transform_indices = @transform_11, window_bounds = array<i64: 1, 32>}, {pipeline_mode = #tpu.pipeline_mode<synchronous>, transform_indices = @transform_12, window_bounds = array<i64: 3, 3, 32>}, {pipeline_mode = #tpu.pipeline_mode<synchronous>, transform_indices = @transform_13, window_bounds = array<i64: 32, 32>}, {pipeline_mode = #tpu.pipeline_mode<synchronous>, transform_indices = @transform_14, window_bounds = array<i64: 1, 32>}, {pipeline_mode = #tpu.pipeline_mode<synchronous>, transform_indices = @transform_15, window_bounds = array<i64: 1, 32>}, {transform_indices = @transform_16, window_bounds = array<i64: 1, 128, 32>}]} {
    %c0_i32 = arith.constant 0 : i32
    %0 = arith.cmpi eq, %arg0, %c0_i32 : i32
    %1 = arith.extui %0 : i1 to i32
    %c0_i32_0 = arith.constant 0 : i32
    %2 = arith.cmpi ne, %1, %c0_i32_0 : i32
    scf.if %2 {
      %cst_230 = arith.constant 0.000000e+00 : f32
      %258 = vector.broadcast %cst_230 : f32 to vector<128x32xf32>
      %c0_231 = arith.constant 0 : index
      %c0_232 = arith.constant 0 : index
      %259 = vector.load %arg18[%c0_231, %c0_232] : memref<128x32xf32, #tpu.memory_space<vmem>>, vector<128x32xf32>
      tpu.vector_store %arg18[%c0_231, %c0_232], %258 {strides = array<i32>} : memref<128x32xf32, #tpu.memory_space<vmem>>, vector<128x32xf32>,
      %cst_233 = arith.constant 0.000000e+00 : f32
      %260 = vector.broadcast %cst_233 : f32 to vector<128x32xf32>
      %c0_234 = arith.constant 0 : index
      %c0_235 = arith.constant 0 : index
      %261 = vector.load %arg19[%c0_234, %c0_235] : memref<128x32xf32, #tpu.memory_space<vmem>>, vector<128x32xf32>
      tpu.vector_store %arg19[%c0_234, %c0_235], %260 {strides = array<i32>} : memref<128x32xf32, #tpu.memory_space<vmem>>, vector<128x32xf32>,
      %cst_236 = arith.constant 0.000000e+00 : f32
      %262 = vector.broadcast %cst_236 : f32 to vector<128x32xf32>
      %c0_237 = arith.constant 0 : index
      %c0_238 = arith.constant 0 : index
      %263 = vector.load %arg20[%c0_237, %c0_238] : memref<128x32xf32, #tpu.memory_space<vmem>>, vector<128x32xf32>
      tpu.vector_store %arg20[%c0_237, %c0_238], %262 {strides = array<i32>} : memref<128x32xf32, #tpu.memory_space<vmem>>, vector<128x32xf32>,
      %cst_239 = arith.constant 0.000000e+00 : f32
      %264 = vector.broadcast %cst_239 : f32 to vector<128x32xf32>
      %c0_240 = arith.constant 0 : index
      %c0_241 = arith.constant 0 : index
      %265 = vector.load %arg21[%c0_240, %c0_241] : memref<128x32xf32, #tpu.memory_space<vmem>>, vector<128x32xf32>
      tpu.vector_store %arg21[%c0_240, %c0_241], %264 {strides = array<i32>} : memref<128x32xf32, #tpu.memory_space<vmem>>, vector<128x32xf32>,
      %cst_242 = arith.constant 0.000000e+00 : f32
      %266 = vector.broadcast %cst_242 : f32 to vector<128x32xf32>
      %c0_243 = arith.constant 0 : index
      %c0_244 = arith.constant 0 : index
      %267 = vector.load %arg22[%c0_243, %c0_244] : memref<128x32xf32, #tpu.memory_space<vmem>>, vector<128x32xf32>
      tpu.vector_store %arg22[%c0_243, %c0_244], %266 {strides = array<i32>} : memref<128x32xf32, #tpu.memory_space<vmem>>, vector<128x32xf32>,
      %c0_245 = arith.constant 0 : index
      %c0_246 = arith.constant 0 : index
      %268 = vector.load %arg4[%c0_245, %c0_246] : memref<1x96xf32, #tpu.memory_space<vmem>>, vector<1x96xf32>
      %269 = vector.shape_cast %268 : vector<1x96xf32> to vector<1x1x1x96xf32>
      %270 = vector.shape_cast %269 : vector<1x1x1x96xf32> to vector<1x1x1x96xf32>
      %271 = vector.broadcast %270 : vector<1x1x1x96xf32> to vector<2x10x10x96xf32>
      %c0_247 = arith.constant 0 : index
      %c0_248 = arith.constant 0 : index
      %c0_249 = arith.constant 0 : index
      %c0_250 = arith.constant 0 : index
      %272 = vector.load %arg23[%c0_247, %c0_248, %c0_249, %c0_250] : memref<2x10x10x96xf32, #tpu.memory_space<vmem>>, vector<2x10x10x96xf32>
      tpu.vector_store %arg23[%c0_247, %c0_248, %c0_249, %c0_250], %271 {strides = array<i32>} : memref<2x10x10x96xf32, #tpu.memory_space<vmem>>, vector<2x10x10x96xf32>,
      %c0_251 = arith.constant 0 : index
      %c0_252 = arith.constant 0 : index
      %273 = vector.load %arg12[%c0_251, %c0_252] : memref<1x32xf32, #tpu.memory_space<vmem>>, vector<1x32xf32>
      %274 = vector.shape_cast %273 : vector<1x32xf32> to vector<1x1x1x32xf32>
      %275 = vector.shape_cast %274 : vector<1x1x1x32xf32> to vector<1x1x1x32xf32>
      %276 = vector.broadcast %275 : vector<1x1x1x32xf32> to vector<2x10x10x32xf32>
      %c0_253 = arith.constant 0 : index
      %c0_254 = arith.constant 0 : index
      %c0_255 = arith.constant 0 : index
      %c0_256 = arith.constant 0 : index
      %277 = vector.load %arg24[%c0_253, %c0_254, %c0_255, %c0_256] : memref<2x10x10x32xf32, #tpu.memory_space<vmem>>, vector<2x10x10x32xf32>
      tpu.vector_store %arg24[%c0_253, %c0_254, %c0_255, %c0_256], %276 {strides = array<i32>} : memref<2x10x10x32xf32, #tpu.memory_space<vmem>>, vector<2x10x10x32xf32>,
    } else {
    }
    %c0 = arith.constant 0 : index
    %c0_1 = arith.constant 0 : index
    %c0_2 = arith.constant 0 : index
    %3 = vector.load %arg1[%c0, %c0_1, %c0_2] : memref<1x128x32xf32, #tpu.memory_space<vmem>>, vector<1x128x32xf32>
    %4 = vector.shape_cast %3 : vector<1x128x32xf32> to vector<128x32xf32>
    %c0_3 = arith.constant 0 : index
    %c0_4 = arith.constant 0 : index
    %5 = vector.load %arg18[%c0_3, %c0_4] : memref<128x32xf32, #tpu.memory_space<vmem>>, vector<128x32xf32>
    %6 = arith.subf %4, %5 : vector<128x32xf32>
    %cst = arith.constant 5.000000e-01 : f32
    %7 = vector.broadcast %cst : f32 to vector<128x32xf32>
    %8 = arith.mulf %6, %7 : vector<128x32xf32>
    %9 = arith.addf %5, %8 : vector<128x32xf32>
    %cst_5 = arith.constant 1.000000e+00 : f32
    %10 = vector.broadcast %cst_5 : f32 to vector<128x32xf32>
    %11 = arith.cmpf oge, %9, %10 : vector<128x32xf32>
    %12 = arith.extui %11 : vector<128x32xi1> to vector<128x32xi32>
    %13 = arith.sitofp %12 : vector<128x32xi32> to vector<128x32xf32>
    %cst_6 = arith.constant 1.000000e+00 : f32
    %14 = vector.broadcast %cst_6 : f32 to vector<128x32xf32>
    %15 = arith.subf %14, %13 : vector<128x32xf32>
    %16 = arith.mulf %9, %15 : vector<128x32xf32>
    %c0_7 = arith.constant 0 : index
    %c0_8 = arith.constant 0 : index
    %17 = vector.load %arg18[%c0_7, %c0_8] : memref<128x32xf32, #tpu.memory_space<vmem>>, vector<128x32xf32>
    tpu.vector_store %arg18[%c0_7, %c0_8], %16 {strides = array<i32>} : memref<128x32xf32, #tpu.memory_space<vmem>>, vector<128x32xf32>,
    %c0_9 = arith.constant 0 : index
    %c0_10 = arith.constant 0 : index
    %18 = vector.load %arg2[%c0_9, %c0_10] : memref<32x96xf32, #tpu.memory_space<vmem>>, vector<32x96xf32>
    %cst_11 = arith.constant dense<0.000000e+00> : vector<128x96xf32>
    %19 = tpu.matmul %13, %18, %cst_11 {dimension_numbers = #tpu.dot_dimension_numbers<[1], [0], [0], [1], [0, 0, 1, 1], [], []>} : vector<128x32xf32>, vector<32x96xf32>, vector<128x96xf32> -> vector<128x96xf32>
    %c0_12 = arith.constant 0 : index
    %c0_13 = arith.constant 0 : index
    %20 = vector.load %arg3[%c0_12, %c0_13] : memref<1x96xf32, #tpu.memory_space<vmem>>, vector<1x96xf32>
    %21 = vector.broadcast %20 : vector<1x96xf32> to vector<128x96xf32>
    %22 = arith.mulf %19, %21 : vector<128x96xf32>
    %c0_14 = arith.constant 0 : index
    %c0_15 = arith.constant 0 : index
    %23 = vector.load %arg4[%c0_14, %c0_15] : memref<1x96xf32, #tpu.memory_space<vmem>>, vector<1x96xf32>
    %24 = vector.broadcast %23 : vector<1x96xf32> to vector<128x96xf32>
    %25 = arith.addf %22, %24 : vector<128x96xf32>
    %26 = vector.shape_cast %25 : vector<128x96xf32> to vector<2x8x8x96xf32>
    %c0_16 = arith.constant 0 : index
    %c1 = arith.constant 1 : index
    %c1_17 = arith.constant 1 : index
    %c0_18 = arith.constant 0 : index
    %27 = vector.load %arg23[%c0_16, %c1, %c1_17, %c0_18] : memref<2x10x10x96xf32, #tpu.memory_space<vmem>>, vector<2x8x8x96xf32>
    tpu.vector_store %arg23[%c0_16, %c1, %c1_17, %c0_18], %26 {strides = array<i32>} : memref<2x10x10x96xf32, #tpu.memory_space<vmem>>, vector<2x8x8x96xf32>,
    %cst_19 = arith.constant 0.000000e+00 : f32
    %28 = vector.broadcast %cst_19 : f32 to vector<2x8x8x96xf32>
    %c0_20 = arith.constant 0 : index
    %c0_21 = arith.constant 0 : index
    %c0_22 = arith.constant 0 : index
    %c0_23 = arith.constant 0 : index
    %29 = vector.load %arg23[%c0_20, %c0_21, %c0_22, %c0_23] : memref<2x10x10x96xf32, #tpu.memory_space<vmem>>, vector<2x8x8x96xf32>
    %c0_24 = arith.constant 0 : index
    %c0_25 = arith.constant 0 : index
    %c0_26 = arith.constant 0 : index
    %30 = vector.load %arg5[%c0_24, %c0_25, %c0_26] : memref<3x3x96xf32, #tpu.memory_space<vmem>>, vector<1x1x96xf32>
    %31 = vector.shape_cast %30 : vector<1x1x96xf32> to vector<1x1x1x96xf32>
    %32 = vector.broadcast %31 : vector<1x1x1x96xf32> to vector<2x8x8x96xf32>
    %33 = arith.mulf %29, %32 : vector<2x8x8x96xf32>
    %34 = arith.addf %28, %33 : vector<2x8x8x96xf32>
    %c0_27 = arith.constant 0 : index
    %c0_28 = arith.constant 0 : index
    %c1_29 = arith.constant 1 : index
    %c0_30 = arith.constant 0 : index
    %35 = vector.load %arg23[%c0_27, %c0_28, %c1_29, %c0_30] : memref<2x10x10x96xf32, #tpu.memory_space<vmem>>, vector<2x8x8x96xf32>
    %c0_31 = arith.constant 0 : index
    %c1_32 = arith.constant 1 : index
    %c0_33 = arith.constant 0 : index
    %36 = vector.load %arg5[%c0_31, %c1_32, %c0_33] : memref<3x3x96xf32, #tpu.memory_space<vmem>>, vector<1x1x96xf32>
    %37 = vector.shape_cast %36 : vector<1x1x96xf32> to vector<1x1x1x96xf32>
    %38 = vector.broadcast %37 : vector<1x1x1x96xf32> to vector<2x8x8x96xf32>
    %39 = arith.mulf %35, %38 : vector<2x8x8x96xf32>
    %40 = arith.addf %34, %39 : vector<2x8x8x96xf32>
    %c0_34 = arith.constant 0 : index
    %c0_35 = arith.constant 0 : index
    %c2 = arith.constant 2 : index
    %c0_36 = arith.constant 0 : index
    %41 = vector.load %arg23[%c0_34, %c0_35, %c2, %c0_36] : memref<2x10x10x96xf32, #tpu.memory_space<vmem>>, vector<2x8x8x96xf32>
    %c0_37 = arith.constant 0 : index
    %c2_38 = arith.constant 2 : index
    %c0_39 = arith.constant 0 : index
    %42 = vector.load %arg5[%c0_37, %c2_38, %c0_39] : memref<3x3x96xf32, #tpu.memory_space<vmem>>, vector<1x1x96xf32>
    %43 = vector.shape_cast %42 : vector<1x1x96xf32> to vector<1x1x1x96xf32>
    %44 = vector.broadcast %43 : vector<1x1x1x96xf32> to vector<2x8x8x96xf32>
    %45 = arith.mulf %41, %44 : vector<2x8x8x96xf32>
    %46 = arith.addf %40, %45 : vector<2x8x8x96xf32>
    %c0_40 = arith.constant 0 : index
    %c1_41 = arith.constant 1 : index
    %c0_42 = arith.constant 0 : index
    %c0_43 = arith.constant 0 : index
    %47 = vector.load %arg23[%c0_40, %c1_41, %c0_42, %c0_43] : memref<2x10x10x96xf32, #tpu.memory_space<vmem>>, vector<2x8x8x96xf32>
    %c1_44 = arith.constant 1 : index
    %c0_45 = arith.constant 0 : index
    %c0_46 = arith.constant 0 : index
    %48 = vector.load %arg5[%c1_44, %c0_45, %c0_46] : memref<3x3x96xf32, #tpu.memory_space<vmem>>, vector<1x1x96xf32>
    %49 = vector.shape_cast %48 : vector<1x1x96xf32> to vector<1x1x1x96xf32>
    %50 = vector.broadcast %49 : vector<1x1x1x96xf32> to vector<2x8x8x96xf32>
    %51 = arith.mulf %47, %50 : vector<2x8x8x96xf32>
    %52 = arith.addf %46, %51 : vector<2x8x8x96xf32>
    %c0_47 = arith.constant 0 : index
    %c1_48 = arith.constant 1 : index
    %c1_49 = arith.constant 1 : index
    %c0_50 = arith.constant 0 : index
    %53 = vector.load %arg23[%c0_47, %c1_48, %c1_49, %c0_50] : memref<2x10x10x96xf32, #tpu.memory_space<vmem>>, vector<2x8x8x96xf32>
    %c1_51 = arith.constant 1 : index
    %c1_52 = arith.constant 1 : index
    %c0_53 = arith.constant 0 : index
    %54 = vector.load %arg5[%c1_51, %c1_52, %c0_53] : memref<3x3x96xf32, #tpu.memory_space<vmem>>, vector<1x1x96xf32>
    %55 = vector.shape_cast %54 : vector<1x1x96xf32> to vector<1x1x1x96xf32>
    %56 = vector.broadcast %55 : vector<1x1x1x96xf32> to vector<2x8x8x96xf32>
    %57 = arith.mulf %53, %56 : vector<2x8x8x96xf32>
    %58 = arith.addf %52, %57 : vector<2x8x8x96xf32>
    %c0_54 = arith.constant 0 : index
    %c1_55 = arith.constant 1 : index
    %c2_56 = arith.constant 2 : index
    %c0_57 = arith.constant 0 : index
    %59 = vector.load %arg23[%c0_54, %c1_55, %c2_56, %c0_57] : memref<2x10x10x96xf32, #tpu.memory_space<vmem>>, vector<2x8x8x96xf32>
    %c1_58 = arith.constant 1 : index
    %c2_59 = arith.constant 2 : index
    %c0_60 = arith.constant 0 : index
    %60 = vector.load %arg5[%c1_58, %c2_59, %c0_60] : memref<3x3x96xf32, #tpu.memory_space<vmem>>, vector<1x1x96xf32>
    %61 = vector.shape_cast %60 : vector<1x1x96xf32> to vector<1x1x1x96xf32>
    %62 = vector.broadcast %61 : vector<1x1x1x96xf32> to vector<2x8x8x96xf32>
    %63 = arith.mulf %59, %62 : vector<2x8x8x96xf32>
    %64 = arith.addf %58, %63 : vector<2x8x8x96xf32>
    %c0_61 = arith.constant 0 : index
    %c2_62 = arith.constant 2 : index
    %c0_63 = arith.constant 0 : index
    %c0_64 = arith.constant 0 : index
    %65 = vector.load %arg23[%c0_61, %c2_62, %c0_63, %c0_64] : memref<2x10x10x96xf32, #tpu.memory_space<vmem>>, vector<2x8x8x96xf32>
    %c2_65 = arith.constant 2 : index
    %c0_66 = arith.constant 0 : index
    %c0_67 = arith.constant 0 : index
    %66 = vector.load %arg5[%c2_65, %c0_66, %c0_67] : memref<3x3x96xf32, #tpu.memory_space<vmem>>, vector<1x1x96xf32>
    %67 = vector.shape_cast %66 : vector<1x1x96xf32> to vector<1x1x1x96xf32>
    %68 = vector.broadcast %67 : vector<1x1x1x96xf32> to vector<2x8x8x96xf32>
    %69 = arith.mulf %65, %68 : vector<2x8x8x96xf32>
    %70 = arith.addf %64, %69 : vector<2x8x8x96xf32>
    %c0_68 = arith.constant 0 : index
    %c2_69 = arith.constant 2 : index
    %c1_70 = arith.constant 1 : index
    %c0_71 = arith.constant 0 : index
    %71 = vector.load %arg23[%c0_68, %c2_69, %c1_70, %c0_71] : memref<2x10x10x96xf32, #tpu.memory_space<vmem>>, vector<2x8x8x96xf32>
    %c2_72 = arith.constant 2 : index
    %c1_73 = arith.constant 1 : index
    %c0_74 = arith.constant 0 : index
    %72 = vector.load %arg5[%c2_72, %c1_73, %c0_74] : memref<3x3x96xf32, #tpu.memory_space<vmem>>, vector<1x1x96xf32>
    %73 = vector.shape_cast %72 : vector<1x1x96xf32> to vector<1x1x1x96xf32>
    %74 = vector.broadcast %73 : vector<1x1x1x96xf32> to vector<2x8x8x96xf32>
    %75 = arith.mulf %71, %74 : vector<2x8x8x96xf32>
    %76 = arith.addf %70, %75 : vector<2x8x8x96xf32>
    %c0_75 = arith.constant 0 : index
    %c2_76 = arith.constant 2 : index
    %c2_77 = arith.constant 2 : index
    %c0_78 = arith.constant 0 : index
    %77 = vector.load %arg23[%c0_75, %c2_76, %c2_77, %c0_78] : memref<2x10x10x96xf32, #tpu.memory_space<vmem>>, vector<2x8x8x96xf32>
    %c2_79 = arith.constant 2 : index
    %c2_80 = arith.constant 2 : index
    %c0_81 = arith.constant 0 : index
    %78 = vector.load %arg5[%c2_79, %c2_80, %c0_81] : memref<3x3x96xf32, #tpu.memory_space<vmem>>, vector<1x1x96xf32>
    %79 = vector.shape_cast %78 : vector<1x1x96xf32> to vector<1x1x1x96xf32>
    %80 = vector.broadcast %79 : vector<1x1x1x96xf32> to vector<2x8x8x96xf32>
    %81 = arith.mulf %77, %80 : vector<2x8x8x96xf32>
    %82 = arith.addf %76, %81 : vector<2x8x8x96xf32>
    %83 = vector.shape_cast %82 : vector<2x8x8x96xf32> to vector<128x96xf32>
    %c0_82 = arith.constant 0 : index
    %c0_83 = arith.constant 0 : index
    %c0_84 = arith.constant 0 : index
    %84 = vector.load %arg6[%c0_82, %c0_83, %c0_84] : memref<3x96x32xf32, #tpu.memory_space<vmem>>, vector<1x96x32xf32>
    %85 = vector.shape_cast %84 : vector<1x96x32xf32> to vector<96x32xf32>
    %cst_85 = arith.constant dense<0.000000e+00> : vector<128x32xf32>
    %86 = tpu.matmul %83, %85, %cst_85 {dimension_numbers = #tpu.dot_dimension_numbers<[1], [0], [0], [1], [0, 0, 1, 1], [], []>} : vector<128x96xf32>, vector<96x32xf32>, vector<128x32xf32> -> vector<128x32xf32>
    %c0_86 = arith.constant 0 : index
    %c0_87 = arith.constant 0 : index
    %c0_88 = arith.constant 0 : index
    %87 = vector.load %arg7[%c0_86, %c0_87, %c0_88] : memref<3x1x32xf32, #tpu.memory_space<vmem>>, vector<1x1x32xf32>
    %88 = vector.shape_cast %87 : vector<1x1x32xf32> to vector<1x32xf32>
    %89 = vector.broadcast %88 : vector<1x32xf32> to vector<128x32xf32>
    %90 = arith.mulf %86, %89 : vector<128x32xf32>
    %c0_89 = arith.constant 0 : index
    %c0_90 = arith.constant 0 : index
    %c0_91 = arith.constant 0 : index
    %91 = vector.load %arg8[%c0_89, %c0_90, %c0_91] : memref<3x1x32xf32, #tpu.memory_space<vmem>>, vector<1x1x32xf32>
    %92 = vector.shape_cast %91 : vector<1x1x32xf32> to vector<1x32xf32>
    %93 = vector.broadcast %92 : vector<1x32xf32> to vector<128x32xf32>
    %94 = arith.addf %90, %93 : vector<128x32xf32>
    %c0_92 = arith.constant 0 : index
    %c0_93 = arith.constant 0 : index
    %95 = vector.load %arg19[%c0_92, %c0_93] : memref<128x32xf32, #tpu.memory_space<vmem>>, vector<128x32xf32>
    %96 = arith.subf %94, %95 : vector<128x32xf32>
    %cst_94 = arith.constant 5.000000e-01 : f32
    %97 = vector.broadcast %cst_94 : f32 to vector<128x32xf32>
    %98 = arith.mulf %96, %97 : vector<128x32xf32>
    %99 = arith.addf %95, %98 : vector<128x32xf32>
    %cst_95 = arith.constant 1.000000e+00 : f32
    %100 = vector.broadcast %cst_95 : f32 to vector<128x32xf32>
    %101 = arith.cmpf oge, %99, %100 : vector<128x32xf32>
    %102 = arith.extui %101 : vector<128x32xi1> to vector<128x32xi32>
    %103 = arith.sitofp %102 : vector<128x32xi32> to vector<128x32xf32>
    %cst_96 = arith.constant 1.000000e+00 : f32
    %104 = vector.broadcast %cst_96 : f32 to vector<128x32xf32>
    %105 = arith.subf %104, %103 : vector<128x32xf32>
    %106 = arith.mulf %99, %105 : vector<128x32xf32>
    %c0_97 = arith.constant 0 : index
    %c0_98 = arith.constant 0 : index
    %107 = vector.load %arg19[%c0_97, %c0_98] : memref<128x32xf32, #tpu.memory_space<vmem>>, vector<128x32xf32>
    tpu.vector_store %arg19[%c0_97, %c0_98], %106 {strides = array<i32>} : memref<128x32xf32, #tpu.memory_space<vmem>>, vector<128x32xf32>,
    %108 = vector.shape_cast %103 : vector<128x32xf32> to vector<2x64x32xf32>
    %c1_99 = arith.constant 1 : index
    %c0_100 = arith.constant 0 : index
    %c0_101 = arith.constant 0 : index
    %109 = vector.load %arg6[%c1_99, %c0_100, %c0_101] : memref<3x96x32xf32, #tpu.memory_space<vmem>>, vector<1x96x32xf32>
    %110 = vector.shape_cast %109 : vector<1x96x32xf32> to vector<96x32xf32>
    %cst_102 = arith.constant dense<0.000000e+00> : vector<128x32xf32>
    %111 = tpu.matmul %83, %110, %cst_102 {dimension_numbers = #tpu.dot_dimension_numbers<[1], [0], [0], [1], [0, 0, 1, 1], [], []>} : vector<128x96xf32>, vector<96x32xf32>, vector<128x32xf32> -> vector<128x32xf32>
    %c1_103 = arith.constant 1 : index
    %c0_104 = arith.constant 0 : index
    %c0_105 = arith.constant 0 : index
    %112 = vector.load %arg7[%c1_103, %c0_104, %c0_105] : memref<3x1x32xf32, #tpu.memory_space<vmem>>, vector<1x1x32xf32>
    %113 = vector.shape_cast %112 : vector<1x1x32xf32> to vector<1x32xf32>
    %114 = vector.broadcast %113 : vector<1x32xf32> to vector<128x32xf32>
    %115 = arith.mulf %111, %114 : vector<128x32xf32>
    %c1_106 = arith.constant 1 : index
    %c0_107 = arith.constant 0 : index
    %c0_108 = arith.constant 0 : index
    %116 = vector.load %arg8[%c1_106, %c0_107, %c0_108] : memref<3x1x32xf32, #tpu.memory_space<vmem>>, vector<1x1x32xf32>
    %117 = vector.shape_cast %116 : vector<1x1x32xf32> to vector<1x32xf32>
    %118 = vector.broadcast %117 : vector<1x32xf32> to vector<128x32xf32>
    %119 = arith.addf %115, %118 : vector<128x32xf32>
    %c0_109 = arith.constant 0 : index
    %c0_110 = arith.constant 0 : index
    %120 = vector.load %arg20[%c0_109, %c0_110] : memref<128x32xf32, #tpu.memory_space<vmem>>, vector<128x32xf32>
    %121 = arith.subf %119, %120 : vector<128x32xf32>
    %cst_111 = arith.constant 5.000000e-01 : f32
    %122 = vector.broadcast %cst_111 : f32 to vector<128x32xf32>
    %123 = arith.mulf %121, %122 : vector<128x32xf32>
    %124 = arith.addf %120, %123 : vector<128x32xf32>
    %cst_112 = arith.constant 1.000000e+00 : f32
    %125 = vector.broadcast %cst_112 : f32 to vector<128x32xf32>
    %126 = arith.cmpf oge, %124, %125 : vector<128x32xf32>
    %127 = arith.extui %126 : vector<128x32xi1> to vector<128x32xi32>
    %128 = arith.sitofp %127 : vector<128x32xi32> to vector<128x32xf32>
    %cst_113 = arith.constant 1.000000e+00 : f32
    %129 = vector.broadcast %cst_113 : f32 to vector<128x32xf32>
    %130 = arith.subf %129, %128 : vector<128x32xf32>
    %131 = arith.mulf %124, %130 : vector<128x32xf32>
    %c0_114 = arith.constant 0 : index
    %c0_115 = arith.constant 0 : index
    %132 = vector.load %arg20[%c0_114, %c0_115] : memref<128x32xf32, #tpu.memory_space<vmem>>, vector<128x32xf32>
    tpu.vector_store %arg20[%c0_114, %c0_115], %131 {strides = array<i32>} : memref<128x32xf32, #tpu.memory_space<vmem>>, vector<128x32xf32>,
    %133 = vector.shape_cast %128 : vector<128x32xf32> to vector<2x64x32xf32>
    %c2_116 = arith.constant 2 : index
    %c0_117 = arith.constant 0 : index
    %c0_118 = arith.constant 0 : index
    %134 = vector.load %arg6[%c2_116, %c0_117, %c0_118] : memref<3x96x32xf32, #tpu.memory_space<vmem>>, vector<1x96x32xf32>
    %135 = vector.shape_cast %134 : vector<1x96x32xf32> to vector<96x32xf32>
    %cst_119 = arith.constant dense<0.000000e+00> : vector<128x32xf32>
    %136 = tpu.matmul %83, %135, %cst_119 {dimension_numbers = #tpu.dot_dimension_numbers<[1], [0], [0], [1], [0, 0, 1, 1], [], []>} : vector<128x96xf32>, vector<96x32xf32>, vector<128x32xf32> -> vector<128x32xf32>
    %c2_120 = arith.constant 2 : index
    %c0_121 = arith.constant 0 : index
    %c0_122 = arith.constant 0 : index
    %137 = vector.load %arg7[%c2_120, %c0_121, %c0_122] : memref<3x1x32xf32, #tpu.memory_space<vmem>>, vector<1x1x32xf32>
    %138 = vector.shape_cast %137 : vector<1x1x32xf32> to vector<1x32xf32>
    %139 = vector.broadcast %138 : vector<1x32xf32> to vector<128x32xf32>
    %140 = arith.mulf %136, %139 : vector<128x32xf32>
    %c2_123 = arith.constant 2 : index
    %c0_124 = arith.constant 0 : index
    %c0_125 = arith.constant 0 : index
    %141 = vector.load %arg8[%c2_123, %c0_124, %c0_125] : memref<3x1x32xf32, #tpu.memory_space<vmem>>, vector<1x1x32xf32>
    %142 = vector.shape_cast %141 : vector<1x1x32xf32> to vector<1x32xf32>
    %143 = vector.broadcast %142 : vector<1x32xf32> to vector<128x32xf32>
    %144 = arith.addf %140, %143 : vector<128x32xf32>
    %c0_126 = arith.constant 0 : index
    %c0_127 = arith.constant 0 : index
    %145 = vector.load %arg21[%c0_126, %c0_127] : memref<128x32xf32, #tpu.memory_space<vmem>>, vector<128x32xf32>
    %146 = arith.subf %144, %145 : vector<128x32xf32>
    %cst_128 = arith.constant 5.000000e-01 : f32
    %147 = vector.broadcast %cst_128 : f32 to vector<128x32xf32>
    %148 = arith.mulf %146, %147 : vector<128x32xf32>
    %149 = arith.addf %145, %148 : vector<128x32xf32>
    %cst_129 = arith.constant 1.000000e+00 : f32
    %150 = vector.broadcast %cst_129 : f32 to vector<128x32xf32>
    %151 = arith.cmpf oge, %149, %150 : vector<128x32xf32>
    %152 = arith.extui %151 : vector<128x32xi1> to vector<128x32xi32>
    %153 = arith.sitofp %152 : vector<128x32xi32> to vector<128x32xf32>
    %cst_130 = arith.constant 1.000000e+00 : f32
    %154 = vector.broadcast %cst_130 : f32 to vector<128x32xf32>
    %155 = arith.subf %154, %153 : vector<128x32xf32>
    %156 = arith.mulf %149, %155 : vector<128x32xf32>
    %c0_131 = arith.constant 0 : index
    %c0_132 = arith.constant 0 : index
    %157 = vector.load %arg21[%c0_131, %c0_132] : memref<128x32xf32, #tpu.memory_space<vmem>>, vector<128x32xf32>
    tpu.vector_store %arg21[%c0_131, %c0_132], %156 {strides = array<i32>} : memref<128x32xf32, #tpu.memory_space<vmem>>, vector<128x32xf32>,
    %158 = vector.shape_cast %153 : vector<128x32xf32> to vector<2x64x32xf32>
    "tpu.trace_start"() <{level = 10 : i32, message = "bnc,bnd->bcd"}> : () -> ()
    %cst_133 = arith.constant dense<0.000000e+00> : vector<2x32x32xf32>
    %159 = tpu.matmul %133, %158, %cst_133 {dimension_numbers = #tpu.dot_dimension_numbers<[1], [1], [2], [2], [0, 0, 0, 2, 1, 2], [0], [0]>} : vector<2x64x32xf32>, vector<2x64x32xf32>, vector<2x32x32xf32> -> vector<2x32x32xf32>
    "tpu.trace_stop"() : () -> ()
    %c0_134 = arith.constant 0 : index
    %c0_135 = arith.constant 0 : index
    %160 = vector.load %arg9[%c0_134, %c0_135] : memref<32x32xf32, #tpu.memory_space<vmem>>, vector<32x32xf32>
    %161 = vector.shape_cast %160 : vector<32x32xf32> to vector<1x32x32xf32>
    %162 = vector.broadcast %161 : vector<1x32x32xf32> to vector<2x32x32xf32>
    %163 = arith.mulf %159, %162 : vector<2x32x32xf32>
    "tpu.trace_start"() <{level = 10 : i32, message = "bnc,bcd->bnd"}> : () -> ()
    %cst_136 = arith.constant dense<0.000000e+00> : vector<2x64x32xf32>
    %164 = tpu.matmul %108, %163, %cst_136 {dimension_numbers = #tpu.dot_dimension_numbers<[2], [1], [1], [2], [0, 0, 0, 1, 1, 2], [0], [0]>} : vector<2x64x32xf32>, vector<2x32x32xf32>, vector<2x64x32xf32> -> vector<2x64x32xf32>
    "tpu.trace_stop"() : () -> ()
    %cst_137 = arith.constant 1.250000e-01 : f32
    %165 = vector.broadcast %cst_137 : f32 to vector<2x64x32xf32>
    %166 = arith.mulf %164, %165 : vector<2x64x32xf32>
    %167 = vector.shape_cast %166 : vector<2x64x32xf32> to vector<128x32xf32>
    %c0_138 = arith.constant 0 : index
    %c0_139 = arith.constant 0 : index
    %168 = vector.load %arg22[%c0_138, %c0_139] : memref<128x32xf32, #tpu.memory_space<vmem>>, vector<128x32xf32>
    %169 = arith.subf %167, %168 : vector<128x32xf32>
    %cst_140 = arith.constant 5.000000e-01 : f32
    %170 = vector.broadcast %cst_140 : f32 to vector<128x32xf32>
    %171 = arith.mulf %169, %170 : vector<128x32xf32>
    %172 = arith.addf %168, %171 : vector<128x32xf32>
    %cst_141 = arith.constant 5.000000e-01 : f32
    %173 = vector.broadcast %cst_141 : f32 to vector<128x32xf32>
    %174 = arith.cmpf oge, %172, %173 : vector<128x32xf32>
    %175 = arith.extui %174 : vector<128x32xi1> to vector<128x32xi32>
    %176 = arith.sitofp %175 : vector<128x32xi32> to vector<128x32xf32>
    %cst_142 = arith.constant 1.000000e+00 : f32
    %177 = vector.broadcast %cst_142 : f32 to vector<128x32xf32>
    %178 = arith.subf %177, %176 : vector<128x32xf32>
    %179 = arith.mulf %172, %178 : vector<128x32xf32>
    %c0_143 = arith.constant 0 : index
    %c0_144 = arith.constant 0 : index
    %180 = vector.load %arg22[%c0_143, %c0_144] : memref<128x32xf32, #tpu.memory_space<vmem>>, vector<128x32xf32>
    tpu.vector_store %arg22[%c0_143, %c0_144], %179 {strides = array<i32>} : memref<128x32xf32, #tpu.memory_space<vmem>>, vector<128x32xf32>,
    %c0_145 = arith.constant 0 : index
    %c0_146 = arith.constant 0 : index
    %181 = vector.load %arg10[%c0_145, %c0_146] : memref<32x32xf32, #tpu.memory_space<vmem>>, vector<32x32xf32>
    %cst_147 = arith.constant dense<0.000000e+00> : vector<128x32xf32>
    %182 = tpu.matmul %176, %181, %cst_147 {dimension_numbers = #tpu.dot_dimension_numbers<[1], [0], [0], [1], [0, 0, 1, 1], [], []>} : vector<128x32xf32>, vector<32x32xf32>, vector<128x32xf32> -> vector<128x32xf32>
    %c0_148 = arith.constant 0 : index
    %c0_149 = arith.constant 0 : index
    %183 = vector.load %arg11[%c0_148, %c0_149] : memref<1x32xf32, #tpu.memory_space<vmem>>, vector<1x32xf32>
    %184 = vector.broadcast %183 : vector<1x32xf32> to vector<128x32xf32>
    %185 = arith.mulf %182, %184 : vector<128x32xf32>
    %c0_150 = arith.constant 0 : index
    %c0_151 = arith.constant 0 : index
    %186 = vector.load %arg12[%c0_150, %c0_151] : memref<1x32xf32, #tpu.memory_space<vmem>>, vector<1x32xf32>
    %187 = vector.broadcast %186 : vector<1x32xf32> to vector<128x32xf32>
    %188 = arith.addf %185, %187 : vector<128x32xf32>
    %189 = vector.shape_cast %188 : vector<128x32xf32> to vector<2x8x8x32xf32>
    %c0_152 = arith.constant 0 : index
    %c1_153 = arith.constant 1 : index
    %c1_154 = arith.constant 1 : index
    %c0_155 = arith.constant 0 : index
    %190 = vector.load %arg24[%c0_152, %c1_153, %c1_154, %c0_155] : memref<2x10x10x32xf32, #tpu.memory_space<vmem>>, vector<2x8x8x32xf32>
    tpu.vector_store %arg24[%c0_152, %c1_153, %c1_154, %c0_155], %189 {strides = array<i32>} : memref<2x10x10x32xf32, #tpu.memory_space<vmem>>, vector<2x8x8x32xf32>,
    %cst_156 = arith.constant 0.000000e+00 : f32
    %191 = vector.broadcast %cst_156 : f32 to vector<2x8x8x32xf32>
    %c0_157 = arith.constant 0 : index
    %c0_158 = arith.constant 0 : index
    %c0_159 = arith.constant 0 : index
    %c0_160 = arith.constant 0 : index
    %192 = vector.load %arg24[%c0_157, %c0_158, %c0_159, %c0_160] : memref<2x10x10x32xf32, #tpu.memory_space<vmem>>, vector<2x8x8x32xf32>
    %c0_161 = arith.constant 0 : index
    %c0_162 = arith.constant 0 : index
    %c0_163 = arith.constant 0 : index
    %193 = vector.load %arg13[%c0_161, %c0_162, %c0_163] : memref<3x3x32xf32, #tpu.memory_space<vmem>>, vector<1x1x32xf32>
    %194 = vector.shape_cast %193 : vector<1x1x32xf32> to vector<1x1x1x32xf32>
    %195 = vector.broadcast %194 : vector<1x1x1x32xf32> to vector<2x8x8x32xf32>
    %196 = arith.mulf %192, %195 : vector<2x8x8x32xf32>
    %197 = arith.addf %191, %196 : vector<2x8x8x32xf32>
    %c0_164 = arith.constant 0 : index
    %c0_165 = arith.constant 0 : index
    %c1_166 = arith.constant 1 : index
    %c0_167 = arith.constant 0 : index
    %198 = vector.load %arg24[%c0_164, %c0_165, %c1_166, %c0_167] : memref<2x10x10x32xf32, #tpu.memory_space<vmem>>, vector<2x8x8x32xf32>
    %c0_168 = arith.constant 0 : index
    %c1_169 = arith.constant 1 : index
    %c0_170 = arith.constant 0 : index
    %199 = vector.load %arg13[%c0_168, %c1_169, %c0_170] : memref<3x3x32xf32, #tpu.memory_space<vmem>>, vector<1x1x32xf32>
    %200 = vector.shape_cast %199 : vector<1x1x32xf32> to vector<1x1x1x32xf32>
    %201 = vector.broadcast %200 : vector<1x1x1x32xf32> to vector<2x8x8x32xf32>
    %202 = arith.mulf %198, %201 : vector<2x8x8x32xf32>
    %203 = arith.addf %197, %202 : vector<2x8x8x32xf32>
    %c0_171 = arith.constant 0 : index
    %c0_172 = arith.constant 0 : index
    %c2_173 = arith.constant 2 : index
    %c0_174 = arith.constant 0 : index
    %204 = vector.load %arg24[%c0_171, %c0_172, %c2_173, %c0_174] : memref<2x10x10x32xf32, #tpu.memory_space<vmem>>, vector<2x8x8x32xf32>
    %c0_175 = arith.constant 0 : index
    %c2_176 = arith.constant 2 : index
    %c0_177 = arith.constant 0 : index
    %205 = vector.load %arg13[%c0_175, %c2_176, %c0_177] : memref<3x3x32xf32, #tpu.memory_space<vmem>>, vector<1x1x32xf32>
    %206 = vector.shape_cast %205 : vector<1x1x32xf32> to vector<1x1x1x32xf32>
    %207 = vector.broadcast %206 : vector<1x1x1x32xf32> to vector<2x8x8x32xf32>
    %208 = arith.mulf %204, %207 : vector<2x8x8x32xf32>
    %209 = arith.addf %203, %208 : vector<2x8x8x32xf32>
    %c0_178 = arith.constant 0 : index
    %c1_179 = arith.constant 1 : index
    %c0_180 = arith.constant 0 : index
    %c0_181 = arith.constant 0 : index
    %210 = vector.load %arg24[%c0_178, %c1_179, %c0_180, %c0_181] : memref<2x10x10x32xf32, #tpu.memory_space<vmem>>, vector<2x8x8x32xf32>
    %c1_182 = arith.constant 1 : index
    %c0_183 = arith.constant 0 : index
    %c0_184 = arith.constant 0 : index
    %211 = vector.load %arg13[%c1_182, %c0_183, %c0_184] : memref<3x3x32xf32, #tpu.memory_space<vmem>>, vector<1x1x32xf32>
    %212 = vector.shape_cast %211 : vector<1x1x32xf32> to vector<1x1x1x32xf32>
    %213 = vector.broadcast %212 : vector<1x1x1x32xf32> to vector<2x8x8x32xf32>
    %214 = arith.mulf %210, %213 : vector<2x8x8x32xf32>
    %215 = arith.addf %209, %214 : vector<2x8x8x32xf32>
    %c0_185 = arith.constant 0 : index
    %c1_186 = arith.constant 1 : index
    %c1_187 = arith.constant 1 : index
    %c0_188 = arith.constant 0 : index
    %216 = vector.load %arg24[%c0_185, %c1_186, %c1_187, %c0_188] : memref<2x10x10x32xf32, #tpu.memory_space<vmem>>, vector<2x8x8x32xf32>
    %c1_189 = arith.constant 1 : index
    %c1_190 = arith.constant 1 : index
    %c0_191 = arith.constant 0 : index
    %217 = vector.load %arg13[%c1_189, %c1_190, %c0_191] : memref<3x3x32xf32, #tpu.memory_space<vmem>>, vector<1x1x32xf32>
    %218 = vector.shape_cast %217 : vector<1x1x32xf32> to vector<1x1x1x32xf32>
    %219 = vector.broadcast %218 : vector<1x1x1x32xf32> to vector<2x8x8x32xf32>
    %220 = arith.mulf %216, %219 : vector<2x8x8x32xf32>
    %221 = arith.addf %215, %220 : vector<2x8x8x32xf32>
    %c0_192 = arith.constant 0 : index
    %c1_193 = arith.constant 1 : index
    %c2_194 = arith.constant 2 : index
    %c0_195 = arith.constant 0 : index
    %222 = vector.load %arg24[%c0_192, %c1_193, %c2_194, %c0_195] : memref<2x10x10x32xf32, #tpu.memory_space<vmem>>, vector<2x8x8x32xf32>
    %c1_196 = arith.constant 1 : index
    %c2_197 = arith.constant 2 : index
    %c0_198 = arith.constant 0 : index
    %223 = vector.load %arg13[%c1_196, %c2_197, %c0_198] : memref<3x3x32xf32, #tpu.memory_space<vmem>>, vector<1x1x32xf32>
    %224 = vector.shape_cast %223 : vector<1x1x32xf32> to vector<1x1x1x32xf32>
    %225 = vector.broadcast %224 : vector<1x1x1x32xf32> to vector<2x8x8x32xf32>
    %226 = arith.mulf %222, %225 : vector<2x8x8x32xf32>
    %227 = arith.addf %221, %226 : vector<2x8x8x32xf32>
    %c0_199 = arith.constant 0 : index
    %c2_200 = arith.constant 2 : index
    %c0_201 = arith.constant 0 : index
    %c0_202 = arith.constant 0 : index
    %228 = vector.load %arg24[%c0_199, %c2_200, %c0_201, %c0_202] : memref<2x10x10x32xf32, #tpu.memory_space<vmem>>, vector<2x8x8x32xf32>
    %c2_203 = arith.constant 2 : index
    %c0_204 = arith.constant 0 : index
    %c0_205 = arith.constant 0 : index
    %229 = vector.load %arg13[%c2_203, %c0_204, %c0_205] : memref<3x3x32xf32, #tpu.memory_space<vmem>>, vector<1x1x32xf32>
    %230 = vector.shape_cast %229 : vector<1x1x32xf32> to vector<1x1x1x32xf32>
    %231 = vector.broadcast %230 : vector<1x1x1x32xf32> to vector<2x8x8x32xf32>
    %232 = arith.mulf %228, %231 : vector<2x8x8x32xf32>
    %233 = arith.addf %227, %232 : vector<2x8x8x32xf32>
    %c0_206 = arith.constant 0 : index
    %c2_207 = arith.constant 2 : index
    %c1_208 = arith.constant 1 : index
    %c0_209 = arith.constant 0 : index
    %234 = vector.load %arg24[%c0_206, %c2_207, %c1_208, %c0_209] : memref<2x10x10x32xf32, #tpu.memory_space<vmem>>, vector<2x8x8x32xf32>
    %c2_210 = arith.constant 2 : index
    %c1_211 = arith.constant 1 : index
    %c0_212 = arith.constant 0 : index
    %235 = vector.load %arg13[%c2_210, %c1_211, %c0_212] : memref<3x3x32xf32, #tpu.memory_space<vmem>>, vector<1x1x32xf32>
    %236 = vector.shape_cast %235 : vector<1x1x32xf32> to vector<1x1x1x32xf32>
    %237 = vector.broadcast %236 : vector<1x1x1x32xf32> to vector<2x8x8x32xf32>
    %238 = arith.mulf %234, %237 : vector<2x8x8x32xf32>
    %239 = arith.addf %233, %238 : vector<2x8x8x32xf32>
    %c0_213 = arith.constant 0 : index
    %c2_214 = arith.constant 2 : index
    %c2_215 = arith.constant 2 : index
    %c0_216 = arith.constant 0 : index
    %240 = vector.load %arg24[%c0_213, %c2_214, %c2_215, %c0_216] : memref<2x10x10x32xf32, #tpu.memory_space<vmem>>, vector<2x8x8x32xf32>
    %c2_217 = arith.constant 2 : index
    %c2_218 = arith.constant 2 : index
    %c0_219 = arith.constant 0 : index
    %241 = vector.load %arg13[%c2_217, %c2_218, %c0_219] : memref<3x3x32xf32, #tpu.memory_space<vmem>>, vector<1x1x32xf32>
    %242 = vector.shape_cast %241 : vector<1x1x32xf32> to vector<1x1x1x32xf32>
    %243 = vector.broadcast %242 : vector<1x1x1x32xf32> to vector<2x8x8x32xf32>
    %244 = arith.mulf %240, %243 : vector<2x8x8x32xf32>
    %245 = arith.addf %239, %244 : vector<2x8x8x32xf32>
    %246 = vector.shape_cast %245 : vector<2x8x8x32xf32> to vector<128x32xf32>
    %c0_220 = arith.constant 0 : index
    %c0_221 = arith.constant 0 : index
    %247 = vector.load %arg14[%c0_220, %c0_221] : memref<32x32xf32, #tpu.memory_space<vmem>>, vector<32x32xf32>
    %cst_222 = arith.constant dense<0.000000e+00> : vector<128x32xf32>
    %248 = tpu.matmul %246, %247, %cst_222 {dimension_numbers = #tpu.dot_dimension_numbers<[1], [0], [0], [1], [0, 0, 1, 1], [], []>} : vector<128x32xf32>, vector<32x32xf32>, vector<128x32xf32> -> vector<128x32xf32>
    %c0_223 = arith.constant 0 : index
    %c0_224 = arith.constant 0 : index
    %249 = vector.load %arg15[%c0_223, %c0_224] : memref<1x32xf32, #tpu.memory_space<vmem>>, vector<1x32xf32>
    %250 = vector.broadcast %249 : vector<1x32xf32> to vector<128x32xf32>
    %251 = arith.mulf %248, %250 : vector<128x32xf32>
    %c0_225 = arith.constant 0 : index
    %c0_226 = arith.constant 0 : index
    %252 = vector.load %arg16[%c0_225, %c0_226] : memref<1x32xf32, #tpu.memory_space<vmem>>, vector<1x32xf32>
    %253 = vector.broadcast %252 : vector<1x32xf32> to vector<128x32xf32>
    %254 = arith.addf %251, %253 : vector<128x32xf32>
    %c0_227 = arith.constant 0 : index
    %c0_228 = arith.constant 0 : index
    %c0_229 = arith.constant 0 : index
    %255 = vector.load %arg17[%c0_227, %c0_228, %c0_229] : memref<1x128x32xf32, #tpu.memory_space<vmem>>, vector<1x128x32xf32>
    %256 = vector.shape_cast %255 : vector<1x128x32xf32> to vector<128x32xf32>
    %257 = vector.shape_cast %254 : vector<128x32xf32> to vector<1x128x32xf32>
    tpu.vector_store %arg17[%c0_227, %c0_228, %c0_229], %257 {strides = array<i32>} : memref<1x128x32xf32, #tpu.memory_space<vmem>>, vector<1x128x32xf32>,
    return
  }
  func.func @transform_0(%arg0: i32) -> (i32, i32, i32) {
    %c0_i32 = arith.constant 0 : i32
    %c0_i32_0 = arith.constant 0 : i32
    %c0_i32_1 = arith.constant 0 : i32
    return %arg0, %c0_i32, %c0_i32_0 : i32, i32, i32
  }
  func.func @transform_1(%arg0: i32) -> (i32, i32) {
    %c0_i32 = arith.constant 0 : i32
    %c0_i32_0 = arith.constant 0 : i32
    %c0_i32_1 = arith.constant 0 : i32
    return %c0_i32, %c0_i32_0 : i32, i32
  }
  func.func @transform_2(%arg0: i32) -> (i32, i32) {
    %c0_i32 = arith.constant 0 : i32
    %c0_i32_0 = arith.constant 0 : i32
    %c0_i32_1 = arith.constant 0 : i32
    return %c0_i32, %c0_i32_0 : i32, i32
  }
  func.func @transform_3(%arg0: i32) -> (i32, i32) {
    %c0_i32 = arith.constant 0 : i32
    %c0_i32_0 = arith.constant 0 : i32
    %c0_i32_1 = arith.constant 0 : i32
    return %c0_i32, %c0_i32_0 : i32, i32
  }
  func.func @transform_4(%arg0: i32) -> (i32, i32, i32) {
    %c0_i32 = arith.constant 0 : i32
    %c0_i32_0 = arith.constant 0 : i32
    %c0_i32_1 = arith.constant 0 : i32
    %c0_i32_2 = arith.constant 0 : i32
    return %c0_i32, %c0_i32_0, %c0_i32_1 : i32, i32, i32
  }
  func.func @transform_5(%arg0: i32) -> (i32, i32, i32) {
    %c0_i32 = arith.constant 0 : i32
    %c0_i32_0 = arith.constant 0 : i32
    %c0_i32_1 = arith.constant 0 : i32
    %c0_i32_2 = arith.constant 0 : i32
    return %c0_i32, %c0_i32_0, %c0_i32_1 : i32, i32, i32
  }
  func.func @transform_6(%arg0: i32) -> (i32, i32, i32) {
    %c0_i32 = arith.constant 0 : i32
    %c0_i32_0 = arith.constant 0 : i32
    %c0_i32_1 = arith.constant 0 : i32
    %c0_i32_2 = arith.constant 0 : i32
    return %c0_i32, %c0_i32_0, %c0_i32_1 : i32, i32, i32
  }
  func.func @transform_7(%arg0: i32) -> (i32, i32, i32) {
    %c0_i32 = arith.constant 0 : i32
    %c0_i32_0 = arith.constant 0 : i32
    %c0_i32_1 = arith.constant 0 : i32
    %c0_i32_2 = arith.constant 0 : i32
    return %c0_i32, %c0_i32_0, %c0_i32_1 : i32, i32, i32
  }
  func.func @transform_8(%arg0: i32) -> (i32, i32) {
    %c0_i32 = arith.constant 0 : i32
    %c0_i32_0 = arith.constant 0 : i32
    %c0_i32_1 = arith.constant 0 : i32
    return %c0_i32, %c0_i32_0 : i32, i32
  }
  func.func @transform_9(%arg0: i32) -> (i32, i32) {
    %c0_i32 = arith.constant 0 : i32
    %c0_i32_0 = arith.constant 0 : i32
    %c0_i32_1 = arith.constant 0 : i32
    return %c0_i32, %c0_i32_0 : i32, i32
  }
  func.func @transform_10(%arg0: i32) -> (i32, i32) {
    %c0_i32 = arith.constant 0 : i32
    %c0_i32_0 = arith.constant 0 : i32
    %c0_i32_1 = arith.constant 0 : i32
    return %c0_i32, %c0_i32_0 : i32, i32
  }
  func.func @transform_11(%arg0: i32) -> (i32, i32) {
    %c0_i32 = arith.constant 0 : i32
    %c0_i32_0 = arith.constant 0 : i32
    %c0_i32_1 = arith.constant 0 : i32
    return %c0_i32, %c0_i32_0 : i32, i32
  }
  func.func @transform_12(%arg0: i32) -> (i32, i32, i32) {
    %c0_i32 = arith.constant 0 : i32
    %c0_i32_0 = arith.constant 0 : i32
    %c0_i32_1 = arith.constant 0 : i32
    %c0_i32_2 = arith.constant 0 : i32
    return %c0_i32, %c0_i32_0, %c0_i32_1 : i32, i32, i32
  }
  func.func @transform_13(%arg0: i32) -> (i32, i32) {
    %c0_i32 = arith.constant 0 : i32
    %c0_i32_0 = arith.constant 0 : i32
    %c0_i32_1 = arith.constant 0 : i32
    return %c0_i32, %c0_i32_0 : i32, i32
  }
  func.func @transform_14(%arg0: i32) -> (i32, i32) {
    %c0_i32 = arith.constant 0 : i32
    %c0_i32_0 = arith.constant 0 : i32
    %c0_i32_1 = arith.constant 0 : i32
    return %c0_i32, %c0_i32_0 : i32, i32
  }
  func.func @transform_15(%arg0: i32) -> (i32, i32) {
    %c0_i32 = arith.constant 0 : i32
    %c0_i32_0 = arith.constant 0 : i32
    %c0_i32_1 = arith.constant 0 : i32
    return %c0_i32, %c0_i32_0 : i32, i32
  }
  func.func @transform_16(%arg0: i32) -> (i32, i32, i32) {
    %c0_i32 = arith.constant 0 : i32
    %c0_i32_0 = arith.constant 0 : i32
    %c0_i32_1 = arith.constant 0 : i32
    return %arg0, %c0_i32, %c0_i32_0 : i32, i32, i32
  }
}

</mosaic_0001>

<bundles_post_ra>
// kernel: ms_attention_forward.1
= control target key start
LH: loop header
LB: loop body
LE: loop exit
PB: predicated region body
PF: predicated region fallthrough
CT: control target
= control target key end

     0   :  { %s7596_s0 = inlined_call_operand.vmem [shape: f32[2,128,32], index: 0, kind: input, shape index: {}]   ;;  %s7597_s1 = inlined_call_operand.vmem [shape: f32[32,96], index: 1, kind: input, shape index: {}]   ;;  %s7598_s2 = inlined_call_operand.vmem [shape: f32[1,96], index: 2, kind: input, shape index: {}]   ;;  %s7599_s3 = inlined_call_operand.vmem [shape: f32[1,96], index: 3, kind: input, shape index: {}]   ;;  %s7600_s4 = inlined_call_operand.vmem [shape: f32[3,3,96], index: 4, kind: input, shape index: {}]   ;;  %s7601_s5 = inlined_call_operand.vmem [shape: f32[3,96,32], index: 5, kind: input, shape index: {}]   ;;  %s7602_s6 = inlined_call_operand.vmem [shape: f32[3,1,32], index: 6, kind: input, shape index: {}]   ;;  %s7603_s7 = inlined_call_operand.vmem [shape: f32[3,1,32], index: 7, kind: input, shape index: {}]   ;;  %s7604_s8 = inlined_call_operand.vmem [shape: f32[32,32], index: 8, kind: input, shape index: {}]   ;;  %s7605_s9 = inlined_call_operand.vmem [shape: f32[32,32], index: 9, kind: input, shape index: {}]   ;;  %s7606_s10 = inlined_call_operand.vmem [shape: f32[1,32], index: 10, kind: input, shape index: {}]   ;;  %s7607_s11 = inlined_call_operand.vmem [shape: f32[1,32], index: 11, kind: input, shape index: {}]   ;;  %s7608_s12 = inlined_call_operand.vmem [shape: f32[3,3,32], index: 12, kind: input, shape index: {}]   ;;  %s7609_s13 = inlined_call_operand.vmem [shape: f32[32,32], index: 13, kind: input, shape index: {}]   ;;  %s7610_s14 = inlined_call_operand.vmem [shape: f32[1,32], index: 14, kind: input, shape index: {}]   ;;  %s7611_s15 = inlined_call_operand.vmem [shape: f32[1,32], index: 15, kind: input, shape index: {}]   ;;  %s7612_s16 = inlined_call_operand.hbm [shape: f32[2,128,32], index: 16, kind: output, shape index: {}]  }
   0x1   :  { %7619 = sst [smem:[#allocation17_spill]] %s7596_s0 }
   0x2   :  { %21 = vsyncpa [#allocation10], 0 }
   0x3   :  { %23 = vsyncpa [#allocation10 + $0x1], 0  ;;  %s5709_s21 = smov 0   ;;  %s5711_s22 = smov 0  }
   0x4   :  { %s5713_s23 = smov 0   ;;  %s5715_s24 = smov 0  }
   0x5 LB: > { %7620 = sst [smem:[#allocation12_spill]] %s5604_s21  ;;  %s5730_s25 = sadd.s32 4294967295, %s5616_s24   ;;  %s5616_s24 = sphi %s5715_s24, %s7639_s24   ;;  %s5612_s23 = sphi %s5713_s23, %s7641_s23   ;;  %s5608_s22 = sphi %s5711_s22, %s7643_s22   ;;  %s5604_s21 = sphi %s5709_s21, %s7642_s21  }
   0x6   : > { %7621 = sst [smem:[#allocation13_spill]] %s5612_s23  ;;  %s4543_s26 = sadd.s32 4294967294, %s5616_s24  }
   0x7   : > { %s5734_s27 = sadd.s32 1, %s5616_s24   ;;  %s377_s28 = sadd.s32 1, %s5612_s23 }
   0x8   : > { %7622 = sst [smem:[#allocation14_spill]] %s5734_s27  ;;  %s374_s29 = ssub.s32 %s5616_s24, %s5734_s27 }
   0x9   : > { %p387_p0 = scmp.ne.s32.totalorder %s5612_s23, %s5608_s22  ;;  %p375_p1 = scmp.eq.s32.totalorder %s374_s29, 0 }
   0xa   : > { %p388_p2 = scmp.eq.s32.totalorder %s5730_s25, 1  ;;  %p393_p3 = scmp.ne.s32.totalorder %s5608_s22, %s5604_s21 }
   0xb   : > { %p394_p4 = scmp.eq.s32.totalorder %s4543_s26, 1  ;;  %p4546_p7 = scmp.ge.s32.totalorder %s5616_s24, 1 }
   0xc   : > { %s5745_s30 = scalar_select %p375_p1, %s5612_s23, %s377_s28  }
   0xd   : > { %p5747_p5 = por %p388_p2, %p387_p0  ;;  %p5751_p6 = por %p394_p4, %p393_p3 }
   0xe   : > { %7623 = sst [smem:[#allocation15_spill]] %s5745_s30  ;;  %p465_p8 = scmp.lt.s32.totalorder %s5616_s24, 3 }
   0xf   : > { %s7625_s17 = scalar_select %p5751_p6, 1, 0 }
  0x10   : > { %p466_p9 = pnand %p4546_p7, %p465_p8 }
  0x11   : > { %7626 = sst [smem:[#allocation16_spill]] %s7625_s17  ;;  %s7618_s18 = sand.u32 (!%p466_p9), 1, %s5608_s22  }
  0x12   : > { %469 = sbr.rel (%p466_p9) target bundleno = 1715 (0x6b3), region = 84  ;;  %p515_p10 = scmp.lt.s32.totalorder (!%p466_p9), %s5730_s25, 1 }
  0x13   : > { %s4547_s19 = sshll.u32 (!%p466_p9), %s7618_s18, 7  ;;  %s7627_s30 = sld [smem:[#allocation17_spill]] (!%p466_p9) }
  0x14   : > { %s5767_s27 = scalar_lea.vmem (!%p466_p9), [#allocation9], %s4547_s19  ;;  %p4550_p11 = scmp.ne.s32.totalorder (!%p466_p9), %s5730_s25, 0 }
  0x19   : > { %s516_s20 = scalar_select %p515_p10, %s5730_s25, 1 }
  0x1a   : > { %523 = sbr.rel (%p4550_p11) target bundleno = 107 (0x6b), region = 88  ;;  %vm524_vm0 = vcmask (!%p4550_p11), 261120   ;;  %v5773_v0 = vld [vmem:[%s7599_s3] ss:$0 sm:$0xff] (!%p4550_p11)  ;;  %vm612_vm1 = vcmask (!%p4550_p11), 785408   ;;  %vm614_vm2 = vcmask (!%p4550_p11), 779264  }
  0x1b   : > { %s4844_s26 = sshll.u32 %s516_s20, 7  ;;  %v5618_v1 = vmov (!%p4550_p11), 0.0   ;;  %613 = vst.msk [vmem:[#allocation7] sm:$0xff] (!%p4550_p11), %vm612_vm1, %v5773_v0  ;;  %616 = vst.msk [vmem:[#allocation7 + $0x10] sm:$0xff] (!%p4550_p11), %vm612_vm1, %v5773_v0  ;;  %v4552_v2 = vld [vmem:[%s7607_s11] ss:$0 sm:$0xff] (!%p4550_p11) }
  0x1c   : > { %s5765_s23 = scalar_lea.vmem %s7627_s30, %s4844_s26  ;;  %525 = vst.msk [vmem:[#allocation2] sm:$0xff] (!%p4550_p11), %vm524_vm0, %v5618_v1  ;;  %526 = vst.msk [vmem:[#allocation2 + $0x8] sm:$0xff] (!%p4550_p11), %vm524_vm0, %v5618_v1  ;;  %vm662_vm3 = vcmask (!%p4550_p11), 254976  }
  0x1d   : > { %527 = vst.msk [vmem:[#allocation2 + $0x10] sm:$0xff] (!%p4550_p11), %vm524_vm0, %v5618_v1  ;;  %528 = vst.msk [vmem:[#allocation2 + $0x18] sm:$0xff] (!%p4550_p11), %vm524_vm0, %v5618_v1 }
  0x1e   : > { %529 = vst.msk [vmem:[#allocation2 + $0x20] sm:$0xff] (!%p4550_p11), %vm524_vm0, %v5618_v1  ;;  %530 = vst.msk [vmem:[#allocation2 + $0x28] sm:$0xff] (!%p4550_p11), %vm524_vm0, %v5618_v1 }
  0x1f   : > { %531 = vst.msk [vmem:[#allocation2 + $0x30] sm:$0xff] (!%p4550_p11), %vm524_vm0, %v5618_v1  ;;  %532 = vst.msk [vmem:[#allocation2 + $0x38] sm:$0xff] (!%p4550_p11), %vm524_vm0, %v5618_v1 }
  0x20   : > { %533 = vst.msk [vmem:[#allocation2 + $0x40] sm:$0xff] (!%p4550_p11), %vm524_vm0, %v5618_v1  ;;  %534 = vst.msk [vmem:[#allocation2 + $0x48] sm:$0xff] (!%p4550_p11), %vm524_vm0, %v5618_v1 }
  0x21   : > { %535 = vst.msk [vmem:[#allocation2 + $0x50] sm:$0xff] %vm524_vm0, %v5618_v1  ;;  %536 = vst.msk [vmem:[#allocation2 + $0x58] sm:$0xff] %vm524_vm0, %v5618_v1 }
  0x22   : > { %537 = vst.msk [vmem:[#allocation2 + $0x60] sm:$0xff] %vm524_vm0, %v5618_v1  ;;  %538 = vst.msk [vmem:[#allocation2 + $0x68] sm:$0xff] %vm524_vm0, %v5618_v1 }
  0x23   : > { %539 = vst.msk [vmem:[#allocation2 + $0x70] sm:$0xff] %vm524_vm0, %v5618_v1  ;;  %540 = vst.msk [vmem:[#allocation2 + $0x78] sm:$0xff] %vm524_vm0, %v5618_v1 }
  0x24   : > { %541 = vst.msk [vmem:[#allocation3] sm:$0xff] %vm524_vm0, %v5618_v1  ;;  %542 = vst.msk [vmem:[#allocation3 + $0x8] sm:$0xff] %vm524_vm0, %v5618_v1 }
  0x25   : > { %543 = vst.msk [vmem:[#allocation3 + $0x10] sm:$0xff] %vm524_vm0, %v5618_v1  ;;  %544 = vst.msk [vmem:[#allocation3 + $0x18] sm:$0xff] %vm524_vm0, %v5618_v1 }
  0x26   : > { %545 = vst.msk [vmem:[#allocation3 + $0x20] sm:$0xff] %vm524_vm0, %v5618_v1  ;;  %546 = vst.msk [vmem:[#allocation3 + $0x28] sm:$0xff] %vm524_vm0, %v5618_v1 }
  0x27   : > { %547 = vst.msk [vmem:[#allocation3 + $0x30] sm:$0xff] %vm524_vm0, %v5618_v1  ;;  %548 = vst.msk [vmem:[#allocation3 + $0x38] sm:$0xff] %vm524_vm0, %v5618_v1 }
  0x28   : > { %549 = vst.msk [vmem:[#allocation3 + $0x40] sm:$0xff] %vm524_vm0, %v5618_v1  ;;  %550 = vst.msk [vmem:[#allocation3 + $0x48] sm:$0xff] %vm524_vm0, %v5618_v1 }
  0x29   : > { %551 = vst.msk [vmem:[#allocation3 + $0x50] sm:$0xff] %vm524_vm0, %v5618_v1  ;;  %552 = vst.msk [vmem:[#allocation3 + $0x58] sm:$0xff] %vm524_vm0, %v5618_v1 }
  0x2a   : > { %553 = vst.msk [vmem:[#allocation3 + $0x60] sm:$0xff] %vm524_vm0, %v5618_v1  ;;  %554 = vst.msk [vmem:[#allocation3 + $0x68] sm:$0xff] %vm524_vm0, %v5618_v1 }
  0x2b   : > { %555 = vst.msk [vmem:[#allocation3 + $0x70] sm:$0xff] %vm524_vm0, %v5618_v1  ;;  %556 = vst.msk [vmem:[#allocation3 + $0x78] sm:$0xff] %vm524_vm0, %v5618_v1 }
  0x2c   : > { %557 = vst.msk [vmem:[#allocation4] sm:$0xff] %vm524_vm0, %v5618_v1  ;;  %558 = vst.msk [vmem:[#allocation4 + $0x8] sm:$0xff] %vm524_vm0, %v5618_v1 }
  0x2d   : > { %559 = vst.msk [vmem:[#allocation4 + $0x10] sm:$0xff] %vm524_vm0, %v5618_v1  ;;  %560 = vst.msk [vmem:[#allocation4 + $0x18] sm:$0xff] %vm524_vm0, %v5618_v1 }
  0x2e   : > { %561 = vst.msk [vmem:[#allocation4 + $0x20] sm:$0xff] %vm524_vm0, %v5618_v1  ;;  %562 = vst.msk [vmem:[#allocation4 + $0x28] sm:$0xff] %vm524_vm0, %v5618_v1 }
  0x2f   : > { %563 = vst.msk [vmem:[#allocation4 + $0x30] sm:$0xff] %vm524_vm0, %v5618_v1  ;;  %564 = vst.msk [vmem:[#allocation4 + $0x38] sm:$0xff] %vm524_vm0, %v5618_v1 }
  0x30   : > { %565 = vst.msk [vmem:[#allocation4 + $0x40] sm:$0xff] %vm524_vm0, %v5618_v1  ;;  %566 = vst.msk [vmem:[#allocation4 + $0x48] sm:$0xff] %vm524_vm0, %v5618_v1 }
  0x31   : > { %567 = vst.msk [vmem:[#allocation4 + $0x50] sm:$0xff] %vm524_vm0, %v5618_v1  ;;  %568 = vst.msk [vmem:[#allocation4 + $0x58] sm:$0xff] %vm524_vm0, %v5618_v1 }
  0x32   : > { %569 = vst.msk [vmem:[#allocation4 + $0x60] sm:$0xff] %vm524_vm0, %v5618_v1  ;;  %570 = vst.msk [vmem:[#allocation4 + $0x68] sm:$0xff] %vm524_vm0, %v5618_v1 }
  0x33   : > { %571 = vst.msk [vmem:[#allocation4 + $0x70] sm:$0xff] %vm524_vm0, %v5618_v1  ;;  %572 = vst.msk [vmem:[#allocation4 + $0x78] sm:$0xff] %vm524_vm0, %v5618_v1 }
  0x34   : > { %573 = vst.msk [vmem:[#allocation5] sm:$0xff] %vm524_vm0, %v5618_v1  ;;  %574 = vst.msk [vmem:[#allocation5 + $0x8] sm:$0xff] %vm524_vm0, %v5618_v1 }
  0x35   : > { %575 = vst.msk [vmem:[#allocation5 + $0x10] sm:$0xff] %vm524_vm0, %v5618_v1  ;;  %576 = vst.msk [vmem:[#allocation5 + $0x18] sm:$0xff] %vm524_vm0, %v5618_v1 }
  0x36   : > { %577 = vst.msk [vmem:[#allocation5 + $0x20] sm:$0xff] %vm524_vm0, %v5618_v1  ;;  %578 = vst.msk [vmem:[#allocation5 + $0x28] sm:$0xff] %vm524_vm0, %v5618_v1 }
  0x37   : > { %579 = vst.msk [vmem:[#allocation5 + $0x30] sm:$0xff] %vm524_vm0, %v5618_v1  ;;  %580 = vst.msk [vmem:[#allocation5 + $0x38] sm:$0xff] %vm524_vm0, %v5618_v1 }
  0x38   : > { %581 = vst.msk [vmem:[#allocation5 + $0x40] sm:$0xff] %vm524_vm0, %v5618_v1  ;;  %582 = vst.msk [vmem:[#allocation5 + $0x48] sm:$0xff] %vm524_vm0, %v5618_v1 }
  0x39   : > { %583 = vst.msk [vmem:[#allocation5 + $0x50] sm:$0xff] %vm524_vm0, %v5618_v1  ;;  %584 = vst.msk [vmem:[#allocation5 + $0x58] sm:$0xff] %vm524_vm0, %v5618_v1 }
  0x3a   : > { %585 = vst.msk [vmem:[#allocation5 + $0x60] sm:$0xff] %vm524_vm0, %v5618_v1  ;;  %586 = vst.msk [vmem:[#allocation5 + $0x68] sm:$0xff] %vm524_vm0, %v5618_v1 }
  0x3b   : > { %587 = vst.msk [vmem:[#allocation5 + $0x70] sm:$0xff] %vm524_vm0, %v5618_v1  ;;  %588 = vst.msk [vmem:[#allocation5 + $0x78] sm:$0xff] %vm524_vm0, %v5618_v1 }
  0x3c   : > { %589 = vst.msk [vmem:[#allocation6] sm:$0xff] %vm524_vm0, %v5618_v1  ;;  %590 = vst.msk [vmem:[#allocation6 + $0x8] sm:$0xff] %vm524_vm0, %v5618_v1 }
  0x3d   : > { %591 = vst.msk [vmem:[#allocation6 + $0x10] sm:$0xff] %vm524_vm0, %v5618_v1  ;;  %592 = vst.msk [vmem:[#allocation6 + $0x18] sm:$0xff] %vm524_vm0, %v5618_v1 }
  0x3e   : > { %593 = vst.msk [vmem:[#allocation6 + $0x20] sm:$0xff] %vm524_vm0, %v5618_v1  ;;  %594 = vst.msk [vmem:[#allocation6 + $0x28] sm:$0xff] %vm524_vm0, %v5618_v1 }
  0x3f   : > { %595 = vst.msk [vmem:[#allocation6 + $0x30] sm:$0xff] %vm524_vm0, %v5618_v1  ;;  %596 = vst.msk [vmem:[#allocation6 + $0x38] sm:$0xff] %vm524_vm0, %v5618_v1 }
  0x40   : > { %597 = vst.msk [vmem:[#allocation6 + $0x40] sm:$0xff] %vm524_vm0, %v5618_v1  ;;  %598 = vst.msk [vmem:[#allocation6 + $0x48] sm:$0xff] %vm524_vm0, %v5618_v1 }
  0x41   : > { %599 = vst.msk [vmem:[#allocation6 + $0x50] sm:$0xff] %vm524_vm0, %v5618_v1  ;;  %600 = vst.msk [vmem:[#allocation6 + $0x58] sm:$0xff] %vm524_vm0, %v5618_v1 }
  0x42   : > { %601 = vst.msk [vmem:[#allocation6 + $0x60] sm:$0xff] %vm524_vm0, %v5618_v1  ;;  %602 = vst.msk [vmem:[#allocation6 + $0x68] sm:$0xff] %vm524_vm0, %v5618_v1 }
  0x43   : > { %603 = vst.msk [vmem:[#allocation6 + $0x70] sm:$0xff] %vm524_vm0, %v5618_v1  ;;  %604 = vst.msk [vmem:[#allocation6 + $0x78] sm:$0xff] %vm524_vm0, %v5618_v1 }
  0x44   : > { %618 = vst.msk [vmem:[#allocation7 + $0x20] sm:$0xff] %vm612_vm1, %v5773_v0  ;;  %620 = vst.msk [vmem:[#allocation7 + $0x30] sm:$0xff] %vm612_vm1, %v5773_v0 }
  0x45   : > { %622 = vst.msk [vmem:[#allocation7 + $0x40] sm:$0xff] %vm612_vm1, %v5773_v0  ;;  %624 = vst.msk [vmem:[#allocation7 + $0x50] sm:$0xff] %vm612_vm1, %v5773_v0 }
  0x46   : > { %626 = vst.msk [vmem:[#allocation7 + $0x60] sm:$0xff] %vm612_vm1, %v5773_v0  ;;  %628 = vst.msk [vmem:[#allocation7 + $0x70] sm:$0xff] %vm612_vm1, %v5773_v0 }
  0x47   : > { %630 = vst.msk [vmem:[#allocation7 + $0x80] sm:$0xff] %vm612_vm1, %v5773_v0  ;;  %632 = vst.msk [vmem:[#allocation7 + $0x90] sm:$0xff] %vm612_vm1, %v5773_v0 }
  0x48   : > { %634 = vst.msk [vmem:[#allocation7 + $0xa0] sm:$0xff] %vm612_vm1, %v5773_v0  ;;  %636 = vst.msk [vmem:[#allocation7 + $0xb0] sm:$0xff] %vm612_vm1, %v5773_v0 }
  0x49   : > { %638 = vst.msk [vmem:[#allocation7 + $0xc0] sm:$0xff] %vm612_vm1, %v5773_v0  ;;  %640 = vst.msk [vmem:[#allocation7 + $0xd0] sm:$0xff] %vm612_vm1, %v5773_v0 }
  0x4a   : > { %642 = vst.msk [vmem:[#allocation7 + $0xe0] sm:$0xff] %vm612_vm1, %v5773_v0  ;;  %644 = vst.msk [vmem:[#allocation7 + $0xf0] sm:$0xff] %vm612_vm1, %v5773_v0 }
  0x4b   : > { %646 = vst.msk [vmem:[#allocation7 + $0x100] sm:$0xff] %vm612_vm1, %v5773_v0  ;;  %648 = vst.msk [vmem:[#allocation7 + $0x110] sm:$0xff] %vm612_vm1, %v5773_v0 }
  0x4c   : > { %650 = vst.msk [vmem:[#allocation7 + $0x120] sm:$0xff] %vm612_vm1, %v5773_v0  ;;  %652 = vst.msk [vmem:[#allocation7 + $0x130] sm:$0xff] %vm612_vm1, %v5773_v0 }
  0x4d   : > { %615 = vst.msk [vmem:[#allocation7 + $0x8] sm:$0x3] %vm614_vm2, %v5773_v0  ;;  %617 = vst.msk [vmem:[#allocation7 + $0x18] sm:$0x3] %vm614_vm2, %v5773_v0 }
  0x4e   : > { %619 = vst.msk [vmem:[#allocation7 + $0x28] sm:$0x3] %vm614_vm2, %v5773_v0  ;;  %621 = vst.msk [vmem:[#allocation7 + $0x38] sm:$0x3] %vm614_vm2, %v5773_v0 }
  0x4f   : > { %623 = vst.msk [vmem:[#allocation7 + $0x48] sm:$0x3] %vm614_vm2, %v5773_v0  ;;  %625 = vst.msk [vmem:[#allocation7 + $0x58] sm:$0x3] %vm614_vm2, %v5773_v0 }
  0x50   : > { %627 = vst.msk [vmem:[#allocation7 + $0x68] sm:$0x3] %vm614_vm2, %v5773_v0  ;;  %629 = vst.msk [vmem:[#allocation7 + $0x78] sm:$0x3] %vm614_vm2, %v5773_v0 }
  0x51   : > { %631 = vst.msk [vmem:[#allocation7 + $0x88] sm:$0x3] %vm614_vm2, %v5773_v0  ;;  %633 = vst.msk [vmem:[#allocation7 + $0x98] sm:$0x3] %vm614_vm2, %v5773_v0 }
  0x52   : > { %635 = vst.msk [vmem:[#allocation7 + $0xa8] sm:$0x3] %vm614_vm2, %v5773_v0  ;;  %637 = vst.msk [vmem:[#allocation7 + $0xb8] sm:$0x3] %vm614_vm2, %v5773_v0 }
  0x53   : > { %639 = vst.msk [vmem:[#allocation7 + $0xc8] sm:$0x3] %vm614_vm2, %v5773_v0  ;;  %641 = vst.msk [vmem:[#allocation7 + $0xd8] sm:$0x3] %vm614_vm2, %v5773_v0 }
  0x54   : > { %643 = vst.msk [vmem:[#allocation7 + $0xe8] sm:$0x3] %vm614_vm2, %v5773_v0  ;;  %645 = vst.msk [vmem:[#allocation7 + $0xf8] sm:$0x3] %vm614_vm2, %v5773_v0 }
  0x55   : > { %647 = vst.msk [vmem:[#allocation7 + $0x108] sm:$0x3] %vm614_vm2, %v5773_v0  ;;  %649 = vst.msk [vmem:[#allocation7 + $0x118] sm:$0x3] %vm614_vm2, %v5773_v0 }
  0x56   : > { %651 = vst.msk [vmem:[#allocation7 + $0x128] sm:$0x3] %vm614_vm2, %v5773_v0  ;;  %653 = vst.msk [vmem:[#allocation7 + $0x138] sm:$0x3] %vm614_vm2, %v5773_v0 }
  0x57   : > { %661 = vst.msk [vmem:[#allocation8] sm:$0xff] %vm524_vm0, %v4552_v2  ;;  %664 = vst.msk [vmem:[#allocation8 + $0x10] sm:$0xff] %vm524_vm0, %v4552_v2 }
  0x58   : > { %666 = vst.msk [vmem:[#allocation8 + $0x20] sm:$0xff] %vm524_vm0, %v4552_v2  ;;  %668 = vst.msk [vmem:[#allocation8 + $0x30] sm:$0xff] %vm524_vm0, %v4552_v2 }
  0x59   : > { %670 = vst.msk [vmem:[#allocation8 + $0x40] sm:$0xff] %vm524_vm0, %v4552_v2  ;;  %672 = vst.msk [vmem:[#allocation8 + $0x50] sm:$0xff] %vm524_vm0, %v4552_v2 }
  0x5a   : > { %674 = vst.msk [vmem:[#allocation8 + $0x60] sm:$0xff] %vm524_vm0, %v4552_v2  ;;  %676 = vst.msk [vmem:[#allocation8 + $0x70] sm:$0xff] %vm524_vm0, %v4552_v2 }
  0x5b   : > { %678 = vst.msk [vmem:[#allocation8 + $0x80] sm:$0xff] %vm524_vm0, %v4552_v2  ;;  %680 = vst.msk [vmem:[#allocation8 + $0x90] sm:$0xff] %vm524_vm0, %v4552_v2 }
  0x5c   : > { %682 = vst.msk [vmem:[#allocation8 + $0xa0] sm:$0xff] %vm524_vm0, %v4552_v2  ;;  %684 = vst.msk [vmem:[#allocation8 + $0xb0] sm:$0xff] %vm524_vm0, %v4552_v2 }
  0x5d   : > { %686 = vst.msk [vmem:[#allocation8 + $0xc0] sm:$0xff] %vm524_vm0, %v4552_v2  ;;  %688 = vst.msk [vmem:[#allocation8 + $0xd0] sm:$0xff] %vm524_vm0, %v4552_v2 }
  0x5e   : > { %690 = vst.msk [vmem:[#allocation8 + $0xe0] sm:$0xff] %vm524_vm0, %v4552_v2  ;;  %692 = vst.msk [vmem:[#allocation8 + $0xf0] sm:$0xff] %vm524_vm0, %v4552_v2 }
  0x5f   : > { %694 = vst.msk [vmem:[#allocation8 + $0x100] sm:$0xff] %vm524_vm0, %v4552_v2  ;;  %696 = vst.msk [vmem:[#allocation8 + $0x110] sm:$0xff] %vm524_vm0, %v4552_v2 }
  0x60   : > { %698 = vst.msk [vmem:[#allocation8 + $0x120] sm:$0xff] %vm524_vm0, %v4552_v2  ;;  %700 = vst.msk [vmem:[#allocation8 + $0x130] sm:$0xff] %vm524_vm0, %v4552_v2 }
  0x61   : > { %663 = vst.msk [vmem:[#allocation8 + $0x8] sm:$0x3] %vm662_vm3, %v4552_v2  ;;  %665 = vst.msk [vmem:[#allocation8 + $0x18] sm:$0x3] %vm662_vm3, %v4552_v2 }
  0x62   : > { %667 = vst.msk [vmem:[#allocation8 + $0x28] sm:$0x3] %vm662_vm3, %v4552_v2  ;;  %669 = vst.msk [vmem:[#allocation8 + $0x38] sm:$0x3] %vm662_vm3, %v4552_v2 }
  0x63   : > { %671 = vst.msk [vmem:[#allocation8 + $0x48] sm:$0x3] %vm662_vm3, %v4552_v2  ;;  %673 = vst.msk [vmem:[#allocation8 + $0x58] sm:$0x3] %vm662_vm3, %v4552_v2 }
  0x64   : > { %675 = vst.msk [vmem:[#allocation8 + $0x68] sm:$0x3] %vm662_vm3, %v4552_v2  ;;  %677 = vst.msk [vmem:[#allocation8 + $0x78] sm:$0x3] %vm662_vm3, %v4552_v2 }
  0x65   : > { %679 = vst.msk [vmem:[#allocation8 + $0x88] sm:$0x3] %vm662_vm3, %v4552_v2  ;;  %681 = vst.msk [vmem:[#allocation8 + $0x98] sm:$0x3] %vm662_vm3, %v4552_v2 }
  0x66   : > { %683 = vst.msk [vmem:[#allocation8 + $0xa8] sm:$0x3] %vm662_vm3, %v4552_v2  ;;  %685 = vst.msk [vmem:[#allocation8 + $0xb8] sm:$0x3] %vm662_vm3, %v4552_v2 }
  0x67   : > { %687 = vst.msk [vmem:[#allocation8 + $0xc8] sm:$0x3] %vm662_vm3, %v4552_v2  ;;  %689 = vst.msk [vmem:[#allocation8 + $0xd8] sm:$0x3] %vm662_vm3, %v4552_v2 }
  0x68   : > { %691 = vst.msk [vmem:[#allocation8 + $0xe8] sm:$0x3] %vm662_vm3, %v4552_v2  ;;  %693 = vst.msk [vmem:[#allocation8 + $0xf8] sm:$0x3] %vm662_vm3, %v4552_v2 }
  0x69   : > { %695 = vst.msk [vmem:[#allocation8 + $0x108] sm:$0x3] %vm662_vm3, %v4552_v2  ;;  %697 = vst.msk [vmem:[#allocation8 + $0x118] sm:$0x3] %vm662_vm3, %v4552_v2 }
  0x6a   : > { %699 = vst.msk [vmem:[#allocation8 + $0x128] sm:$0x3] %vm662_vm3, %v4552_v2  ;;  %701 = vst.msk [vmem:[#allocation8 + $0x138] sm:$0x3] %vm662_vm3, %v4552_v2 }
  0x6b PF: > { %v879_v3 = vld [vmem:[%s7597_s1] sm:$0xff]  ;;  %v880_v4 = vld [vmem:[%s7597_s1 + $0x8] sm:$0xff]  ;;  %v881_v5 = vld [vmem:[%s7597_s1 + $0x10] sm:$0xff]  ;;  %vm862_vm4 = vcmask 261120   ;;  %v5619_v43 = vmov 0.0   ;;  %s4845_s20 = sshll.u32 %s5730_s25, 11 }
  0x6c   : > { %v5362_v6 = vpack.c.bf16 %v880_v4, %v879_v3  ;;  %v882_v7 = vld [vmem:[%s7597_s1 + $0x18] sm:$0xff]  ;;  %v702_v8 = vld [vmem:[%s5765_s23] sm:$0xff]  ;;  %v703_v12 = vld [vmem:[%s5765_s23 + $0x8] sm:$0xff]  ;;  %s4481_s26 = sshll.u32 %s5767_s27, 4  ;;  %s7544_s21 = scalar_lea.hbm %s7612_s16, %s4845_s20  ;;  %s7546_s26 = int_to_ptr.vmem [resolvable:$true] %s4481_s26 }
  0x6d   : > { %v718_v9 = vld [vmem:[#allocation2] sm:$0xff]  ;;  %v5366_v10 = vpack.c.bf16 %v882_v7, %v881_v5  ;;  %v719_v13 = vld [vmem:[#allocation2 + $0x8] sm:$0xff]  ;;  %v704_v14 = vld [vmem:[%s5765_s23 + $0x10] sm:$0xff]  ;;  %s7636_s25 = sand.u32 1, %s5608_s22   ;;  %s5621_s17 = smov [#allocation9]  }
  0x6e   : > { %v734_v11 = vsub.f32 %v702_v8, %v718_v9  ;;  %5363 = vmatprep.subr.bf16.mxu0 %v5362_v6  ;;  %v735_v15 = vsub.f32 %v703_v12, %v719_v13  ;;  %v720_v16 = vld [vmem:[#allocation2 + $0x10] sm:$0xff]  ;;  %v705_v17 = vld [vmem:[%s5765_s23 + $0x18] sm:$0xff]  ;;  %v706_v22 = vld [vmem:[%s5765_s23 + $0x20] sm:$0xff]  ;;  %s7555_s30 = scalar_lea.sflag [#allocation10], %s7636_s25  ;;  %s5558_s18 = sshll.u32 %s5621_s17, 4  ;;  %s5559_s18 = int_to_ptr.vmem [resolvable:$false] %s5558_s18 }
  0x6f   : > { %v721_v18 = vld [vmem:[#allocation2 + $0x18] sm:$0xff]  ;;  %5365 = vmatpush3.bf16.msra.mxu0 %v5362_v6  ;;  %v736_v20 = vsub.f32 %v704_v14, %v720_v16  ;;  %v722_v23 = vld [vmem:[#allocation2 + $0x20] sm:$0xff]  ;;  %v707_v24 = vld [vmem:[%s5765_s23 + $0x28] sm:$0xff]  ;;  %s5560_s19 = scalar_lea.vmem %s5559_s18, 4096  ;;  %p5561_p1 = scmp.lt.s32.totalorder %s7546_s26, %s5559_s18 }
  0x70   : > { %v750_v19 = vmul.f32 0.5, %v734_v11  ;;  %v737_v21 = vsub.f32 %v705_v17, %v721_v18  ;;  %5367 = vmatprep.subr.bf16.mxu0 %v5366_v10  ;;  %v751_v25 = vmul.f32 0.5, %v735_v15  ;;  %v738_v26 = vsub.f32 %v706_v22, %v722_v23  ;;  %v723_v27 = vld [vmem:[#allocation2 + $0x28] sm:$0xff]  ;;  %v708_v28 = vld [vmem:[%s5765_s23 + $0x30] sm:$0xff]  ;;  %v709_v34 = vld [vmem:[%s5765_s23 + $0x38] sm:$0xff] }
  0x71   : > { %v724_v29 = vld [vmem:[#allocation2 + $0x30] sm:$0xff]  ;;  %v752_v31 = vmul.f32 0.5, %v736_v20  ;;  %v739_v33 = vsub.f32 %v707_v24, %v723_v27  ;;  %v725_v35 = vld [vmem:[#allocation2 + $0x38] sm:$0xff]  ;;  %v710_v52 = vld [vmem:[%s5765_s23 + $0x40] sm:$0xff] }
  0x72   : > { %v766_v30 = vadd.f32 %v750_v19, %v718_v9  ;;  %v753_v32 = vmul.f32 0.5, %v737_v21  ;;  %v767_v36 = vadd.f32 %v751_v25, %v719_v13  ;;  %v754_v37 = vmul.f32 0.5, %v738_v26  ;;  %v726_v53 = vld [vmem:[#allocation2 + $0x40] sm:$0xff]  ;;  %v711_v58 = vld [vmem:[%s5765_s23 + $0x48] sm:$0xff]  ;;  %v712_v4 = vld [vmem:[%s5765_s23 + $0x50] sm:$0xff] }
  0x73   : > { %v740_v38 = vsub.f32 %v708_v28, %v724_v29  ;;  %v741_v39 = vsub.f32 %v709_v34, %v725_v35  ;;  %5369 = vmatpush3.bf16.msra.mxu0 %v5366_v10  ;;  %v768_v40 = vadd.f32 %v752_v31, %v720_v16  ;;  %v755_v42 = vmul.f32 0.5, %v739_v33  ;;  %v727_v59 = vld [vmem:[#allocation2 + $0x48] sm:$0xff]  ;;  %v728_v5 = vld [vmem:[#allocation2 + $0x50] sm:$0xff]  ;;  %v713_v6 = vld [vmem:[%s5765_s23 + $0x58] sm:$0xff] }
  0x74   : > { %vm782_vm5 = vcmp.ge.f32.partialorder %v766_v30, 1.0  ;;  %v769_v41 = vadd.f32 %v753_v32, %v721_v18  ;;  %vm783_vm6 = vcmp.ge.f32.partialorder %v767_v36, 1.0  ;;  %v770_v45 = vadd.f32 %v754_v37, %v722_v23  ;;  %v729_v9 = vld [vmem:[#allocation2 + $0x58] sm:$0xff]  ;;  %v714_v10 = vld [vmem:[%s5765_s23 + $0x60] sm:$0xff]  ;;  %v715_v23 = vld [vmem:[%s5765_s23 + $0x68] sm:$0xff] }
  0x75   : > { %v4553_v44 = vsel %vm782_vm5, 1.0, %v5619_v43  ;;  %v756_v46 = vmul.f32 0.5, %v740_v38  ;;  %v4554_v48 = vsel %vm783_vm6, 1.0, %v5619_v43  ;;  %vm784_vm7 = vcmp.ge.f32.partialorder %v768_v40, 1.0  ;;  %v730_v11 = vld [vmem:[#allocation2 + $0x60] sm:$0xff]  ;;  %v731_v24 = vld [vmem:[#allocation2 + $0x68] sm:$0xff] }
  0x76   : > { %v830_v47 = vsub.f32 1.0, %v4553_v44  ;;  %5046 = vmatprep.mubr.msk.f32.mxu0 %vm862_vm4, %v4553_v44  ;;  %vm785_vm8 = vcmp.ge.f32.partialorder %v769_v41, 1.0  ;;  %v831_v49 = vsub.f32 1.0, %v4554_v48  ;;  %v4555_v50 = vsel %vm784_vm7, 1.0, %v5619_v43  ;;  %v716_v32 = vld [vmem:[%s5765_s23 + $0x70] sm:$0xff]  ;;  %v717_v37 = vld [vmem:[%s5765_s23 + $0x78] sm:$0xff] }
  0x77   : > { %5047 = vmatmul.mubr.msk.f32.vlgmr.msra.gmra.mrb[0].mxu0 %vm862_vm4, %v4554_v48  ;;  %v4556_v51 = vsel %vm785_vm8, 1.0, %v5619_v43  ;;  %vm786_vm9 = vcmp.ge.f32.partialorder %v770_v45, 1.0  ;;  %v832_v55 = vsub.f32 1.0, %v4555_v50  ;;  %v771_v62 = vadd.f32 %v755_v42, %v723_v27  ;;  %v733_v38 = vld [vmem:[#allocation2 + $0x78] sm:$0xff]  ;;  %s5554_s23 = scalar_lea.vmem %s7546_s26, 2048 }
  0x78   : > { %v846_v54 = vmul.f32 %v830_v47, %v766_v30  ;;  %5049 = vmatprep.mubr.msk.f32.mxu0 %vm862_vm4, %v4555_v50  ;;  %v833_v56 = vsub.f32 1.0, %v4556_v51  ;;  %v4557_v57 = vsel %vm786_vm9, 1.0, %v5619_v43  ;;  %v847_v60 = vmul.f32 %v831_v49, %v767_v36  ;;  %v732_v36 = vld [vmem:[#allocation2 + $0x70] sm:$0xff]  ;;  %p5555_p12 = scmp.ne.s32.totalorder %s7546_s26, %s5554_s23  ;;  %p5562_p2 = scmp.lt.s32.totalorder %s5560_s19, %s5554_s23 }
  0x79   : > { %v834_v61 = vsub.f32 1.0, %v4557_v57  ;;  %v772_v63 = vadd.f32 %v756_v46, %v724_v29  ;;  %v848_v0 = vmul.f32 %v832_v55, %v768_v40  ;;  %v757_v2 = vmul.f32 0.5, %v741_v39 }
  0x7a   : > { %863 = vst.msk [vmem:[#allocation2] sm:$0xff] %vm862_vm4, %v846_v54  ;;  %v849_v1 = vmul.f32 %v833_v56, %v769_v41  ;;  %v742_v3 = vsub.f32 %v710_v52, %v726_v53  ;;  %864 = vst.msk [vmem:[#allocation2 + $0x8] sm:$0xff] %vm862_vm4, %v847_v60  ;;  %vm787_vm10 = vcmp.ge.f32.partialorder %v771_v62, 1.0  ;;  %v743_v8 = vsub.f32 %v711_v58, %v727_v59  ;;  %p5556_p13 = pnand %p5555_p12, %p5747_p5  ;;  %p5563_p3 = por %p5562_p2, %p5561_p1 }
  0x7b   : > { %5050 = vmatmul.mubr.msk.f32.gmra.mrb[2].mxu0 %vm862_vm4, %v4556_v51  ;;  %v850_v7 = vmul.f32 %v834_v61, %v770_v45  ;;  %vm788_vm11 = vcmp.ge.f32.partialorder %v772_v63, 1.0  ;;  %865 = vst.msk [vmem:[#allocation2 + $0x10] sm:$0xff] %vm862_vm4, %v848_v0  ;;  %v4558_v12 = vsel %vm787_vm10, 1.0, %v5619_v43  ;;  %v773_v14 = vadd.f32 %v757_v2, %v725_v35 }
  0x7c   : > { %866 = vst.msk [vmem:[#allocation2 + $0x18] sm:$0xff] %vm862_vm4, %v849_v1  ;;  %5052 = vmatprep.mubr.msk.f32.mxu0 %vm862_vm4, %v4557_v57  ;;  %v4559_v13 = vsel %vm788_vm11, 1.0, %v5619_v43  ;;  %v758_v15 = vmul.f32 0.5, %v742_v3  ;;  %v835_v16 = vsub.f32 1.0, %v4558_v12  ;;  %v759_v18 = vmul.f32 0.5, %v743_v8  ;;  %p5557_p0 = pneg %p5556_p13 }
  0x7d   : > { %867 = vst.msk [vmem:[#allocation2 + $0x20] sm:$0xff] %vm862_vm4, %v850_v7  ;;  %v836_v17 = vsub.f32 1.0, %v4559_v13  ;;  %v744_v19 = vsub.f32 %v712_v4, %v728_v5  ;;  %vm789_vm12 = vcmp.ge.f32.partialorder %v773_v14, 1.0  ;;  %v745_v21 = vsub.f32 %v713_v6, %v729_v9 }
  0x7e   : > { %v774_v20 = vadd.f32 %v758_v15, %v726_v53  ;;  %v746_v22 = vsub.f32 %v714_v10, %v730_v11  ;;  %v851_v25 = vmul.f32 %v835_v16, %v771_v62  ;;  %v4560_v27 = vsel %vm789_vm12, 1.0, %v5619_v43  ;;  %v4637_v15 = vld [vmem:[%s7601_s5 + $0x68] sm:$0xff]  ;;  %p5564_p4 = pnand %p5563_p3, %p5557_p0 }
  0x7f   : > { %5053 = vmatmul.mubr.msk.f32.gmra.mrb[4].mxu0 %vm862_vm4, %v4558_v12  ;;  %v852_v26 = vmul.f32 %v836_v17, %v772_v63  ;;  %v775_v28 = vadd.f32 %v759_v18, %v727_v59  ;;  %v837_v29 = vsub.f32 1.0, %v4560_v27  ;;  %v760_v30 = vmul.f32 0.5, %v744_v19  ;;  %v1621_v12 = vld [vmem:[%s7601_s5 + $0x8] sm:$0xff]  ;;  %v1622_v17 = vld [vmem:[%s7601_s5 + $0x10] sm:$0xff]  ;;  %v1623_v18 = vld [vmem:[%s7601_s5 + $0x18] sm:$0xff] }
  0x80   : > { %5055 = vmatprep.mubr.msk.f32.mxu0 %vm862_vm4, %v4559_v13  ;;  %vm790_vm13 = vcmp.ge.f32.partialorder %v774_v20, 1.0  ;;  %v761_v31 = vmul.f32 0.5, %v745_v21  ;;  %868 = vst.msk [vmem:[#allocation2 + $0x28] sm:$0xff] %vm862_vm4, %v851_v25  ;;  %v762_v34 = vmul.f32 0.5, %v746_v22  ;;  %v747_v35 = vsub.f32 %v715_v23, %v731_v24  ;;  %v4636_v13 = vld [vmem:[%s7601_s5 + $0x60] sm:$0xff]  ;;  %v4638_v19 = vld [vmem:[%s7601_s5 + $0x70] sm:$0xff] }
  0x81   : > { %869 = vst.msk [vmem:[#allocation2 + $0x30] sm:$0xff] %vm862_vm4, %v852_v26  ;;  %v4561_v33 = vsel %vm790_vm13, 1.0, %v5619_v43  ;;  %vm791_vm14 = vcmp.ge.f32.partialorder %v775_v28, 1.0  ;;  %v853_v39 = vmul.f32 %v837_v29, %v773_v14  ;;  %v776_v42 = vadd.f32 %v760_v30, %v728_v5  ;;  %v4639_v21 = vld [vmem:[%s7601_s5 + $0x78] sm:$0xff]  ;;  %v1624_v23 = vld [vmem:[%s7601_s5 + $0x20] sm:$0xff]  ;;  %v1626_v29 = vld [vmem:[%s7601_s5 + $0x30] sm:$0xff] }
  0x82   : > { %v838_v40 = vsub.f32 1.0, %v4561_v33  ;;  %v4562_v41 = vsel %vm791_vm14, 1.0, %v5619_v43  ;;  %v777_v45 = vadd.f32 %v761_v31, %v729_v9  ;;  %v778_v46 = vadd.f32 %v762_v34, %v730_v11  ;;  %v1620_v11 = vld [vmem:[%s7601_s5] sm:$0xff]  ;;  %v1627_v30 = vld [vmem:[%s7601_s5 + $0x38] sm:$0xff]  ;;  %v4642_v31 = vld [vmem:[%s7601_s5 + $0x90] sm:$0xff] }
  0x83   : > { %5056 = vmatmul.mubr.msk.f32.gmra.mrb[6].mxu0 %vm862_vm4, %v4560_v27  ;;  %v839_v44 = vsub.f32 1.0, %v4562_v41  ;;  %v763_v47 = vmul.f32 0.5, %v747_v35  ;;  %870 = vst.msk [vmem:[#allocation2 + $0x38] sm:$0xff] %vm862_vm4, %v853_v39  ;;  %vm792_vm15 = vcmp.ge.f32.partialorder %v776_v42, 1.0  ;;  %v748_v49 = vsub.f32 %v716_v32, %v732_v36  ;;  %v4640_v25 = vld [vmem:[%s7601_s5 + $0x80] sm:$0xff]  ;;  %v4641_v27 = vld [vmem:[%s7601_s5 + $0x88] sm:$0xff] }
  0x84   : > { %v854_v48 = vmul.f32 %v838_v40, %v774_v20  ;;  %5058 = vmatprep.mubr.msk.f32.mxu0 %vm862_vm4, %v4561_v33  ;;  %v749_v50 = vsub.f32 %v717_v37, %v733_v38  ;;  %v4563_v52 = vsel %vm792_vm15, 1.0, %v5619_v43  ;;  %vm793_vm0 = vcmp.ge.f32.partialorder %v777_v45, 1.0  ;;  %v4643_v33 = vld [vmem:[%s7601_s5 + $0x98] sm:$0xff]  ;;  %v1628_v35 = vld [vmem:[%s7601_s5 + $0x40] sm:$0xff]  ;;  %v4645_v39 = vld [vmem:[%s7601_s5 + $0xa8] sm:$0xff] }
  0x85   : > { %v855_v51 = vmul.f32 %v839_v44, %v775_v28  ;;  %vm794_vm1 = vcmp.ge.f32.partialorder %v778_v46, 1.0  ;;  %v840_v53 = vsub.f32 1.0, %v4563_v52  ;;  %v4564_v54 = vsel %vm793_vm0, 1.0, %v5619_v43  ;;  %v4644_v37 = vld [vmem:[%s7601_s5 + $0xa0] sm:$0xff]  ;;  %v4646_v44 = vld [vmem:[%s7601_s5 + $0xb0] sm:$0xff] }
  0x86   : > { %871 = vst.msk [vmem:[#allocation2 + $0x40] sm:$0xff] %vm862_vm4, %v854_v48  ;;  %v4565_v55 = vsel %vm794_vm1, 1.0, %v5619_v43  ;;  %v779_v56 = vadd.f32 %v763_v47, %v731_v24  ;;  %v841_v57 = vsub.f32 1.0, %v4564_v54  ;;  %v764_v59 = vmul.f32 0.5, %v748_v49  ;;  %v1625_v24 = vld [vmem:[%s7601_s5 + $0x28] sm:$0xff]  ;;  %v4684_v48 = vld [vmem:[%s7601_s5 + $0xc0] sm:$0xff] }
  0x87   : > { %872 = vst.msk [vmem:[#allocation2 + $0x48] sm:$0xff] %vm862_vm4, %v855_v51  ;;  %5059 = vmatmul.mubr.msk.f32.gmra.mrb[8].mxu0 %vm862_vm4, %v4562_v41  ;;  %v842_v58 = vsub.f32 1.0, %v4565_v55  ;;  %v765_v60 = vmul.f32 0.5, %v749_v50  ;;  %v856_v61 = vmul.f32 %v840_v53, %v776_v42  ;;  %v5370_v14 = vpack.c.bf16 %v1621_v12, %v1620_v11  ;;  %v1630_v41 = vld [vmem:[%s7601_s5 + $0x50] sm:$0xff]  ;;  %v1631_v42 = vld [vmem:[%s7601_s5 + $0x58] sm:$0xff]  ;;  %v4685_v49 = vld [vmem:[%s7601_s5 + $0xc8] sm:$0xff] }
  0x88   : > { %5061 = vmatprep.mubr.msk.f32.mxu0 %vm862_vm4, %v4563_v52  ;;  %vm795_vm2 = vcmp.ge.f32.partialorder %v779_v56, 1.0  ;;  %v857_v62 = vmul.f32 %v841_v57, %v777_v45  ;;  %v780_v1 = vadd.f32 %v764_v59, %v732_v36  ;;  %v5394_v16 = vpack.c.bf16 %v4637_v15, %v4636_v13  ;;  %v1629_v36 = vld [vmem:[%s7601_s5 + $0x48] sm:$0xff]  ;;  %v6218_v51 = vld [vmem:[%s7598_s2] ss:$0 sm:$0xff]  ;;  %v6233_v57 = vld [vmem:[%s7600_s4 + $0x1] ss:$0 sm:$0xff] }
  0x89   : > { %v858_v63 = vmul.f32 %v842_v58, %v778_v46  ;;  %v4566_v0 = vsel %vm795_vm2, 1.0, %v5619_v43  ;;  %873 = vst.msk [vmem:[#allocation2 + $0x50] sm:$0xff] %vm862_vm4, %v856_v61  ;;  %v781_v3 = vadd.f32 %v765_v60, %v733_v38  ;;  %5371 = vmatprep.subr.bf16.mxu1 %v5370_v14  ;;  %v5374_v20 = vpack.c.bf16 %v1623_v18, %v1622_v17  ;;  %v4647_v46 = vld [vmem:[%s7601_s5 + $0xb8] sm:$0xff]  ;;  %v6223_v52 = vld [vmem:[%s7599_s3] ss:$0 sm:$0xff]  ;;  %v1201_v61 = vld [vmem:[#allocation7 + $0xa1] sm:$0xff] }
  0x8a   : > { %v843_v2 = vsub.f32 1.0, %v4566_v0  ;;  %874 = vst.msk [vmem:[#allocation2 + $0x58] sm:$0xff] %vm862_vm4, %v857_v62  ;;  %vm796_vm3 = vcmp.ge.f32.partialorder %v780_v1, 1.0  ;;  %5395 = vmatprep.subr.bf16.mxu0 %v5394_v16  ;;  %5373 = vmatpush3.bf16.msra.mxu1 %v5370_v14  ;;  %v5398_v22 = vpack.c.bf16 %v4639_v21, %v4638_v19  ;;  %v5378_v26 = vpack.c.bf16 %v1625_v24, %v1624_v23  ;;  %v1140_v53 = vld [vmem:[#allocation7] sm:$0xff]  ;;  %v1467_v17 = vld [vmem:[#allocation7 + $0x90] sm:$0xff] }
  0x8b   : > { %5062 = vmatmul.mubr.msk.f32.gmra.mrb[10].mxu0 %vm862_vm4, %v4564_v54  ;;  %875 = vst.msk [vmem:[#allocation2 + $0x60] sm:$0xff] %vm862_vm4, %v858_v63  ;;  %v4567_v5 = vsel %vm796_vm3, 1.0, %v5619_v43  ;;  %vm797_vm5 = vcmp.ge.f32.partialorder %v781_v3, 1.0  ;;  %5375 = vmatprep.subr.bf16.mxu1 %v5374_v20  ;;  %v5402_v28 = vpack.c.bf16 %v4641_v27, %v4640_v25  ;;  %v5382_v32 = vpack.c.bf16 %v1627_v30, %v1626_v29  ;;  %v1148_v60 = vld [vmem:[#allocation7 + $0xa0] sm:$0xff]  ;;  %v6266_v23 = vld [vmem:[%s7600_s4 + $0x8] ss:$0 sm:$0xff] }
  0x8c   : > { %5064 = vmatprep.mubr.msk.f32.mxu0 %vm862_vm4, %v4565_v55  ;;  %v859_v4 = vmul.f32 %v843_v2, %v779_v56  ;;  %v844_v6 = vsub.f32 1.0, %v4567_v5  ;;  %v4568_v7 = vsel %vm797_vm5, 1.0, %v5619_v43  ;;  %5397 = vmatpush3.bf16.msra.mxu0 %v5394_v16  ;;  %v5406_v34 = vpack.c.bf16 %v4643_v33, %v4642_v31  ;;  %v6228_v55 = vld [vmem:[%s7600_s4] ss:$0 sm:$0xff]  ;;  %v1193_v56 = vld [vmem:[#allocation7 + $0x1] sm:$0xff]  ;;  %v1521_v24 = vld [vmem:[#allocation7 + $0x91] sm:$0xff] }
  0x8d   : > { %v845_v8 = vsub.f32 1.0, %v4568_v7  ;;  %5399 = vmatprep.subr.bf16.mxu0 %v5398_v22  ;;  %v5386_v38 = vpack.c.bf16 %v1629_v36, %v1628_v35  ;;  %v5410_v40 = vpack.c.bf16 %v4645_v39, %v4644_v37  ;;  %v5390_v45 = vpack.c.bf16 %v1631_v42, %v1630_v41  ;;  %v1574_v25 = vld [vmem:[#allocation7 + $0x92] sm:$0xff]  ;;  %v4688_v29 = vld [vmem:[%s7601_s5 + $0xe0] sm:$0xff]  ;;  %v4689_v30 = vld [vmem:[%s7601_s5 + $0xe8] sm:$0xff] }
  0x8e   : > { %876 = vst.msk [vmem:[#allocation2 + $0x68] sm:$0xff] %vm862_vm4, %v859_v4  ;;  %v860_v9 = vmul.f32 %v844_v6, %v780_v1  ;;  %5377 = vmatpush3.bf16.msra.mxu1 %v5374_v20  ;;  %v5414_v47 = vpack.c.bf16 %v4647_v46, %v4646_v44  ;;  %v6212_v50 = vpack.c.bf16 %v4685_v49, %v4684_v48  ;;  %vm1123_vm6 = vcmask 785408   ;;  %v1246_v4 = vld [vmem:[#allocation7 + $0x2] sm:$0xff]  ;;  %v4690_v35 = vld [vmem:[%s7601_s5 + $0xf0] sm:$0xff]  ;;  %v4691_v36 = vld [vmem:[%s7601_s5 + $0xf8] sm:$0xff] }
  0x8f   : > { %5065 = vmatmul.mubr.msk.f32.gmra.mrb[12].mxu0 %vm862_vm4, %v4566_v0  ;;  %v861_v10 = vmul.f32 %v845_v8, %v781_v3  ;;  %5379 = vmatprep.subr.bf16.mxu1 %v5378_v26  ;;  %v1161_v0 = vmul.f32 %v6228_v55, %v1140_v53  ;;  %v1214_v1 = vmul.f32 %v6233_v57, %v1193_v56  ;;  %v6286_v33 = vld [vmem:[%s7600_s4 + $0x5] ss:$0 sm:$0xff]  ;;  %v6303_v41 = vld [vmem:[%s7600_s4 + $0xa] ss:$0 sm:$0xff] }
  0x90   : > { %5067 = vmatprep.mubr.msk.f32.mxu0 %vm862_vm4, %v4567_v5  ;;  %877 = vst.msk [vmem:[#allocation2 + $0x70] sm:$0xff] %vm862_vm4, %v860_v9  ;;  %5401 = vmatpush3.bf16.msra.mxu0 %v5398_v22  ;;  %v6244_v5 = vld [vmem:[%s7600_s4 + $0x2] ss:$0 sm:$0xff]  ;;  %v1169_v6 = vmul.f32 %v6228_v55, %v1148_v60  ;;  %v6261_v22 = vld [vmem:[%s7600_s4 + $0x4] ss:$0 sm:$0xff]  ;;  %v6306_v42 = vmul.f32 %v6266_v23, %v1467_v17 }
  0x91   : > { %878 = vst.msk [vmem:[#allocation2 + $0x78] sm:$0xff] %vm862_vm4, %v861_v10  ;;  %5403 = vmatprep.subr.bf16.mxu0 %v5402_v28  ;;  %v1254_v10 = vld [vmem:[#allocation7 + $0xa2] sm:$0xff]  ;;  %v1230_v13 = vadd.f32 %v1214_v1, %v1161_v0  ;;  %v1267_v14 = vmul.f32 %v6244_v5, %v1246_v4 }
  0x92   : > { %5381 = vmatpush3.bf16.msra.mxu1 %v5378_v26  ;;  %v1275_v19 = vmul.f32 %v6244_v5, %v1254_v10  ;;  %v4686_v26 = vld [vmem:[%s7601_s5 + $0xd0] sm:$0xff]  ;;  %v6332_v1 = vld [vmem:[%s7600_s4 + $0x6] ss:$0 sm:$0xff] }
  0x93   : > { %5068 = vmatmul.mubr.msk.f32.gmra.mrb[14].mxu0 %vm862_vm4, %v4568_v7  ;;  %5383 = vmatprep.subr.bf16.mxu1 %v5382_v32  ;;  %v1222_v7 = vmul.f32 %v6233_v57, %v1201_v61 }
  0x94   : > { %5405 = vmatpush3.bf16.msra.mxu0 %v5402_v28  ;;  %v4687_v28 = vld [vmem:[%s7601_s5 + $0xd8] sm:$0xff] }
  0x95   : > { %5407 = vmatprep.subr.bf16.mxu0 %v5406_v34  ;;  %v1238_v18 = vadd.f32 %v1222_v7, %v1169_v6  ;;  %v6318_v56 = vpack.c.bf16 %v4687_v28, %v4686_v26 }
  0x96   : > { %5385 = vmatpush3.bf16.msra.mxu1 %v5382_v32  ;;  %v1283_v32 = vadd.f32 %v1267_v14, %v1230_v13 }
  0x97   : > { %5387 = vmatprep.subr.bf16.mxu1 %v5386_v38 }
  0x98   : > { %5409 = vmatpush3.bf16.msra.mxu0 %v5406_v34  ;;  %v6291_v34 = vld [vmem:[%s7600_s4 + $0x9] ss:$0 sm:$0xff] }
  0x99   : > { %5411 = vmatprep.subr.bf16.mxu0 %v5410_v40  ;;  %v6309_v44 = vmul.f32 %v6291_v34, %v1521_v24 }
  0x9a   : > { %5389 = vmatpush3.bf16.msra.mxu1 %v5386_v38 }
  0x9b   : > { %5391 = vmatprep.subr.bf16.mxu1 %v5390_v45 }
  0x9c   : > { %5413 = vmatpush3.bf16.msra.mxu0 %v5410_v40 }
  0x9d   : > { %5415 = vmatprep.subr.bf16.mxu0 %v5414_v47 }
  0x9e   : > { %5393 = vmatpush3.bf16.msra.mxu1 %v5390_v45  ;;  %v6311_v45 = vadd.f32 %v1275_v19, %v1238_v18 }
  0x9f   : > { %5419 = vmatprep.subr.bf16.mxu1 %v6212_v50 }
  0xa0   : > { %5417 = vmatpush3.bf16.msra.mxu0 %v5414_v47 }
 0x14a   : > { %v5048_v54 = vpop.f32.mrb[0].mxu0 }
 0x14b   : > { %v1084_v58 = vmul.f32 %v5048_v54, %v6218_v51  ;;  %v997_v59 = vpop.f32.mrb[1].mxu0  ;;  %v6316_v54 = vmul.f32 %v6303_v41, %v1574_v25 }
 0x14c   : > { %v1083_v62 = vmul.f32 %v6218_v51, %v997_v59 }
 0x14d   : > { %v1107_v63 = vadd.f32 %v6223_v52, %v1084_v58  ;;  %v6320_v58 = vpack.c.bf16 %v4689_v30, %v4688_v29 }
 0x14e   : > { %v1106_v2 = vadd.f32 %v6223_v52, %v1083_v62  ;;  %v5051_v3 = vpop.f32.mrb[2].mxu0 }
 0x14f   : > { %1125 = vst.msk [vmem:[#allocation7 + $0x21] sm:$0xff] %vm1123_vm6, %v1107_v63  ;;  %v1086_v8 = vmul.f32 %v5051_v3, %v6218_v51  ;;  %v1007_v9 = vpop.f32.mrb[3].mxu0  ;;  %v6326_v63 = vpack.c.bf16 %v4691_v36, %v4690_v35 }
 0x150   : > { %1124 = vst.msk [vmem:[#allocation7 + $0x11] sm:$0xff] %vm1123_vm6, %v1106_v2  ;;  %v1085_v11 = vmul.f32 %v6218_v51, %v1007_v9 }
 0x151   : > { %v1109_v12 = vadd.f32 %v6223_v52, %v1086_v8 }
 0x152   : > { %v1108_v15 = vadd.f32 %v6223_v52, %v1085_v11  ;;  %v5054_v16 = vpop.f32.mrb[4].mxu0 }
 0x153   : > { %1127 = vst.msk [vmem:[#allocation7 + $0x41] sm:$0xff] %vm1123_vm6, %v1109_v12  ;;  %v1088_v20 = vmul.f32 %v5054_v16, %v6218_v51  ;;  %v1017_v21 = vpop.f32.mrb[5].mxu0 }
 0x154   : > { %1126 = vst.msk [vmem:[#allocation7 + $0x31] sm:$0xff] %vm1123_vm6, %v1108_v15  ;;  %v1087_v27 = vmul.f32 %v6218_v51, %v1017_v21 }
 0x155   : > { %v1111_v31 = vadd.f32 %v6223_v52, %v1088_v20 }
 0x156   : > { %v1110_v37 = vadd.f32 %v6223_v52, %v1087_v27  ;;  %v5057_v38 = vpop.f32.mrb[6].mxu0  ;;  %v1460_v39 = vld [vmem:[#allocation7 + $0x20] sm:$0xff] }
 0x157   : > { %v1514_v40 = vld [vmem:[#allocation7 + $0x21] sm:$0xff]  ;;  %1129 = vst.msk [vmem:[#allocation7 + $0x61] sm:$0xff] %vm1123_vm6, %v1111_v31  ;;  %v1090_v46 = vmul.f32 %v5057_v38, %v6218_v51  ;;  %v1027_v47 = vpop.f32.mrb[7].mxu0  ;;  %v1299_v48 = vld [vmem:[#allocation7 + $0x10] sm:$0xff]  ;;  %v1482_v62 = vmul.f32 %v6266_v23, %v1460_v39  ;;  %v1163_v15 = vmul.f32 %v6228_v55, %v1460_v39  ;;  %v1322_v19 = vmul.f32 %v6261_v22, %v1460_v39 }
 0x158   : > { %v1353_v49 = vld [vmem:[#allocation7 + $0x11] sm:$0xff]  ;;  %v1567_v53 = vld [vmem:[#allocation7 + $0x22] sm:$0xff]  ;;  %1128 = vst.msk [vmem:[#allocation7 + $0x51] sm:$0xff] %vm1123_vm6, %v1110_v37  ;;  %v1089_v59 = vmul.f32 %v6218_v51, %v1027_v47  ;;  %v1321_v60 = vmul.f32 %v6261_v22, %v1299_v48  ;;  %v1535_v2 = vmul.f32 %v6291_v34, %v1514_v40  ;;  %v1162_v3 = vmul.f32 %v6228_v55, %v1299_v48 }
 0x159   : > { %v1406_v61 = vld [vmem:[#allocation7 + $0x12] sm:$0xff]  ;;  %v1113_v0 = vadd.f32 %v6223_v52, %v1090_v46  ;;  %v1215_v4 = vmul.f32 %v6233_v57, %v1353_v49  ;;  %v1374_v9 = vmul.f32 %v6286_v33, %v1353_v49  ;;  %v1588_v10 = vmul.f32 %v6303_v41, %v1567_v53 }
 0x15a   : > { %v1112_v6 = vadd.f32 %v6223_v52, %v1089_v59  ;;  %v5060_v7 = vpop.f32.mrb[8].mxu0  ;;  %v1337_v8 = vadd.f32 %v1321_v60, %v1283_v32  ;;  %v1268_v14 = vmul.f32 %v6244_v5, %v1406_v61  ;;  %v1427_v18 = vmul.f32 %v6332_v1, %v1406_v61 }
 0x15b   : > { %1131 = vst.msk [vmem:[#allocation7 + $0x81] sm:$0xff] %vm1123_vm6, %v1113_v0  ;;  %v1092_v11 = vmul.f32 %v5060_v7, %v6218_v51  ;;  %v1037_v12 = vpop.f32.mrb[9].mxu0  ;;  %v1231_v13 = vadd.f32 %v1215_v4, %v1162_v3  ;;  %v1461_v20 = vld [vmem:[#allocation7 + $0x30] sm:$0xff]  ;;  %v1375_v25 = vmul.f32 %v6286_v33, %v1514_v40  ;;  %v1216_v27 = vmul.f32 %v6233_v57, %v1514_v40 }
 0x15c   : > { %1130 = vst.msk [vmem:[#allocation7 + $0x71] sm:$0xff] %vm1123_vm6, %v1112_v6  ;;  %v1091_v16 = vmul.f32 %v6218_v51, %v1037_v12  ;;  %v1390_v17 = vadd.f32 %v1374_v9, %v1337_v8  ;;  %v1515_v26 = vld [vmem:[#allocation7 + $0x31] sm:$0xff]  ;;  %v1428_v31 = vmul.f32 %v6332_v1, %v1567_v53  ;;  %v1269_v35 = vmul.f32 %v6244_v5, %v1567_v53  ;;  %v1462_v12 = vld [vmem:[#allocation7 + $0x40] sm:$0xff] }
 0x15d   : > { %v1115_v21 = vadd.f32 %v6223_v52, %v1092_v11  ;;  %v1284_v24 = vadd.f32 %v1268_v14, %v1231_v13  ;;  %v1568_v32 = vld [vmem:[#allocation7 + $0x32] sm:$0xff]  ;;  %v1232_v39 = vadd.f32 %v1216_v27, %v1163_v15  ;;  %v1323_v46 = vmul.f32 %v6261_v22, %v1461_v20 }
 0x15e   : > { %v1114_v28 = vadd.f32 %v6223_v52, %v1091_v16  ;;  %v5063_v29 = vpop.f32.mrb[10].mxu0  ;;  %v1443_v30 = vadd.f32 %v1427_v18, %v1390_v17  ;;  %v1483_v48 = vmul.f32 %v6266_v23, %v1461_v20  ;;  %v1536_v49 = vmul.f32 %v6291_v34, %v1515_v26 }
 0x15f   : > { %1133 = vst.msk [vmem:[#allocation7 + $0xc1] sm:$0xff] %vm1123_vm6, %v1115_v21  ;;  %v1094_v36 = vmul.f32 %v5063_v29, %v6218_v51  ;;  %v1047_v37 = vpop.f32.mrb[11].mxu0  ;;  %v1338_v38 = vadd.f32 %v1322_v19, %v1284_v24  ;;  %v1589_v60 = vmul.f32 %v6303_v41, %v1568_v32  ;;  %v1285_v61 = vadd.f32 %v1269_v35, %v1232_v39  ;;  %v4692_v24 = vld [vmem:[%s7601_s5 + $0x100] sm:$0xff] }
 0x160   : > { %1132 = vst.msk [vmem:[#allocation7 + $0xb1] sm:$0xff] %vm1123_vm6, %v1114_v28  ;;  %v1093_v40 = vmul.f32 %v6218_v51, %v1047_v37  ;;  %v1498_v47 = vadd.f32 %v1482_v62, %v1443_v30  ;;  %v1376_v6 = vmul.f32 %v6286_v33, %v1515_v26  ;;  %v1164_v7 = vmul.f32 %v6228_v55, %v1461_v20  ;;  %v1516_v20 = vld [vmem:[#allocation7 + $0x41] sm:$0xff] }
 0x161   : > { %v1117_v53 = vadd.f32 %v6223_v52, %v1094_v36  ;;  %v1391_v59 = vadd.f32 %v1375_v25, %v1338_v38  ;;  %v1339_v11 = vadd.f32 %v1323_v46, %v1285_v61  ;;  %v1217_v13 = vmul.f32 %v6233_v57, %v1515_v26  ;;  %v4693_v25 = vld [vmem:[%s7601_s5 + $0x108] sm:$0xff] }
 0x162   : > { %v1116_v0 = vadd.f32 %v6223_v52, %v1093_v40  ;;  %v5066_v3 = vpop.f32.mrb[12].mxu0  ;;  %v1551_v4 = vadd.f32 %v1535_v2, %v1498_v47  ;;  %v1429_v2 = vmul.f32 %v6332_v1, %v1568_v32  ;;  %v1270_v16 = vmul.f32 %v6244_v5, %v1568_v32  ;;  %v1569_v35 = vld [vmem:[#allocation7 + $0x42] sm:$0xff] }
 0x163   : > { %1135 = vst.msk [vmem:[#allocation7 + $0xe1] sm:$0xff] %vm1123_vm6, %v1117_v53  ;;  %v1096_v62 = vmul.f32 %v5066_v3, %v6218_v51  ;;  %v1057_v8 = vpop.f32.mrb[13].mxu0  ;;  %v1444_v9 = vadd.f32 %v1428_v31, %v1391_v59  ;;  %v1392_v19 = vadd.f32 %v1376_v6, %v1339_v11  ;;  %v1233_v21 = vadd.f32 %v1217_v13, %v1164_v7  ;;  %v4694_v59 = vld [vmem:[%s7601_s5 + $0x110] sm:$0xff] }
 0x164   : > { %1134 = vst.msk [vmem:[#allocation7 + $0xd1] sm:$0xff] %vm1123_vm6, %v1116_v0  ;;  %v1095_v14 = vmul.f32 %v6218_v51, %v1057_v8  ;;  %v6371_v15 = vadd.f32 %v1588_v10, %v1551_v4  ;;  %v1484_v27 = vmul.f32 %v6266_v23, %v1462_v12  ;;  %v1324_v28 = vmul.f32 %v6261_v22, %v1462_v12  ;;  %v1517_v3 = vld [vmem:[#allocation7 + $0x51] sm:$0xff] }
 0x165   : > { %v1119_v17 = vadd.f32 %v6223_v52, %v1096_v62  ;;  %v1499_v18 = vadd.f32 %v1483_v48, %v1444_v9  ;;  %v1445_v32 = vadd.f32 %v1429_v2, %v1392_v19  ;;  %v1286_v36 = vadd.f32 %v1270_v16, %v1233_v21  ;;  %v1571_v21 = vld [vmem:[#allocation7 + $0x62] sm:$0xff] }
 0x166   : > { %v1118_v10 = vadd.f32 %v6223_v52, %v1095_v14  ;;  %v5069_v26 = vpop.f32.mrb[14].mxu0  ;;  %5094 = vmatprep.mubr.msk.f32.mxu1 %vm1123_vm6, %v6371_v15  ;;  %5142 = vmatprep.mubr.msk.f32.mxu0 %vm1123_vm6, %v6371_v15  ;;  %v1537_v38 = vmul.f32 %v6291_v34, %v1516_v20  ;;  %v1377_v39 = vmul.f32 %v6286_v33, %v1516_v20 }
 0x167   : > { %1137 = vst.msk [vmem:[#allocation7 + $0x101] sm:$0xff] %vm1123_vm6, %v1119_v17  ;;  %v1098_v29 = vmul.f32 %v5069_v26, %v6218_v51  ;;  %v1067_v30 = vpop.f32.mrb[15].mxu0  ;;  %v1552_v31 = vadd.f32 %v1536_v49, %v1499_v18  ;;  %v6395_v46 = vpack.c.bf16 %v4693_v25, %v4692_v24  ;;  %v1500_v48 = vadd.f32 %v1484_v27, %v1445_v32  ;;  %v1463_v49 = vld [vmem:[#allocation7 + $0x50] sm:$0xff]  ;;  %v1464_v17 = vld [vmem:[#allocation7 + $0x60] sm:$0xff] }
 0x168   : > { %1136 = vst.msk [vmem:[#allocation7 + $0xf1] sm:$0xff] %vm1123_vm6, %v1118_v10  ;;  %v1097_v37 = vmul.f32 %v6218_v51, %v1067_v30  ;;  %v1340_v53 = vadd.f32 %v1324_v28, %v1286_v36  ;;  %v4695_v51 = vld [vmem:[%s7601_s5 + $0x118] sm:$0xff]  ;;  %v1590_v0 = vmul.f32 %v6303_v41, %v1569_v35  ;;  %v1165_v4 = vmul.f32 %v6228_v55, %v1462_v12  ;;  %v1465_v36 = vld [vmem:[#allocation7 + $0x70] sm:$0xff] }
 0x169   : > { %v1121_v40 = vadd.f32 %v6223_v52, %v1098_v29  ;;  %v6398_v47 = vadd.f32 %v1589_v60, %v1552_v31  ;;  %v1218_v60 = vmul.f32 %v6233_v57, %v1516_v20  ;;  %v1553_v6 = vadd.f32 %v1537_v38, %v1500_v48  ;;  %v1518_v20 = vld [vmem:[#allocation7 + $0x61] sm:$0xff]  ;;  %v1519_v48 = vld [vmem:[#allocation7 + $0x71] sm:$0xff] }
 0x16a   : > { %v1120_v61 = vadd.f32 %v6223_v52, %v1097_v37  ;;  %v1393_v7 = vadd.f32 %v1377_v39, %v1340_v53  ;;  %v1430_v62 = vmul.f32 %v6332_v1, %v1569_v35  ;;  %v1570_v52 = vld [vmem:[#allocation7 + $0x52] sm:$0xff]  ;;  %v1271_v9 = vmul.f32 %v6244_v5, %v1569_v35 }
 0x16b   : > { %1139 = vst.msk [vmem:[#allocation7 + $0x121] sm:$0xff] %vm1123_vm6, %v1121_v40  ;;  %5095 = vmatmul.mubr.msk.f32.vlgmr.msra.gmra.mrb[0].mxu1 %vm1123_vm6, %v6398_v47  ;;  %5143 = vmatmul.mubr.msk.f32.vlgmr.msra.gmra.mrb[16].mxu0 %vm1123_vm6, %v6398_v47  ;;  %v1234_v8 = vadd.f32 %v1218_v60, %v1165_v4  ;;  %v1325_v11 = vmul.f32 %v6261_v22, %v1463_v49 }
 0x16c   : > { %1138 = vst.msk [vmem:[#allocation7 + $0x111] sm:$0xff] %vm1123_vm6, %v1120_v61  ;;  %5421 = vmatpush3.bf16.msra.mxu1 %v6212_v50  ;;  %v6420_v12 = vpack.c.bf16 %v4695_v51, %v4694_v59  ;;  %v6422_v13 = vadd.f32 %v1590_v0, %v1553_v6  ;;  %v1446_v14 = vadd.f32 %v1430_v62, %v1393_v7 }
 0x16d   : > { %v1485_v2 = vmul.f32 %v6266_v23, %v1463_v49  ;;  %v1538_v16 = vmul.f32 %v6291_v34, %v1517_v3  ;;  %5423 = vmatprep.subr.bf16.mxu1 %v6318_v56  ;;  %v1591_v18 = vmul.f32 %v6303_v41, %v1570_v52  ;;  %v1287_v19 = vadd.f32 %v1271_v9, %v1234_v8 }
 0x16e   : > { %v1166_v24 = vmul.f32 %v6228_v55, %v1463_v49  ;;  %v1219_v50 = vmul.f32 %v6233_v57, %v1517_v3  ;;  %5097 = vmatprep.mubr.msk.f32.mxu1 %vm1123_vm6, %v6422_v13  ;;  %5145 = vmatprep.mubr.msk.f32.mxu0 %vm1123_vm6, %v6422_v13  ;;  %v1378_v10 = vmul.f32 %v6286_v33, %v1517_v3  ;;  %v1572_v3 = vld [vmem:[#allocation7 + $0x72] sm:$0xff] }
 0x16f   : > { %v1501_v25 = vadd.f32 %v1485_v2, %v1446_v14  ;;  %v1431_v26 = vmul.f32 %v6332_v1, %v1570_v52  ;;  %v1341_v27 = vadd.f32 %v1325_v11, %v1287_v19  ;;  %v1486_v28 = vmul.f32 %v6266_v23, %v1464_v17  ;;  %v1466_v11 = vld [vmem:[#allocation7 + $0x80] sm:$0xff] }
 0x170   : > { %v1235_v29 = vadd.f32 %v1219_v50, %v1166_v24  ;;  %v1272_v30 = vmul.f32 %v6244_v5, %v1570_v52  ;;  %5425 = vmatpush3.bf16.msra.mxu1 %v6318_v56  ;;  %v1539_v32 = vmul.f32 %v6291_v34, %v1518_v20  ;;  %v1592_v35 = vmul.f32 %v6303_v41, %v1571_v21  ;;  %v1520_v14 = vld [vmem:[#allocation7 + $0x81] sm:$0xff] }
 0x171   : > { %v1554_v31 = vadd.f32 %v1538_v16, %v1501_v25  ;;  %v1167_v37 = vmul.f32 %v6228_v55, %v1464_v17  ;;  %5427 = vmatprep.subr.bf16.mxu1 %v6320_v58  ;;  %v1394_v38 = vadd.f32 %v1378_v10, %v1341_v27  ;;  %v1326_v40 = vmul.f32 %v6261_v22, %v1464_v17  ;;  %v1361_v25 = vld [vmem:[#allocation7 + $0xb1] sm:$0xff] }
 0x172   : > { %v1288_v39 = vadd.f32 %v1272_v30, %v1235_v29  ;;  %v1220_v53 = vmul.f32 %v6233_v57, %v1518_v20  ;;  %v1379_v56 = vmul.f32 %v6286_v33, %v1518_v20  ;;  %v1432_v59 = vmul.f32 %v6332_v1, %v1571_v21 }
 0x173   : > { %v6445_v49 = vadd.f32 %v1591_v18, %v1554_v31  ;;  %v1273_v51 = vmul.f32 %v6244_v5, %v1571_v21  ;;  %v1447_v61 = vadd.f32 %v1431_v26, %v1394_v38  ;;  %v1327_v60 = vmul.f32 %v6261_v22, %v1465_v36 }
 0x174   : > { %v1342_v0 = vadd.f32 %v1326_v40, %v1288_v39  ;;  %v1236_v4 = vadd.f32 %v1220_v53, %v1167_v37  ;;  %5429 = vmatpush3.bf16.msra.mxu1 %v6320_v58  ;;  %v1487_v6 = vmul.f32 %v6266_v23, %v1465_v36  ;;  %v1540_v7 = vmul.f32 %v6291_v34, %v1519_v48  ;;  %v1307_v58 = vld [vmem:[#allocation7 + $0xb0] sm:$0xff] }
 0x175   : > { %5098 = vmatmul.mubr.msk.f32.gmra.mrb[2].mxu1 %vm1123_vm6, %v6445_v49  ;;  %5146 = vmatmul.mubr.msk.f32.gmra.mrb[18].mxu0 %vm1123_vm6, %v6445_v49  ;;  %v1168_v62 = vmul.f32 %v6228_v55, %v1465_v36  ;;  %v1502_v52 = vadd.f32 %v1486_v28, %v1447_v61  ;;  %v1221_v2 = vmul.f32 %v6233_v57, %v1519_v48  ;;  %v1414_v37 = vld [vmem:[#allocation7 + $0xb2] sm:$0xff] }
 0x176   : > { %v1395_v8 = vadd.f32 %v1379_v56, %v1342_v0  ;;  %v1289_v9 = vadd.f32 %v1273_v51, %v1236_v4  ;;  %5431 = vmatprep.subr.bf16.mxu1 %v6326_v63  ;;  %v1593_v16 = vmul.f32 %v6303_v41, %v1572_v3  ;;  %v1380_v17 = vmul.f32 %v6286_v33, %v1519_v48  ;;  %v1468_v56 = vld [vmem:[#allocation7 + $0xc0] sm:$0xff] }
 0x177   : > { %v1433_v18 = vmul.f32 %v6332_v1, %v1572_v3  ;;  %v1274_v19 = vmul.f32 %v6244_v5, %v1572_v3  ;;  %v1555_v20 = vadd.f32 %v1539_v32, %v1502_v52  ;;  %v1237_v50 = vadd.f32 %v1221_v2, %v1168_v62  ;;  %v1573_v32 = vld [vmem:[#allocation7 + $0x82] sm:$0xff] }
 0x178   : > { %v1448_v21 = vadd.f32 %v1432_v59, %v1395_v8  ;;  %v1343_v24 = vadd.f32 %v1327_v60, %v1289_v9  ;;  %5433 = vmatpush3.bf16.msra.mxu1 %v6326_v63  ;;  %v1488_v10 = vmul.f32 %v6266_v23, %v1466_v11  ;;  %v1541_v26 = vmul.f32 %v6291_v34, %v1520_v14  ;;  %v1575_v52 = vld [vmem:[#allocation7 + $0xc2] sm:$0xff] }
 0x179   : > { %v1328_v27 = vmul.f32 %v6261_v22, %v1466_v11  ;;  %v1329_v28 = vmul.f32 %v6261_v22, %v1307_v58  ;;  %5435 = vmatprep.subr.bf16.mxu1 %v6395_v46  ;;  %v6471_v29 = vadd.f32 %v1592_v35, %v1555_v20  ;;  %v1290_v36 = vadd.f32 %v1274_v19, %v1237_v50 }
 0x17a   : > { %v1503_v30 = vadd.f32 %v1487_v6, %v1448_v21  ;;  %v1396_v31 = vadd.f32 %v1380_v17, %v1343_v24  ;;  %v1381_v38 = vmul.f32 %v6286_v33, %v1520_v14  ;;  %v1382_v39 = vmul.f32 %v6286_v33, %v1361_v25  ;;  %v1469_v17 = vld [vmem:[#allocation7 + $0xd0] sm:$0xff] }
 0x17b   : > { %v1345_v63 = vadd.f32 %v1329_v28, %v6311_v45  ;;  %v1170_v40 = vmul.f32 %v6228_v55, %v1307_v58  ;;  %5100 = vmatprep.mubr.msk.f32.mxu1 %vm1123_vm6, %v6471_v29  ;;  %5148 = vmatprep.mubr.msk.f32.mxu0 %vm1123_vm6, %v6471_v29  ;;  %v1344_v53 = vadd.f32 %v1328_v27, %v1290_v36  ;;  %v1522_v45 = vld [vmem:[#allocation7 + $0xc1] sm:$0xff]  ;;  %v1523_v27 = vld [vmem:[#allocation7 + $0xd1] sm:$0xff] }
 0x17c   : > { %v1556_v35 = vadd.f32 %v1540_v7, %v1503_v30  ;;  %v1449_v48 = vadd.f32 %v1433_v18, %v1396_v31  ;;  %v1594_v59 = vmul.f32 %v6303_v41, %v1573_v32  ;;  %v1435_v61 = vmul.f32 %v6332_v1, %v1414_v37  ;;  %5437 = vmatpush3.bf16.msra.mxu1 %v6395_v46 }
 0x17d   : > { %v1398_v51 = vadd.f32 %v1382_v39, %v1345_v63  ;;  %v1223_v0 = vmul.f32 %v6233_v57, %v1361_v25  ;;  %v1397_v60 = vadd.f32 %v1381_v38, %v1344_v53  ;;  %v1434_v6 = vmul.f32 %v6332_v1, %v1573_v32  ;;  %5439 = vmatprep.subr.bf16.mxu1 %v6420_v12 }
 0x17e   : > { %v6485_v3 = vadd.f32 %v1593_v16, %v1556_v35  ;;  %v1504_v4 = vadd.f32 %v1488_v10, %v1449_v48  ;;  %v1490_v62 = vmul.f32 %v6266_v23, %v1468_v56  ;;  %v1276_v9 = vmul.f32 %v6244_v5, %v1414_v37  ;;  %v1470_v48 = vld [vmem:[#allocation7 + $0xe0] sm:$0xff] }
 0x17f   : > { %v1451_v7 = vadd.f32 %v1435_v61, %v1398_v51  ;;  %v1239_v8 = vadd.f32 %v1223_v0, %v1170_v40  ;;  %v1450_v11 = vadd.f32 %v1434_v6, %v1397_v60  ;;  %v1543_v14 = vmul.f32 %v6291_v34, %v1522_v45  ;;  %v1524_v61 = vld [vmem:[#allocation7 + $0xe1] sm:$0xff] }
 0x180   : > { %5101 = vmatmul.mubr.msk.f32.gmra.mrb[4].mxu1 %vm1123_vm6, %v6485_v3  ;;  %5149 = vmatmul.mubr.msk.f32.gmra.mrb[20].mxu0 %vm1123_vm6, %v6485_v3  ;;  %v1557_v46 = vadd.f32 %v1541_v26, %v1504_v4  ;;  %v1330_v16 = vmul.f32 %v6261_v22, %v1468_v56  ;;  %v1171_v18 = vmul.f32 %v6228_v55, %v1468_v56 }
 0x181   : > { %v1506_v2 = vadd.f32 %v1490_v62, %v1451_v7  ;;  %v1292_v58 = vadd.f32 %v1276_v9, %v1239_v8  ;;  %5441 = vmatpush3.bf16.msra.mxu1 %v6420_v12  ;;  %v1505_v20 = vadd.f32 %v6306_v42, %v1450_v11  ;;  %v1596_v21 = vmul.f32 %v6303_v41, %v1575_v52  ;;  %v1576_v42 = vld [vmem:[#allocation7 + $0xd2] sm:$0xff] }
 0x182   : > { %v6499_v19 = vadd.f32 %v1594_v59, %v1557_v46  ;;  %v1224_v24 = vmul.f32 %v6233_v57, %v1522_v45  ;;  %v1383_v10 = vmul.f32 %v6286_v33, %v1522_v45  ;;  %v1277_v26 = vmul.f32 %v6244_v5, %v1575_v52  ;;  %v1577_v45 = vld [vmem:[#allocation7 + $0xe2] sm:$0xff] }
 0x183   : > { %v1559_v50 = vadd.f32 %v1543_v14, %v1506_v2  ;;  %v1346_v25 = vadd.f32 %v1330_v16, %v1292_v58  ;;  %v1558_v12 = vadd.f32 %v6309_v44, %v1505_v20  ;;  %v1331_v30 = vmul.f32 %v6261_v22, %v1469_v17 }
 0x184   : > { %5103 = vmatprep.mubr.msk.f32.mxu1 %vm1123_vm6, %v6499_v19  ;;  %5151 = vmatprep.mubr.msk.f32.mxu0 %vm1123_vm6, %v6499_v19  ;;  %v1240_v28 = vadd.f32 %v1224_v24, %v1171_v18  ;;  %v1436_v36 = vmul.f32 %v6332_v1, %v1575_v52  ;;  %v1491_v37 = vmul.f32 %v6266_v23, %v1469_v17  ;;  %v1471_v52 = vld [vmem:[#allocation7 + $0xf0] sm:$0xff] }
 0x185   : > { %v6512_v31 = vadd.f32 %v1596_v21, %v1559_v50  ;;  %v1399_v32 = vadd.f32 %v1383_v10, %v1346_v25  ;;  %v6517_v38 = vadd.f32 %v6316_v54, %v1558_v12  ;;  %v1384_v39 = vmul.f32 %v6286_v33, %v1523_v27  ;;  %v1525_v18 = vld [vmem:[#allocation7 + $0xf1] sm:$0xff] }
 0x186   : > { %v1293_v63 = vadd.f32 %v1277_v26, %v1240_v28  ;;  %v1172_v44 = vmul.f32 %v6228_v55, %v1469_v17  ;;  %v1544_v35 = vmul.f32 %v6291_v34, %v1523_v27  ;;  %v1225_v53 = vmul.f32 %v6233_v57, %v1523_v27  ;;  %v1578_v24 = vld [vmem:[#allocation7 + $0xf2] sm:$0xff] }
 0x187   : > { %v1452_v40 = vadd.f32 %v1436_v36, %v1399_v32  ;;  %v1278_v56 = vmul.f32 %v6244_v5, %v1576_v42  ;;  %5104 = vmatmul.mubr.msk.f32.gmra.mrb[6].mxu1 %vm1123_vm6, %v6517_v38  ;;  %5152 = vmatmul.mubr.msk.f32.gmra.mrb[22].mxu0 %vm1123_vm6, %v6517_v38  ;;  %v1597_v54 = vmul.f32 %v6303_v41, %v1576_v42 }
 0x188   : > { %v1347_v59 = vadd.f32 %v1331_v30, %v1293_v63  ;;  %v1437_v51 = vmul.f32 %v6332_v1, %v1576_v42  ;;  %5106 = vmatprep.mubr.msk.f32.mxu1 %vm1123_vm6, %v6512_v31  ;;  %5154 = vmatprep.mubr.msk.f32.mxu0 %vm1123_vm6, %v6512_v31  ;;  %v1241_v4 = vadd.f32 %v1225_v53, %v1172_v44  ;;  %v1472_v63 = vld [vmem:[#allocation7 + $0x100] sm:$0xff] }
 0x189   : > { %v1507_v0 = vadd.f32 %v1491_v37, %v1452_v40  ;;  %v1332_v60 = vmul.f32 %v6261_v22, %v1470_v48  ;;  %v1492_v7 = vmul.f32 %v6266_v23, %v1470_v48  ;;  %v1545_v62 = vmul.f32 %v6291_v34, %v1524_v61 }
 0x18a   : > { %v1400_v6 = vadd.f32 %v1384_v39, %v1347_v59  ;;  %v1173_v8 = vmul.f32 %v6228_v55, %v1470_v48  ;;  %v1294_v46 = vadd.f32 %v1278_v56, %v1241_v4  ;;  %v1226_v11 = vmul.f32 %v6233_v57, %v1524_v61  ;;  %v1579_v48 = vld [vmem:[#allocation7 + $0x102] sm:$0xff] }
 0x18b   : > { %v1560_v9 = vadd.f32 %v1544_v35, %v1507_v0  ;;  %v1279_v14 = vmul.f32 %v6244_v5, %v1577_v45  ;;  %v1598_v58 = vmul.f32 %v6303_v41, %v1577_v45  ;;  %v1385_v16 = vmul.f32 %v6286_v33, %v1524_v61  ;;  %v1526_v35 = vld [vmem:[#allocation7 + $0x101] sm:$0xff] }
 0x18c   : > { %v1453_v2 = vadd.f32 %v1437_v51, %v1400_v6  ;;  %v1438_v17 = vmul.f32 %v6332_v1, %v1577_v45  ;;  %v1348_v21 = vadd.f32 %v1332_v60, %v1294_v46  ;;  %v1242_v50 = vadd.f32 %v1226_v11, %v1173_v8  ;;  %v1473_v60 = vld [vmem:[#allocation7 + $0x110] sm:$0xff] }
 0x18d   : > { %v6543_v20 = vadd.f32 %v1597_v54, %v1560_v9  ;;  %v1333_v25 = vmul.f32 %v6261_v22, %v1471_v52  ;;  %v1493_v26 = vmul.f32 %v6266_v23, %v1471_v52  ;;  %v1386_v12 = vmul.f32 %v6286_v33, %v1525_v18 }
 0x18e   : > { %v1508_v10 = vadd.f32 %v1492_v7, %v1453_v2  ;;  %v1174_v27 = vmul.f32 %v6228_v55, %v1471_v52  ;;  %v1401_v42 = vadd.f32 %v1385_v16, %v1348_v21  ;;  %v1295_v28 = vadd.f32 %v1279_v14, %v1242_v50  ;;  %v1527_v14 = vld [vmem:[#allocation7 + $0x111] sm:$0xff] }
 0x18f   : > { %5107 = vmatmul.mubr.msk.f32.gmra.mrb[8].mxu1 %vm1123_vm6, %v6543_v20  ;;  %5155 = vmatmul.mubr.msk.f32.gmra.mrb[24].mxu0 %vm1123_vm6, %v6543_v20  ;;  %v1227_v30 = vmul.f32 %v6233_v57, %v1525_v18  ;;  %v1546_v36 = vmul.f32 %v6291_v34, %v1525_v18  ;;  %v1439_v37 = vmul.f32 %v6332_v1, %v1578_v24  ;;  %v1580_v2 = vld [vmem:[#allocation7 + $0x112] sm:$0xff] }
 0x190   : > { %v1561_v32 = vadd.f32 %v1545_v62, %v1508_v10  ;;  %v1280_v39 = vmul.f32 %v6244_v5, %v1578_v24  ;;  %v1454_v44 = vadd.f32 %v1438_v17, %v1401_v42  ;;  %v1349_v40 = vadd.f32 %v1333_v25, %v1295_v28  ;;  %v1474_v10 = vld [vmem:[#allocation7 + $0x120] sm:$0xff] }
 0x191   : > { %v1243_v53 = vadd.f32 %v1227_v30, %v1174_v27  ;;  %v1334_v56 = vmul.f32 %v6261_v22, %v1472_v63  ;;  %v1599_v59 = vmul.f32 %v6303_v41, %v1578_v24  ;;  %v1494_v51 = vmul.f32 %v6266_v23, %v1472_v63 }
 0x192   : > { %v6558_v54 = vadd.f32 %v1598_v58, %v1561_v32  ;;  %v1387_v61 = vmul.f32 %v6286_v33, %v1526_v35  ;;  %v1509_v45 = vadd.f32 %v1493_v26, %v1454_v44  ;;  %v1402_v0 = vadd.f32 %v1386_v12, %v1349_v40  ;;  %v1581_v40 = vld [vmem:[#allocation7 + $0x122] sm:$0xff] }
 0x193   : > { %v1296_v4 = vadd.f32 %v1280_v39, %v1243_v53  ;;  %v1175_v6 = vmul.f32 %v6228_v55, %v1472_v63  ;;  %v1547_v7 = vmul.f32 %v6291_v34, %v1526_v35  ;;  %v1228_v62 = vmul.f32 %v6233_v57, %v1526_v35 }
 0x194   : > { %5109 = vmatprep.mubr.msk.f32.mxu1 %vm1123_vm6, %v6558_v54  ;;  %5157 = vmatprep.mubr.msk.f32.mxu0 %vm1123_vm6, %v6558_v54  ;;  %v1281_v52 = vmul.f32 %v6244_v5, %v1579_v48  ;;  %v1562_v8 = vadd.f32 %v1546_v36, %v1509_v45  ;;  %v1455_v9 = vadd.f32 %v1439_v37, %v1402_v0  ;;  %v1528_v36 = vld [vmem:[#allocation7 + $0x121] sm:$0xff] }
 0x195   : > { %v1350_v46 = vadd.f32 %v1334_v56, %v1296_v4  ;;  %v1440_v11 = vmul.f32 %v6332_v1, %v1579_v48  ;;  %v1600_v58 = vmul.f32 %v6303_v41, %v1579_v48  ;;  %v1495_v16 = vmul.f32 %v6266_v23, %v1473_v60 }
 0x196   : > { %v1244_v17 = vadd.f32 %v1228_v62, %v1175_v6  ;;  %v1335_v18 = vmul.f32 %v6261_v22, %v1473_v60  ;;  %v6575_v21 = vadd.f32 %v1599_v59, %v1562_v8  ;;  %v1510_v24 = vadd.f32 %v1494_v51, %v1455_v9  ;;  %v1475_v51 = vld [vmem:[#allocation7 + $0x130] sm:$0xff] }
 0x197   : > { %v1403_v50 = vadd.f32 %v1387_v61, %v1350_v46  ;;  %v1388_v25 = vmul.f32 %v6286_v33, %v1527_v14  ;;  %v1176_v12 = vmul.f32 %v6228_v55, %v1473_v60  ;;  %v1229_v27 = vmul.f32 %v6233_v57, %v1527_v14  ;;  %v1529_v60 = vld [vmem:[#allocation7 + $0x131] sm:$0xff] }
 0x198   : > { %v1297_v26 = vadd.f32 %v1281_v52, %v1244_v17  ;;  %v1282_v42 = vmul.f32 %v6244_v5, %v1580_v2  ;;  %5110 = vmatmul.mubr.msk.f32.gmra.mrb[10].mxu1 %vm1123_vm6, %v6575_v21  ;;  %v1563_v28 = vadd.f32 %v1547_v7, %v1510_v24  ;;  %v1548_v32 = vmul.f32 %v6291_v34, %v1527_v14  ;;  %v1582_v52 = vld [vmem:[#allocation7 + $0x132] sm:$0xff] }
 0x199   : > { %v1456_v30 = vadd.f32 %v1440_v11, %v1403_v50  ;;  %5158 = vmatmul.mubr.msk.f32.gmra.mrb[26].mxu0 %vm1123_vm6, %v6575_v21  ;;  %v1441_v63 = vmul.f32 %v6332_v1, %v1580_v2  ;;  %v1245_v39 = vadd.f32 %v1229_v27, %v1176_v12  ;;  %v1336_v55 = vmul.f32 %v6261_v22, %v1474_v10 }
 0x19a   : > { %v1351_v37 = vadd.f32 %v1335_v18, %v1297_v26  ;;  %v1616_v57 = vadd.f32 %v1600_v58, %v1563_v28  ;;  %v1601_v5 = vmul.f32 %v6303_v41, %v1580_v2  ;;  %v1496_v48 = vmul.f32 %v6266_v23, %v1474_v10  ;;  %v1871_v18 = vld [vmem:[#allocation3] sm:$0xff] }
 0x19b   : > { %v1511_v44 = vadd.f32 %v1495_v16, %v1456_v30  ;;  %v1298_v53 = vadd.f32 %v1282_v42, %v1245_v39  ;;  %v1389_v56 = vmul.f32 %v6286_v33, %v1528_v36  ;;  %v1549_v22 = vmul.f32 %v6291_v34, %v1528_v36 }
 0x19c   : > { %v1404_v35 = vadd.f32 %v1388_v25, %v1351_v37  ;;  %5112 = vmatprep.mubr.msk.f32.mxu1 %vm1123_vm6, %v1616_v57  ;;  %5160 = vmatprep.mubr.msk.f32.mxu0 %vm1123_vm6, %v1616_v57  ;;  %v1442_v0 = vmul.f32 %v6332_v1, %v1581_v40  ;;  %v1602_v7 = vmul.f32 %v6303_v41, %v1581_v40 }
 0x19d   : > { %v1564_v59 = vadd.f32 %v1548_v32, %v1511_v44  ;;  %v1352_v45 = vadd.f32 %v1336_v55, %v1298_v53  ;;  %v1497_v33 = vmul.f32 %v6266_v23, %v1475_v51  ;;  %v1550_v46 = vmul.f32 %v6291_v34, %v1529_v60  ;;  %v6636_v23 = vld [vmem:[%s7602_s6] ss:$0 sm:$0xff]  ;;  %v6641_v34 = vld [vmem:[%s7602_s6 + $0x1] ss:$0 sm:$0xff] }
 0x19e   : > { %v1457_v61 = vadd.f32 %v1441_v63, %v1404_v35  ;;  %v1603_v1 = vmul.f32 %v6303_v41, %v1582_v52  ;;  %v1874_v35 = vld [vmem:[#allocation3 + $0x18] sm:$0xff] }
 0x19f   : > { %v1617_v4 = vadd.f32 %v1601_v5, %v1564_v59  ;;  %v1405_v62 = vadd.f32 %v1389_v56, %v1352_v45 }
 0x1a0   : > { %v1512_v6 = vadd.f32 %v1496_v48, %v1457_v61  ;;  %v2240_v48 = vld [vmem:[#allocation4 + $0x18] sm:$0xff]  ;;  %v1873_v61 = vld [vmem:[#allocation3 + $0x10] sm:$0xff] }
 0x1a1   : > { %5113 = vmatmul.mubr.msk.f32.gmra.mrb[12].mxu1 %vm1123_vm6, %v1617_v4  ;;  %5161 = vmatmul.mubr.msk.f32.gmra.mrb[28].mxu0 %vm1123_vm6, %v1617_v4  ;;  %v1458_v9 = vadd.f32 %v1442_v0, %v1405_v62 }
 0x1a2   : > { %v1565_v8 = vadd.f32 %v1549_v22, %v1512_v6  ;;  %v2239_v22 = vld [vmem:[#allocation4 + $0x10] sm:$0xff] }
 0x1a3   : > { %v1513_v14 = vadd.f32 %v1497_v33, %v1458_v9 }
 0x1a4   : > { %v1618_v11 = vadd.f32 %v1602_v7, %v1565_v8 }
 0x1a5   : > { %v1566_v2 = vadd.f32 %v1550_v46, %v1513_v14 }
 0x1a6   : > { %5115 = vmatprep.mubr.msk.f32.mxu1 %vm1123_vm6, %v1618_v11  ;;  %5163 = vmatprep.mubr.msk.f32.mxu0 %vm1123_vm6, %v1618_v11 }
 0x1a7   : > { %v1619_v58 = vadd.f32 %v1603_v1, %v1566_v2 }
 0x1a9   : > { %5116 = vmatmul.mubr.msk.f32.gmra.mrb[14].mxu1 %vm1123_vm6, %v1619_v58  ;;  %5164 = vmatmul.mubr.msk.f32.gmra.mrb[30].mxu0 %vm1123_vm6, %v1619_v58 }
 0x1aa   : > { %5190 = vmatprep.mubr.msk.f32.mxu1 %vm1123_vm6, %v6371_v15  ;;  %v6646_v15 = vld [vmem:[%s7603_s7] ss:$0 sm:$0xff] }
 0x1ad   : > { %5191 = vmatmul.mubr.msk.f32.vlgmr.msra.gmra.mrb[16].mxu1 %vm1123_vm6, %v6398_v47 }
 0x1ae   : > { %5193 = vmatprep.mubr.msk.f32.mxu1 %vm1123_vm6, %v6422_v13  ;;  %v6651_v13 = vld [vmem:[%s7603_s7 + $0x1] ss:$0 sm:$0xff] }
 0x1b1   : > { %5194 = vmatmul.mubr.msk.f32.gmra.mrb[18].mxu1 %vm1123_vm6, %v6445_v49 }
 0x1b2   : > { %5196 = vmatprep.mubr.msk.f32.mxu1 %vm1123_vm6, %v6471_v29 }
 0x1b5   : > { %5197 = vmatmul.mubr.msk.f32.gmra.mrb[20].mxu1 %vm1123_vm6, %v6485_v3 }
 0x1b6   : > { %5199 = vmatprep.mubr.msk.f32.mxu1 %vm1123_vm6, %v6499_v19 }
 0x1b9   : > { %5200 = vmatmul.mubr.msk.f32.gmra.mrb[22].mxu1 %vm1123_vm6, %v6517_v38  ;;  %v2238_v38 = vld [vmem:[#allocation4 + $0x8] sm:$0xff] }
 0x1ba   : > { %5202 = vmatprep.mubr.msk.f32.mxu1 %vm1123_vm6, %v6512_v31  ;;  %v1872_v31 = vld [vmem:[#allocation3 + $0x8] sm:$0xff] }
 0x1bd   : > { %5203 = vmatmul.mubr.msk.f32.gmra.mrb[24].mxu1 %vm1123_vm6, %v6543_v20 }
 0x1be   : > { %5205 = vmatprep.mubr.msk.f32.mxu1 %vm1123_vm6, %v6558_v54 }
 0x1c1   : > { %5206 = vmatmul.mubr.msk.f32.gmra.mrb[26].mxu1 %vm1123_vm6, %v6575_v21  ;;  %v2237_v21 = vld [vmem:[#allocation4] sm:$0xff] }
 0x1c2   : > { %5208 = vmatprep.mubr.msk.f32.mxu1 %vm1123_vm6, %v1616_v57 }
 0x1c5   : > { %5209 = vmatmul.mubr.msk.f32.gmra.mrb[28].mxu1 %vm1123_vm6, %v1617_v4 }
 0x1c6   : > { %5211 = vmatprep.mubr.msk.f32.mxu1 %vm1123_vm6, %v1618_v11 }
 0x1c9   : > { %5212 = vmatmul.mubr.msk.f32.gmra.mrb[30].mxu1 %vm1123_vm6, %v1619_v58 }
 0x23e   : > { %v5096_v41 = vpop.f32.mrb[0].mxu1  ;;  %v5144_v47 = vpop.f32.mrb[16].mxu0 }
 0x23f   : > { %v1833_v49 = vmul.f32 %v5096_v41, %v6636_v23  ;;  %v2198_v29 = vmul.f32 %v5144_v47, %v6641_v34  ;;  %v1746_v3 = vpop.f32.mrb[1].mxu1  ;;  %v2110_v19 = vpop.f32.mrb[17].mxu0 }
 0x240   : > { %v1832_v20 = vmul.f32 %v6636_v23, %v1746_v3  ;;  %v2197_v54 = vmul.f32 %v6641_v34, %v2110_v19 }
 0x241   : > { %v1856_v16 = vadd.f32 %v6646_v15, %v1833_v49  ;;  %v2222_v17 = vadd.f32 %v6651_v13, %v2198_v29 }
 0x242   : > { %v1855_v24 = vadd.f32 %v6646_v15, %v1832_v20  ;;  %v2221_v50 = vadd.f32 %v6651_v13, %v2197_v54 }
 0x243   : > { %v1888_v25 = vsub.f32 %v1856_v16, %v1872_v31  ;;  %v2254_v10 = vsub.f32 %v2222_v17, %v2238_v38 }
 0x244   : > { %v1887_v26 = vsub.f32 %v1855_v24, %v1871_v18  ;;  %v2253_v12 = vsub.f32 %v2221_v50, %v2237_v21 }
 0x245   : > { %v1904_v27 = vmul.f32 0.5, %v1888_v25  ;;  %v2270_v42 = vmul.f32 0.5, %v2254_v10  ;;  %v1876_v25 = vld [vmem:[#allocation3 + $0x28] sm:$0xff] }
 0x246   : > { %v1903_v28 = vmul.f32 0.5, %v1887_v26  ;;  %v2269_v30 = vmul.f32 0.5, %v2253_v12  ;;  %v2242_v10 = vld [vmem:[#allocation4 + $0x28] sm:$0xff] }
 0x247   : > { %v1920_v32 = vadd.f32 %v1904_v27, %v1872_v31  ;;  %v2286_v36 = vadd.f32 %v2270_v42, %v2238_v38 }
 0x248   : > { %v5099_v37 = vpop.f32.mrb[2].mxu1  ;;  %v5147_v63 = vpop.f32.mrb[18].mxu0  ;;  %v2285_v39 = vadd.f32 %v2269_v30, %v2237_v21  ;;  %v1919_v55 = vadd.f32 %v1903_v28, %v1871_v18 }
 0x249   : > { %vm1936_vm7 = vcmp.ge.f32.partialorder %v1920_v32, 1.0  ;;  %v1835_v57 = vmul.f32 %v5099_v37, %v6636_v23  ;;  %v2200_v44 = vmul.f32 %v5147_v63, %v6641_v34  ;;  %v1756_v5 = vpop.f32.mrb[3].mxu1  ;;  %v2120_v40 = vpop.f32.mrb[19].mxu0  ;;  %vm2302_vm8 = vcmp.ge.f32.partialorder %v2286_v36, 1.0 }
 0x24a   : > { %v1834_v53 = vmul.f32 %v6636_v23, %v1756_v5  ;;  %v2199_v56 = vmul.f32 %v6641_v34, %v2120_v40  ;;  %vm2301_vm9 = vcmp.ge.f32.partialorder %v2285_v39, 1.0  ;;  %vm1935_vm10 = vcmp.ge.f32.partialorder %v1919_v55, 1.0 }
 0x24b   : > { %v1858_v59 = vadd.f32 %v6646_v15, %v1835_v57  ;;  %v2224_v51 = vadd.f32 %v6651_v13, %v2200_v44  ;;  %v4668_v45 = vsel %vm2301_vm9, 1.0, %v5619_v43  ;;  %v4620_v0 = vsel %vm1935_vm10, 1.0, %v5619_v43 }
 0x24c   : > { %v1857_v4 = vadd.f32 %v6646_v15, %v1834_v53  ;;  %v2223_v60 = vadd.f32 %v6651_v13, %v2199_v56  ;;  %2763 = vxpose.xlu0.b32.start [1/8] (short) (narrow) %v4668_v45, 32  ;;  %v2349_v6 = vsub.f32 1.0, %v4668_v45  ;;  %v1983_v7 = vsub.f32 1.0, %v4620_v0  ;;  %5266 = vmatprep.mubr.msk.f32.mxu1 %vm862_vm4, %v4620_v0 }
 0x24d   : > { %v1890_v62 = vsub.f32 %v1858_v59, %v1874_v35  ;;  %v2256_v33 = vsub.f32 %v2224_v51, %v2240_v48  ;;  %v4669_v52 = vsel %vm2302_vm8, 1.0, %v5619_v43  ;;  %v6676_v8 = vsel %vm1936_vm7, 1.0, %v5619_v43 }
 0x24e   : > { %v1889_v9 = vsub.f32 %v1857_v4, %v1873_v61  ;;  %v2255_v46 = vsub.f32 %v2223_v60, %v2239_v22  ;;  %v2365_v11 = vmul.f32 %v2349_v6, %v2285_v39  ;;  %v1999_v14 = vmul.f32 %v1983_v7, %v1919_v55 }
 0x24f   : > { %v1906_v1 = vmul.f32 0.5, %v1890_v62  ;;  %v2272_v2 = vmul.f32 0.5, %v2256_v33  ;;  %v2350_v58 = vsub.f32 1.0, %v4669_v52  ;;  %v1984_v41 = vsub.f32 1.0, %v6676_v8 }
 0x250   : > { %v1905_v47 = vmul.f32 0.5, %v1889_v9  ;;  %v2271_v49 = vmul.f32 0.5, %v2255_v46  ;;  %2381 = vst.msk [vmem:[#allocation4] sm:$0xff] %vm862_vm4, %v2365_v11  ;;  %2015 = vst.msk [vmem:[#allocation3] sm:$0xff] %vm862_vm4, %v1999_v14  ;;  %2764 = vxpose.xlu0.b32.cont [2/8] (short) (narrow) %v4669_v52, 32  ;;  %v6708_v46 = vld [vmem:[#allocation3 + $0x38] sm:$0xff] }
 0x251   : > { %v2366_v29 = vmul.f32 %v2350_v58, %v2286_v36  ;;  %v2288_v3 = vadd.f32 %v2272_v2, %v2240_v48  ;;  %v2000_v19 = vmul.f32 %v1984_v41, %v1920_v32  ;;  %v1922_v16 = vadd.f32 %v1906_v1, %v1874_v35  ;;  %v1875_v32 = vld [vmem:[#allocation3 + $0x20] sm:$0xff]  ;;  %v2244_v11 = vld [vmem:[#allocation4 + $0x38] sm:$0xff] }
 0x252   : > { %v2287_v31 = vadd.f32 %v2271_v49, %v2239_v22  ;;  %v1921_v38 = vadd.f32 %v1905_v47, %v1873_v61  ;;  %v2241_v36 = vld [vmem:[#allocation4 + $0x20] sm:$0xff]  ;;  %v6714_v49 = vld [vmem:[#allocation3 + $0x30] sm:$0xff] }
 0x253   : > { %v5102_v20 = vpop.f32.mrb[4].mxu1  ;;  %v5150_v54 = vpop.f32.mrb[20].mxu0  ;;  %2382 = vst.msk [vmem:[#allocation4 + $0x8] sm:$0xff] %vm862_vm4, %v2366_v29  ;;  %vm2304_vm11 = vcmp.ge.f32.partialorder %v2288_v3, 1.0  ;;  %2016 = vst.msk [vmem:[#allocation3 + $0x8] sm:$0xff] %vm862_vm4, %v2000_v19  ;;  %vm1938_vm14 = vcmp.ge.f32.partialorder %v1922_v16, 1.0 }
 0x254   : > { %v1837_v17 = vmul.f32 %v5102_v20, %v6636_v23  ;;  %v2202_v18 = vmul.f32 %v5150_v54, %v6641_v34  ;;  %v1766_v21 = vpop.f32.mrb[5].mxu1  ;;  %v2130_v24 = vpop.f32.mrb[21].mxu0  ;;  %vm2303_vm12 = vcmp.ge.f32.partialorder %v2287_v31, 1.0  ;;  %v4671_v50 = vsel %vm2304_vm11, 1.0, %v5619_v43  ;;  %v2243_v29 = vld [vmem:[#allocation4 + $0x30] sm:$0xff] }
 0x255   : > { %v1836_v26 = vmul.f32 %v6636_v23, %v1766_v21  ;;  %v2201_v12 = vmul.f32 %v6641_v34, %v2130_v24  ;;  %v4670_v27 = vsel %vm2303_vm12, 1.0, %v5619_v43  ;;  %v2352_v42 = vsub.f32 1.0, %v4671_v50 }
 0x256   : > { %v1860_v28 = vadd.f32 %v6646_v15, %v1837_v17  ;;  %v2226_v30 = vadd.f32 %v6651_v13, %v2202_v18  ;;  %2765 = vxpose.xlu0.b32.cont [3/8] (short) (narrow) %v4670_v27, 32  ;;  %v2351_v37 = vsub.f32 1.0, %v4670_v27  ;;  %vm1937_vm13 = vcmp.ge.f32.partialorder %v1921_v38, 1.0 }
 0x257   : > { %v1859_v63 = vadd.f32 %v6646_v15, %v1836_v26  ;;  %v2225_v39 = vadd.f32 %v6651_v13, %v2201_v12  ;;  %v2368_v55 = vmul.f32 %v2352_v42, %v2288_v3  ;;  %v6694_v57 = vsel %vm1937_vm13, 1.0, %v5619_v43 }
 0x258   : > { %v1892_v44 = vsub.f32 %v1860_v28, %v1876_v25  ;;  %v2258_v5 = vsub.f32 %v2226_v30, %v2242_v10  ;;  %v2367_v40 = vmul.f32 %v2351_v37, %v2287_v31  ;;  %v1985_v35 = vsub.f32 1.0, %v6694_v57 }
 0x259   : > { %v1891_v48 = vsub.f32 %v1859_v63, %v1875_v32  ;;  %v2257_v53 = vsub.f32 %v2225_v39, %v2241_v36  ;;  %2384 = vst.msk [vmem:[#allocation4 + $0x18] sm:$0xff] %vm862_vm4, %v2368_v55  ;;  %v6700_v61 = vsel %vm1938_vm14, 1.0, %v5619_v43  ;;  %v2246_v63 = vld [vmem:[#allocation4 + $0x48] sm:$0xff] }
 0x25a   : > { %v1908_v56 = vmul.f32 0.5, %v1892_v44  ;;  %v2274_v59 = vmul.f32 0.5, %v2258_v5  ;;  %2383 = vst.msk [vmem:[#allocation4 + $0x10] sm:$0xff] %vm862_vm4, %v2367_v40  ;;  %2766 = vxpose.xlu0.b32.cont [4/8] (short) (narrow) %v4671_v50, 32  ;;  %v2001_v51 = vmul.f32 %v1985_v35, %v1921_v38  ;;  %v5105_v0 = vpop.f32.mrb[6].mxu1  ;;  %v5153_v4 = vpop.f32.mrb[22].mxu0 }
 0x25b   : > { %v1907_v22 = vmul.f32 0.5, %v1891_v48  ;;  %v2273_v45 = vmul.f32 0.5, %v2257_v53  ;;  %v1986_v60 = vsub.f32 1.0, %v6700_v61  ;;  %v1839_v6 = vmul.f32 %v5105_v0, %v6636_v23  ;;  %v1776_v62 = vpop.f32.mrb[7].mxu1  ;;  %v2140_v33 = vpop.f32.mrb[23].mxu0  ;;  %v1880_v55 = vld [vmem:[#allocation3 + $0x48] sm:$0xff] }
 0x25c   : > { %v2204_v7 = vmul.f32 %v5153_v4, %v6641_v34  ;;  %v2290_v52 = vadd.f32 %v2274_v59, %v2242_v10  ;;  %2017 = vst.msk [vmem:[#allocation3 + $0x10] sm:$0xff] %vm862_vm4, %v2001_v51  ;;  %v6706_v9 = vadd.f32 %v1908_v56, %v1876_v25  ;;  %v1838_v14 = vmul.f32 %v6636_v23, %v1776_v62  ;;  %v2245_v48 = vld [vmem:[#allocation4 + $0x40] sm:$0xff] }
 0x25d   : > { %v2203_v1 = vmul.f32 %v6641_v34, %v2140_v33  ;;  %v2289_v2 = vadd.f32 %v2273_v45, %v2241_v36  ;;  %v2002_v58 = vmul.f32 %v1986_v60, %v1922_v16  ;;  %v1862_v41 = vadd.f32 %v6646_v15, %v1839_v6  ;;  %v1879_v56 = vld [vmem:[#allocation3 + $0x40] sm:$0xff] }
 0x25e   : > { %v2228_v47 = vadd.f32 %v6651_v13, %v2204_v7  ;;  %vm2306_vm15 = vcmp.ge.f32.partialorder %v2290_v52, 1.0  ;;  %v1923_v3 = vadd.f32 %v1907_v22, %v1875_v32  ;;  %v1861_v19 = vadd.f32 %v6646_v15, %v1838_v14 }
 0x25f   : > { %v2227_v31 = vadd.f32 %v6651_v13, %v2203_v1  ;;  %vm2305_vm0 = vcmp.ge.f32.partialorder %v2289_v2, 1.0  ;;  %v4673_v38 = vsel %vm2306_vm15, 1.0, %v5619_v43  ;;  %2018 = vst.msk [vmem:[#allocation3 + $0x18] sm:$0xff] %vm862_vm4, %v2002_v58  ;;  %v1894_v20 = vsub.f32 %v1862_v41, %v6708_v46 }
 0x260   : > { %v2260_v54 = vsub.f32 %v2228_v47, %v2244_v11  ;;  %v4672_v16 = vsel %vm2305_vm0, 1.0, %v5619_v43  ;;  %v2354_v17 = vsub.f32 1.0, %v4673_v38  ;;  %v1893_v18 = vsub.f32 %v1861_v19, %v6714_v49 }
 0x261   : > { %v2259_v21 = vsub.f32 %v2227_v31, %v2243_v29  ;;  %2767 = vxpose.xlu0.b32.cont [5/8] (short) (narrow) %v4672_v16, 32  ;;  %v2353_v24 = vsub.f32 1.0, %v4672_v16  ;;  %vm1939_vm1 = vcmp.ge.f32.partialorder %v1923_v3, 1.0  ;;  %v6723_v50 = vmul.f32 0.5, %v1894_v20 }
 0x262   : > { %v2276_v25 = vmul.f32 0.5, %v2260_v54  ;;  %v5156_v10 = vpop.f32.mrb[24].mxu0  ;;  %v5108_v26 = vpop.f32.mrb[8].mxu1  ;;  %v2370_v12 = vmul.f32 %v2354_v17, %v2290_v52  ;;  %v6726_v27 = vsel %vm1939_vm1, 1.0, %v5619_v43  ;;  %v1909_v42 = vmul.f32 0.5, %v1893_v18 }
 0x263   : > { %v2275_v28 = vmul.f32 0.5, %v2259_v21  ;;  %v2206_v30 = vmul.f32 %v5156_v10, %v6641_v34  ;;  %v2150_v32 = vpop.f32.mrb[25].mxu0  ;;  %v1841_v36 = vmul.f32 %v5108_v26, %v6636_v23  ;;  %v1786_v37 = vpop.f32.mrb[9].mxu1  ;;  %v2369_v5 = vmul.f32 %v2353_v24, %v2289_v2  ;;  %v2248_v26 = vld [vmem:[#allocation4 + $0x58] sm:$0xff] }
 0x264   : > { %v2205_v39 = vmul.f32 %v6641_v34, %v2150_v32  ;;  %v1840_v44 = vmul.f32 %v6636_v23, %v1786_v37  ;;  %2386 = vst.msk [vmem:[#allocation4 + $0x28] sm:$0xff] %vm862_vm4, %v2370_v12  ;;  %v2292_v40 = vadd.f32 %v2276_v25, %v2244_v11  ;;  %v1987_v51 = vsub.f32 1.0, %v6726_v27 }
 0x265   : > { %v2230_v35 = vadd.f32 %v6651_v13, %v2206_v30  ;;  %v1864_v53 = vadd.f32 %v6646_v15, %v1841_v36  ;;  %2768 = vxpose.xlu0.b32.cont [6/8] (short) (narrow) %v4673_v38, 32  ;;  %v2291_v59 = vadd.f32 %v2275_v28, %v2243_v29  ;;  %2385 = vst.msk [vmem:[#allocation4 + $0x20] sm:$0xff] %vm862_vm4, %v2369_v5  ;;  %vm1940_vm3 = vcmp.ge.f32.partialorder %v6706_v9, 1.0  ;;  %v2247_v30 = vld [vmem:[#allocation4 + $0x50] sm:$0xff] }
 0x266   : > { %v2229_v22 = vadd.f32 %v6651_v13, %v2205_v39  ;;  %v1863_v45 = vadd.f32 %v6646_v15, %v1840_v44  ;;  %vm2308_vm2 = vcmp.ge.f32.partialorder %v2292_v40, 1.0  ;;  %v2003_v1 = vmul.f32 %v1987_v51, %v1923_v3  ;;  %v6769_v36 = vld [vmem:[#allocation3 + $0x50] sm:$0xff] }
 0x267   : > { %v2262_v0 = vsub.f32 %v2230_v35, %v2246_v63  ;;  %v1896_v4 = vsub.f32 %v1864_v53, %v1880_v55  ;;  %vm2307_vm5 = vcmp.ge.f32.partialorder %v2291_v59, 1.0  ;;  %v4675_v60 = vsel %vm2308_vm2, 1.0, %v5619_v43 }
 0x268   : > { %v2261_v6 = vsub.f32 %v2229_v22, %v2245_v48  ;;  %v1895_v7 = vsub.f32 %v1863_v45, %v1879_v56  ;;  %v4674_v62 = vsel %vm2307_vm5, 1.0, %v5619_v43  ;;  %v2356_v33 = vsub.f32 1.0, %v4675_v60  ;;  %2019 = vst.msk [vmem:[#allocation3 + $0x20] sm:$0xff] %vm862_vm4, %v2003_v1  ;;  %v6797_v1 = vld [vmem:[#allocation3 + $0x68] sm:$0xff] }
 0x269   : > { %v2278_v52 = vmul.f32 0.5, %v2262_v0  ;;  %v1912_v11 = vmul.f32 0.5, %v1896_v4  ;;  %2769 = vxpose.xlu0.b32.cont [7/8] (short) (narrow) %v4674_v62, 32  ;;  %v2355_v14 = vsub.f32 1.0, %v4674_v62  ;;  %v6745_v47 = vsel %vm1940_vm3, 1.0, %v5619_v43 }
 0x26a   : > { %v2277_v2 = vmul.f32 0.5, %v2261_v6  ;;  %v1911_v58 = vmul.f32 0.5, %v1895_v7  ;;  %v2372_v41 = vmul.f32 %v2356_v33, %v2292_v40  ;;  %v1988_v16 = vsub.f32 1.0, %v6745_v47 }
 0x26b   : > { %v6747_v29 = vadd.f32 %v1912_v11, %v1880_v55  ;;  %v2294_v19 = vadd.f32 %v2278_v52, %v2246_v63  ;;  %v2371_v31 = vmul.f32 %v2355_v14, %v2291_v59  ;;  %v5111_v20 = vpop.f32.mrb[10].mxu1  ;;  %v6753_v17 = vadd.f32 %v1909_v42, %v6714_v49  ;;  %v6773_v63 = vld [vmem:[#allocation3 + $0x58] sm:$0xff] }
 0x26c   : > { %v5159_v38 = vpop.f32.mrb[26].mxu0  ;;  %v2293_v54 = vadd.f32 %v2277_v2, %v2245_v48  ;;  %2388 = vst.msk [vmem:[#allocation4 + $0x38] sm:$0xff] %vm862_vm4, %v2372_v41  ;;  %v1927_v3 = vadd.f32 %v1911_v58, %v1879_v56  ;;  %v1843_v24 = vmul.f32 %v5111_v20, %v6636_v23  ;;  %v1796_v25 = vpop.f32.mrb[11].mxu1  ;;  %v6760_v10 = vadd.f32 %v6723_v50, %v6708_v46  ;;  %v2250_v58 = vld [vmem:[#allocation4 + $0x68] sm:$0xff] }
 0x26d   : > { %v2208_v18 = vmul.f32 %v5159_v38, %v6641_v34  ;;  %v2160_v21 = vpop.f32.mrb[27].mxu0  ;;  %vm2310_vm6 = vcmp.ge.f32.partialorder %v2294_v19, 1.0  ;;  %2387 = vst.msk [vmem:[#allocation4 + $0x30] sm:$0xff] %vm862_vm4, %v2371_v31  ;;  %2770 = vxpose.xlu0.b32.end [8/8] (short) (narrow) %v4675_v60, 32  ;;  %v1842_v49 = vmul.f32 %v6636_v23, %v1796_v25  ;;  %vm1944_vm9 = vcmp.ge.f32.partialorder %v6747_v29, 1.0  ;;  %v6804_v38 = vld [vmem:[#allocation3 + $0x60] sm:$0xff] }
 0x26e   : > { %v2207_v12 = vmul.f32 %v6641_v34, %v2160_v21  ;;  %vm2309_vm7 = vcmp.ge.f32.partialorder %v2293_v54, 1.0  ;;  %v4677_v42 = vsel %vm2310_vm6, 1.0, %v5619_v43  ;;  %v6767_v32 = vadd.f32 %v6646_v15, %v1843_v24 }
 0x26f   : > { %v2232_v28 = vadd.f32 %v6651_v13, %v2208_v18  ;;  %v4676_v37 = vsel %vm2309_vm7, 1.0, %v5619_v43  ;;  %v2358_v46 = vsub.f32 1.0, %v4677_v42  ;;  %v1865_v39 = vadd.f32 %v6646_v15, %v1842_v49 }
 0x270   : > { %v2231_v50 = vadd.f32 %v6651_v13, %v2207_v12  ;;  %2893 = vxpose.xlu1.b32.start [1/8] (short) (narrow) %v4676_v37, 32  ;;  %v2357_v55 = vsub.f32 1.0, %v4676_v37  ;;  %vm1943_vm8 = vcmp.ge.f32.partialorder %v1927_v3, 1.0  ;;  %v1898_v51 = vsub.f32 %v6767_v32, %v6773_v63 }
 0x271   : > { %v2264_v44 = vsub.f32 %v2232_v28, %v2248_v26  ;;  %v2374_v5 = vmul.f32 %v2358_v46, %v2294_v19  ;;  %v6778_v40 = vsel %vm1943_vm8, 1.0, %v5619_v43  ;;  %v1897_v48 = vsub.f32 %v1865_v39, %v6769_v36 }
 0x272   : > { %v2263_v35 = vsub.f32 %v2231_v50, %v2247_v30  ;;  %v2373_v53 = vmul.f32 %v2357_v55, %v2293_v54  ;;  %v1991_v56 = vsub.f32 1.0, %v6778_v40  ;;  %v2004_v22 = vmul.f32 %v1988_v16, %v6706_v9  ;;  %v2249_v54 = vld [vmem:[#allocation4 + $0x60] sm:$0xff] }
 0x273   : > { %v2280_v59 = vmul.f32 0.5, %v2264_v44  ;;  %2390 = vst.msk [vmem:[#allocation4 + $0x48] sm:$0xff] %vm862_vm4, %v2374_v5  ;;  %vm1941_vm10 = vcmp.ge.f32.partialorder %v6753_v17, 1.0  ;;  %v6787_v0 = vmul.f32 0.5, %v1897_v48  ;;  %vm1942_vm11 = vcmp.ge.f32.partialorder %v6760_v10, 1.0 }
 0x274   : > { %v2279_v45 = vmul.f32 0.5, %v2263_v35  ;;  %v5114_v4 = vpop.f32.mrb[12].mxu1  ;;  %2389 = vst.msk [vmem:[#allocation4 + $0x40] sm:$0xff] %vm862_vm4, %v2373_v53  ;;  %v5162_v60 = vpop.f32.mrb[28].mxu0  ;;  %2894 = vxpose.xlu1.b32.cont [2/8] (short) (narrow) %v4677_v42, 32  ;;  %v2007_v6 = vmul.f32 %v1991_v56, %v1927_v3  ;;  %v6791_v7 = vsel %vm1941_vm10, 1.0, %v5619_v43 }
 0x275   : > { %v1845_v62 = vmul.f32 %v5114_v4, %v6636_v23  ;;  %v1806_v33 = vpop.f32.mrb[13].mxu1  ;;  %v2210_v52 = vmul.f32 %v5162_v60, %v6641_v34  ;;  %v2170_v9 = vpop.f32.mrb[29].mxu0  ;;  %v2296_v11 = vadd.f32 %v2280_v59, %v2248_v26  ;;  %2020 = vst.msk [vmem:[#allocation3 + $0x28] sm:$0xff] %vm862_vm4, %v2004_v22  ;;  %v1989_v14 = vsub.f32 1.0, %v6791_v7 }
 0x276   : > { %v1844_v2 = vmul.f32 %v6636_v23, %v1806_v33  ;;  %v2209_v41 = vmul.f32 %v6641_v34, %v2170_v9  ;;  %v2295_v19 = vadd.f32 %v2279_v45, %v2247_v30  ;;  %2023 = vst.msk [vmem:[#allocation3 + $0x40] sm:$0xff] %vm862_vm4, %v2007_v6  ;;  %v6818_v28 = vsel %vm1942_vm11, 1.0, %v5619_v43  ;;  %v6846_v33 = vld [vmem:[%s7602_s6 + $0x2] ss:$0 sm:$0xff] }
 0x277   : > { %v1868_v31 = vadd.f32 %v6646_v15, %v1845_v62  ;;  %v2234_v20 = vadd.f32 %v6651_v13, %v2210_v52  ;;  %vm2312_vm12 = vcmp.ge.f32.partialorder %v2296_v11, 1.0  ;;  %v2005_v3 = vmul.f32 %v1989_v14, %v6753_v17  ;;  %v6840_v62 = vld [vmem:[#allocation3 + $0x78] sm:$0xff] }
 0x278   : > { %v1867_v16 = vadd.f32 %v6646_v15, %v1844_v2  ;;  %v2233_v18 = vadd.f32 %v6651_v13, %v2209_v41  ;;  %vm2311_vm13 = vcmp.ge.f32.partialorder %v2295_v19, 1.0  ;;  %v4679_v21 = vsel %vm2312_vm12, 1.0, %v5619_v43  ;;  %v2252_v52 = vld [vmem:[#allocation4 + $0x78] sm:$0xff] }
 0x279   : > { %v1900_v24 = vsub.f32 %v1868_v31, %v6797_v1  ;;  %v2266_v25 = vsub.f32 %v2234_v20, %v2250_v58  ;;  %v4678_v26 = vsel %vm2311_vm13, 1.0, %v5619_v43  ;;  %v2360_v12 = vsub.f32 1.0, %v4679_v21  ;;  %2021 = vst.msk [vmem:[#allocation3 + $0x30] sm:$0xff] %vm862_vm4, %v2005_v3 }
 0x27a   : > { %v1899_v49 = vsub.f32 %v1867_v16, %v6804_v38  ;;  %v2265_v42 = vsub.f32 %v2233_v18, %v2249_v54  ;;  %2895 = vxpose.xlu1.b32.cont [3/8] (short) (narrow) %v4678_v26, 32  ;;  %v2359_v17 = vsub.f32 1.0, %v4678_v26  ;;  %v1914_v30 = vmul.f32 0.5, %v1898_v51 }
 0x27b   : > { %v2282_v32 = vmul.f32 0.5, %v2266_v25  ;;  %v2376_v37 = vmul.f32 %v2360_v12, %v2296_v11  ;;  %v1990_v46 = vsub.f32 1.0, %v6818_v28  ;;  %v6821_v50 = vmul.f32 0.5, %v1900_v24  ;;  %v2603_v12 = vld [vmem:[#allocation5] sm:$0xff] }
 0x27c   : > { %v2281_v39 = vmul.f32 0.5, %v2265_v42  ;;  %v2375_v55 = vmul.f32 %v2359_v17, %v2295_v19  ;;  %v6826_v44 = vsel %vm1944_vm9, 1.0, %v5619_v43  ;;  %v6828_v5 = vmul.f32 0.5, %v1899_v49  ;;  %v5117_v35 = vpop.f32.mrb[14].mxu1  ;;  %v5165_v48 = vpop.f32.mrb[30].mxu0 }
 0x27d   : > { %2392 = vst.msk [vmem:[#allocation4 + $0x58] sm:$0xff] %vm862_vm4, %v2376_v37  ;;  %v2298_v53 = vadd.f32 %v2282_v32, %v2250_v58  ;;  %v2006_v56 = vmul.f32 %v1990_v46, %v6760_v10  ;;  %v1992_v59 = vsub.f32 1.0, %v6826_v44  ;;  %v1847_v51 = vmul.f32 %v5117_v35, %v6636_v23  ;;  %v1816_v22 = vpop.f32.mrb[15].mxu1  ;;  %v2180_v4 = vpop.f32.mrb[31].mxu0 }
 0x27e   : > { %2391 = vst.msk [vmem:[#allocation4 + $0x50] sm:$0xff] %vm862_vm4, %v2375_v55  ;;  %v2212_v45 = vmul.f32 %v5165_v48, %v6641_v34  ;;  %2896 = vxpose.xlu1.b32.cont [4/8] (short) (narrow) %v4679_v21, 32  ;;  %v2297_v60 = vadd.f32 %v2281_v39, %v2249_v54  ;;  %v6838_v6 = vadd.f32 %v6787_v0, %v6769_v36  ;;  %v6852_v0 = vld [vmem:[#allocation3 + $0x70] sm:$0xff]  ;;  %v2604_v21 = vld [vmem:[#allocation5 + $0x8] sm:$0xff] }
 0x27f   : > { %v1846_v10 = vmul.f32 %v6636_v23, %v1816_v22  ;;  %v2211_v9 = vmul.f32 %v6641_v34, %v2180_v4  ;;  %vm2314_vm14 = vcmp.ge.f32.partialorder %v2298_v53, 1.0  ;;  %2022 = vst.msk [vmem:[#allocation3 + $0x38] sm:$0xff] %vm862_vm4, %v2006_v56  ;;  %v2008_v11 = vmul.f32 %v1992_v59, %v6747_v29  ;;  %v2251_v23 = vld [vmem:[#allocation4 + $0x70] sm:$0xff]  ;;  %v6860_v34 = vld [vmem:[%s7603_s7 + $0x2] ss:$0 sm:$0xff]  ;;  %v2606_v59 = vld [vmem:[#allocation5 + $0x18] sm:$0xff] }
 0x280   : > { %v1870_v36 = vadd.f32 %v6646_v15, %v1847_v51  ;;  %v2236_v14 = vadd.f32 %v6651_v13, %v2212_v45  ;;  %vm2313_vm15 = vcmp.ge.f32.partialorder %v2297_v60, 1.0  ;;  %v4681_v2 = vsel %vm2314_vm14, 1.0, %v5619_v43  ;;  %v5192_v41 = vpop.f32.mrb[16].mxu1 }
 0x281   : > { %v1869_v58 = vadd.f32 %v6646_v15, %v1846_v10  ;;  %v2235_v29 = vadd.f32 %v6651_v13, %v2211_v9  ;;  %v4680_v19 = vsel %vm2313_vm15, 1.0, %v5619_v43  ;;  %v2362_v31 = vsub.f32 1.0, %v4681_v2  ;;  %2024 = vst.msk [vmem:[#allocation3 + $0x48] sm:$0xff] %vm862_vm4, %v2008_v11  ;;  %v2476_v3 = vpop.f32.mrb[17].mxu1 }
 0x282   : > { %v1902_v20 = vsub.f32 %v1870_v36, %v6840_v62  ;;  %v2564_v54 = vmul.f32 %v5192_v41, %v6846_v33  ;;  %v2268_v16 = vsub.f32 %v2236_v14, %v2252_v52  ;;  %2897 = vxpose.xlu1.b32.cont [5/8] (short) (narrow) %v4680_v19, 32  ;;  %v2361_v15 = vsub.f32 1.0, %v4680_v19  ;;  %v6900_v19 = vld [vmem:[#allocation5 + $0x28] sm:$0xff] }
 0x283   : > { %v1901_v18 = vsub.f32 %v1869_v58, %v6852_v0  ;;  %v2563_v24 = vmul.f32 %v6846_v33, %v2476_v3  ;;  %v2267_v25 = vsub.f32 %v2235_v29, %v2251_v23  ;;  %v2378_v13 = vmul.f32 %v2362_v31, %v2298_v53 }
 0x284   : > { %v2588_v26 = vadd.f32 %v6860_v34, %v2564_v54  ;;  %v2284_v49 = vmul.f32 0.5, %v2268_v16  ;;  %v2377_v42 = vmul.f32 %v2361_v15, %v2297_v60  ;;  %v6871_v17 = vadd.f32 %v1914_v30, %v6773_v63  ;;  %v5195_v46 = vpop.f32.mrb[18].mxu1  ;;  %v2605_v60 = vld [vmem:[#allocation5 + $0x10] sm:$0xff]  ;;  %v2607_v15 = vld [vmem:[#allocation5 + $0x20] sm:$0xff] }
 0x285   : > { %v6873_v32 = vmul.f32 0.5, %v1902_v20  ;;  %v2587_v37 = vadd.f32 %v6860_v34, %v2563_v24  ;;  %v2283_v39 = vmul.f32 0.5, %v2267_v25  ;;  %2394 = vst.msk [vmem:[#allocation4 + $0x68] sm:$0xff] %vm862_vm4, %v2378_v13  ;;  %vm1945_vm0 = vcmp.ge.f32.partialorder %v6838_v6, 1.0  ;;  %v2486_v48 = vpop.f32.mrb[19].mxu1 }
 0x286   : > { %v2620_v55 = vsub.f32 %v2588_v26, %v2604_v21  ;;  %v2566_v35 = vmul.f32 %v5195_v46, %v6846_v33  ;;  %2393 = vst.msk [vmem:[#allocation4 + $0x60] sm:$0xff] %vm862_vm4, %v2377_v42  ;;  %2898 = vxpose.xlu1.b32.cont [6/8] (short) (narrow) %v4681_v2, 32  ;;  %v6880_v53 = vadd.f32 %v2284_v49, %v2252_v52  ;;  %v6883_v63 = vsel %vm1945_vm0, 1.0, %v5619_v43 }
 0x287   : > { %v6885_v30 = vmul.f32 0.5, %v1901_v18  ;;  %v2619_v56 = vsub.f32 %v2587_v37, %v2603_v12  ;;  %v2565_v51 = vmul.f32 %v6846_v33, %v2486_v48  ;;  %v6888_v22 = vadd.f32 %v2283_v39, %v2251_v23  ;;  %v6910_v39 = vld [vmem:[#allocation5 + $0x38] sm:$0xff] }
 0x288   : > { %v2636_v45 = vmul.f32 0.5, %v2620_v55  ;;  %v2590_v4 = vadd.f32 %v6860_v34, %v2566_v35  ;;  %vm2316_vm1 = vcmp.ge.f32.partialorder %v6880_v53, 1.0  ;;  %v1993_v10 = vsub.f32 1.0, %v6883_v63  ;;  %v5198_v11 = vpop.f32.mrb[20].mxu1 }
 0x289   : > { %v2635_v52 = vmul.f32 0.5, %v2619_v56  ;;  %v2589_v9 = vadd.f32 %v6860_v34, %v2565_v51  ;;  %vm2315_vm2 = vcmp.ge.f32.partialorder %v6888_v22, 1.0  ;;  %v6896_v36 = vsel %vm2316_vm1, 1.0, %v5619_v43  ;;  %v2496_v2 = vpop.f32.mrb[21].mxu1 }
 0x28a   : > { %v2622_v14 = vsub.f32 %v2590_v4, %v2606_v59  ;;  %v2568_v23 = vmul.f32 %v5198_v11, %v6846_v33  ;;  %v2652_v58 = vadd.f32 %v2636_v45, %v2604_v21  ;;  %v4682_v41 = vsel %vm2315_vm2, 1.0, %v5619_v43  ;;  %v6916_v4 = vld [vmem:[#allocation5 + $0x30] sm:$0xff] }
 0x28b   : > { %v2621_v29 = vsub.f32 %v2589_v9, %v2605_v60  ;;  %v2567_v31 = vmul.f32 %v6846_v33, %v2496_v2  ;;  %v2651_v20 = vadd.f32 %v2635_v52, %v2603_v12  ;;  %2899 = vxpose.xlu1.b32.cont [7/8] (short) (narrow) %v4682_v41, 32  ;;  %v2363_v54 = vsub.f32 1.0, %v4682_v41 }
 0x28c   : > { %v2638_v3 = vmul.f32 0.5, %v2622_v14  ;;  %v2592_v16 = vadd.f32 %v6860_v34, %v2568_v23  ;;  %vm2668_vm3 = vcmp.ge.f32.partialorder %v2652_v58, 1.0  ;;  %v2364_v18 = vsub.f32 1.0, %v6896_v36  ;;  %v5201_v25 = vpop.f32.mrb[22].mxu1 }
 0x28d   : > { %v2637_v24 = vmul.f32 0.5, %v2621_v29  ;;  %v2591_v21 = vadd.f32 %v6860_v34, %v2567_v31  ;;  %vm2667_vm5 = vcmp.ge.f32.partialorder %v2651_v20, 1.0  ;;  %v4717_v13 = vsel %vm2668_vm3, 1.0, %v5619_v43  ;;  %v2506_v49 = vpop.f32.mrb[23].mxu1 }
 0x28e   : > { %v2624_v26 = vsub.f32 %v2592_v16, %v6900_v19  ;;  %v2570_v12 = vmul.f32 %v5201_v25, %v6846_v33  ;;  %v4716_v42 = vsel %vm2667_vm5, 1.0, %v5619_v43  ;;  %v2716_v37 = vsub.f32 1.0, %v4717_v13  ;;  %vm5442_vm6 = vmpackc.low %vm2668_vm3, %vm2667_vm5  ;;  %v6931_v25 = vld [vmem:[#allocation5 + $0x40] sm:$0xff] }
 0x28f   : > { %v2623_v46 = vsub.f32 %v2591_v21, %v2607_v15  ;;  %v2569_v55 = vmul.f32 %v6846_v33, %v2506_v49  ;;  %v2715_v35 = vsub.f32 1.0, %v4716_v42  ;;  %v5620_v48 = vmov 1.0|1.0   ;;  %2900 = vxpose.xlu1.b32.end [8/8] (short) (narrow) %v6896_v36, 32 }
 0x290   : > { %5443 = vmatprep.subr.msk.bf16.mxu0 %vm5442_vm6, %v5620_v48  ;;  %v2653_v56 = vadd.f32 %v2637_v24, %v2605_v60  ;;  %v2640_v51 = vmul.f32 0.5, %v2624_v26  ;;  %v2594_v45 = vadd.f32 %v6860_v34, %v2570_v12  ;;  %v2732_v52 = vmul.f32 %v2716_v37, %v2652_v58  ;;  %v5204_v2 = vpop.f32.mrb[24].mxu1 }
 0x291   : > { %5445 = vmatpush3.bf16.msk.msra.mxu0 %vm5442_vm6, %v5620_v48  ;;  %v2654_v9 = vadd.f32 %v2638_v3, %v2606_v59  ;;  %v2639_v11 = vmul.f32 0.5, %v2623_v46  ;;  %v2593_v14 = vadd.f32 %v6860_v34, %v2569_v55  ;;  %v2731_v23 = vmul.f32 %v2715_v35, %v2651_v20  ;;  %v2516_v29 = vpop.f32.mrb[25].mxu1  ;;  %v6926_v59 = vld [vmem:[#allocation5 + $0x48] sm:$0xff] }
 0x292   : > { %vm2669_vm7 = vcmp.ge.f32.partialorder %v2653_v56, 1.0  ;;  %v2626_v41 = vsub.f32 %v2594_v45, %v6910_v39  ;;  %2748 = vst.msk [vmem:[#allocation5 + $0x8] sm:$0xff] %vm862_vm4, %v2732_v52  ;;  %v2572_v60 = vmul.f32 %v5204_v2, %v6846_v33  ;;  %v2571_v20 = vmul.f32 %v6846_v33, %v2516_v29 }
 0x293   : > { %vm2670_vm8 = vcmp.ge.f32.partialorder %v2654_v9, 1.0  ;;  %v4718_v31 = vsel %vm2669_vm7, 1.0, %v5619_v43  ;;  %v2625_v58 = vsub.f32 %v2593_v14, %v6916_v4  ;;  %2747 = vst.msk [vmem:[#allocation5] sm:$0xff] %vm862_vm4, %v2731_v23  ;;  %v2379_v26 = vmul.f32 %v2363_v54, %v6888_v22  ;;  %v6943_v54 = vld [vmem:[#allocation5 + $0x58] sm:$0xff]  ;;  %v2613_v23 = vld [vmem:[#allocation5 + $0x50] sm:$0xff] }
 0x294   : > { %v4719_v3 = vsel %vm2670_vm8, 1.0, %v5619_v43  ;;  %v2717_v16 = vsub.f32 1.0, %v4718_v31  ;;  %vm5446_vm9 = vmpackc.low %vm2670_vm8, %vm2669_vm7  ;;  %v2642_v24 = vmul.f32 0.5, %v2626_v41  ;;  %v2596_v21 = vadd.f32 %v6860_v34, %v2572_v60  ;;  %v5207_v37 = vpop.f32.mrb[26].mxu1 }
 0x295   : > { %v2718_v13 = vsub.f32 1.0, %v4719_v3  ;;  %5447 = vmatprep.subr.msk.bf16.mxu0 %vm5446_vm9, %v5620_v48  ;;  %v2641_v12 = vmul.f32 0.5, %v2625_v58  ;;  %v2595_v49 = vadd.f32 %v6860_v34, %v2571_v20  ;;  %v2655_v46 = vadd.f32 %v2639_v11, %v2607_v15  ;;  %v2526_v52 = vpop.f32.mrb[27].mxu1  ;;  %2395 = vst.msk [vmem:[#allocation4 + $0x70] sm:$0xff] %vm862_vm4, %v2379_v26 }
 0x296   : > { %v2733_v42 = vmul.f32 %v2717_v16, %v2653_v56  ;;  %5449 = vmatpush3.bf16.msk.msra.mxu0 %vm5446_vm9, %v5620_v48  ;;  %v2628_v55 = vsub.f32 %v2596_v21, %v6926_v59  ;;  %v2574_v45 = vmul.f32 %v5207_v37, %v6846_v33  ;;  %v2656_v14 = vadd.f32 %v2640_v51, %v6900_v19  ;;  %v2616_v16 = vld [vmem:[#allocation5 + $0x68] sm:$0xff]  ;;  %v2615_v37 = vld [vmem:[#allocation5 + $0x60] sm:$0xff] }
 0x297   : > { %v2734_v35 = vmul.f32 %v2718_v13, %v2654_v9  ;;  %v2627_v22 = vsub.f32 %v2595_v49, %v6931_v25  ;;  %v2573_v56 = vmul.f32 %v6846_v33, %v2526_v52  ;;  %vm2671_vm10 = vcmp.ge.f32.partialorder %v2655_v46, 1.0 }
 0x298   : > { %2749 = vst.msk [vmem:[#allocation5 + $0x10] sm:$0xff] %vm862_vm4, %v2733_v42  ;;  %v2380_v15 = vmul.f32 %v2364_v18, %v6880_v53  ;;  %v2644_v9 = vmul.f32 0.5, %v2628_v55  ;;  %v2598_v11 = vadd.f32 %v6860_v34, %v2574_v45  ;;  %vm2672_vm11 = vcmp.ge.f32.partialorder %v2656_v14, 1.0  ;;  %v5210_v29 = vpop.f32.mrb[28].mxu1 }
 0x299   : > { %2750 = vst.msk [vmem:[#allocation5 + $0x18] sm:$0xff] %vm862_vm4, %v2734_v35  ;;  %v4720_v19 = vsel %vm2671_vm10, 1.0, %v5619_v43  ;;  %v2643_v51 = vmul.f32 0.5, %v2627_v22  ;;  %v2597_v2 = vadd.f32 %v6860_v34, %v2573_v56  ;;  %v4721_v41 = vsel %vm2672_vm11, 1.0, %v5619_v43  ;;  %vm5450_vm12 = vmpackc.low %vm2672_vm11, %vm2671_vm10  ;;  %v2536_v31 = vpop.f32.mrb[29].mxu1  ;;  %v2618_v56 = vld [vmem:[#allocation5 + $0x78] sm:$0xff] }
 0x29a   : > { %v2719_v60 = vsub.f32 1.0, %v4720_v19  ;;  %2396 = vst.msk [vmem:[#allocation4 + $0x78] sm:$0xff] %vm862_vm4, %v2380_v15  ;;  %v2630_v53 = vsub.f32 %v2598_v11, %v6943_v54  ;;  %v2720_v36 = vsub.f32 1.0, %v4721_v41  ;;  %5451 = vmatprep.subr.msk.bf16.mxu0 %vm5450_vm12, %v5620_v48  ;;  %v2576_v18 = vmul.f32 %v5210_v29, %v6846_v33 }
 0x29b   : > { %v2657_v58 = vadd.f32 %v2641_v12, %v6916_v4  ;;  %v2629_v20 = vsub.f32 %v2597_v2, %v2613_v23  ;;  %5453 = vmatpush3.bf16.msk.msra.mxu0 %vm5450_vm12, %v5620_v48  ;;  %v2575_v21 = vmul.f32 %v6846_v33, %v2536_v31  ;;  %v2658_v13 = vadd.f32 %v2642_v24, %v6910_v39 }
 0x29c   : > { %v2735_v3 = vmul.f32 %v2719_v60, %v2655_v46  ;;  %v2646_v26 = vmul.f32 0.5, %v2630_v53  ;;  %v2736_v49 = vmul.f32 %v2720_v36, %v2656_v14  ;;  %v2600_v42 = vadd.f32 %v6860_v34, %v2576_v18  ;;  %v5213_v46 = vpop.f32.mrb[30].mxu1  ;;  %v2617_v60 = vld [vmem:[#allocation5 + $0x70] sm:$0xff] }
 0x29d   : > { %vm2673_vm13 = vcmp.ge.f32.partialorder %v2657_v58, 1.0  ;;  %v2645_v55 = vmul.f32 0.5, %v2629_v20  ;;  %v2599_v4 = vadd.f32 %v6860_v34, %v2575_v21  ;;  %vm2674_vm14 = vcmp.ge.f32.partialorder %v2658_v13, 1.0  ;;  %v2546_v52 = vpop.f32.mrb[31].mxu1 }
 0x29e   : > { %2751 = vst.msk [vmem:[#allocation5 + $0x20] sm:$0xff] %vm862_vm4, %v2735_v3  ;;  %v4722_v12 = vsel %vm2673_vm13, 1.0, %v5619_v43  ;;  %2752 = vst.msk [vmem:[#allocation5 + $0x28] sm:$0xff] %vm862_vm4, %v2736_v49  ;;  %v2632_v35 = vsub.f32 %v2600_v42, %v2616_v16  ;;  %v4723_v39 = vsel %vm2674_vm14, 1.0, %v5619_v43  ;;  %v2578_v45 = vmul.f32 %v5213_v46, %v6846_v33 }
 0x29f   : > { %v2721_v24 = vsub.f32 1.0, %v4722_v12  ;;  %vm5454_vm15 = vmpackc.low %vm2674_vm14, %vm2673_vm13  ;;  %v2631_v14 = vsub.f32 %v2599_v4, %v2615_v37  ;;  %v2722_v22 = vsub.f32 1.0, %v4723_v39  ;;  %v2577_v15 = vmul.f32 %v6846_v33, %v2546_v52 }
 0x2a0   : > { %5455 = vmatprep.subr.msk.bf16.mxu0 %vm5454_vm15, %v5620_v48  ;;  %v2659_v11 = vadd.f32 %v2643_v51, %v6931_v25  ;;  %vm1946_vm0 = vcmp.ge.f32.partialorder %v6871_v17, 1.0  ;;  %v2648_v19 = vmul.f32 0.5, %v2632_v35  ;;  %v2602_v41 = vadd.f32 %v6860_v34, %v2578_v45 }
 0x2a1   : > { %v2737_v2 = vmul.f32 %v2721_v24, %v2657_v58  ;;  %5457 = vmatpush3.bf16.msk.msra.mxu0 %vm5454_vm15, %v5620_v48  ;;  %v2660_v29 = vadd.f32 %v2644_v9, %v6926_v59  ;;  %v2647_v53 = vmul.f32 0.5, %v2631_v14  ;;  %v2738_v36 = vmul.f32 %v2722_v22, %v2658_v13 }
 0x2a2   : > { %v2601_v18 = vadd.f32 %v6860_v34, %v2577_v15  ;;  %vm2675_vm1 = vcmp.ge.f32.partialorder %v2659_v11, 1.0  ;;  %v2634_v33 = vsub.f32 %v2602_v41, %v2618_v56  ;;  %v2661_v51 = vadd.f32 %v2645_v55, %v2613_v23 }
 0x2a3   : > { %2753 = vst.msk [vmem:[#allocation5 + $0x30] sm:$0xff] %vm862_vm4, %v2737_v2  ;;  %vm2676_vm2 = vcmp.ge.f32.partialorder %v2660_v29, 1.0  ;;  %v4724_v25 = vsel %vm2675_vm1, 1.0, %v5619_v43  ;;  %2754 = vst.msk [vmem:[#allocation5 + $0x38] sm:$0xff] %vm862_vm4, %v2738_v36  ;;  %v2662_v34 = vadd.f32 %v2646_v26, %v6943_v54  ;;  %v2663_v23 = vadd.f32 %v2647_v53, %v2615_v37 }
 0x2a4   : > { %v2633_v31 = vsub.f32 %v2601_v18, %v2617_v60  ;;  %v4725_v58 = vsel %vm2676_vm2, 1.0, %v5619_v43  ;;  %v2723_v20 = vsub.f32 1.0, %v4724_v25  ;;  %vm6981_vm3 = vmpackc.low %vm2676_vm2, %vm2675_vm1  ;;  %v2650_v9 = vmul.f32 0.5, %v2634_v33 }
 0x2a5   : > { %v2724_v3 = vsub.f32 1.0, %v4725_v58  ;;  %5459 = vmatprep.subr.msk.bf16.mxu0 %vm6981_vm3, %v5620_v48  ;;  %vm2677_vm5 = vcmp.ge.f32.partialorder %v2661_v51, 1.0  ;;  %vm2678_vm6 = vcmp.ge.f32.partialorder %v2662_v34, 1.0  ;;  %v2664_v54 = vadd.f32 %v2648_v19, %v2616_v16 }
 0x2a6   : > { %v2649_v21 = vmul.f32 0.5, %v2633_v31  ;;  %v2739_v13 = vmul.f32 %v2723_v20, %v2659_v11  ;;  %v4726_v49 = vsel %vm2677_vm5, 1.0, %v5619_v43  ;;  %v4727_v55 = vsel %vm2678_vm6, 1.0, %v5619_v43  ;;  %vm6991_vm7 = vmpackc.low %vm2678_vm6, %vm2677_vm5 }
 0x2a7   : > { %v2740_v42 = vmul.f32 %v2724_v3, %v2660_v29  ;;  %v2725_v4 = vsub.f32 1.0, %v4726_v49  ;;  %v2726_v26 = vsub.f32 1.0, %v4727_v55  ;;  %vm2679_vm8 = vcmp.ge.f32.partialorder %v2663_v23, 1.0 }
 0x2a8   : > { %2755 = vst.msk [vmem:[#allocation5 + $0x40] sm:$0xff] %vm862_vm4, %v2739_v13  ;;  %v2665_v46 = vadd.f32 %v2649_v21, %v2617_v60  ;;  %v2666_v37 = vadd.f32 %v2650_v9, %v2618_v56  ;;  %vm2680_vm9 = vcmp.ge.f32.partialorder %v2664_v54, 1.0  ;;  %v4728_v39 = vsel %vm2679_vm8, 1.0, %v5619_v43 }
 0x2a9   : > { %2756 = vst.msk [vmem:[#allocation5 + $0x48] sm:$0xff] %vm862_vm4, %v2740_v42  ;;  %v2741_v35 = vmul.f32 %v2725_v4, %v2661_v51  ;;  %v2009_v24 = vmul.f32 %v1993_v10, %v6838_v6  ;;  %v2742_v45 = vmul.f32 %v2726_v26, %v2662_v34  ;;  %v4729_v52 = vsel %vm2680_vm9, 1.0, %v5619_v43  ;;  %vm7002_vm10 = vmpackc.low %vm2680_vm9, %vm2679_vm8  ;;  %v3023_v42 = vld [vmem:[%s7604_s8 + $0x8] sm:$0xff] }
 0x2aa   : > { %v2727_v16 = vsub.f32 1.0, %v4728_v39  ;;  %vm2681_vm11 = vcmp.ge.f32.partialorder %v2665_v46, 1.0  ;;  %v2728_v22 = vsub.f32 1.0, %v4729_v52  ;;  %vm2682_vm12 = vcmp.ge.f32.partialorder %v2666_v37, 1.0 }
 0x2ab   : > { %2757 = vst.msk [vmem:[#allocation5 + $0x50] sm:$0xff] %vm862_vm4, %v2741_v35  ;;  %v4730_v56 = vsel %vm2681_vm11, 1.0, %v5619_v43  ;;  %2025 = vst.msk [vmem:[#allocation3 + $0x50] sm:$0xff] %vm862_vm4, %v2009_v24  ;;  %v7012_v6 = vsel %vm1946_vm0, 1.0, %v5619_v43  ;;  %v4731_v15 = vsel %vm2682_vm12, 1.0, %v5619_v43  ;;  %v1931_v29 = vadd.f32 %v6828_v5, %v6804_v38 }
 0x2ac   : > { %2758 = vst.msk [vmem:[#allocation5 + $0x58] sm:$0xff] %vm862_vm4, %v2742_v45  ;;  %v2743_v10 = vmul.f32 %v2727_v16, %v2663_v23  ;;  %v2729_v11 = vsub.f32 1.0, %v4730_v56  ;;  %vm7016_vm13 = vmpackc.low %vm2682_vm12, %vm2681_vm11  ;;  %v1994_v2 = vsub.f32 1.0, %v7012_v6  ;;  %v2744_v41 = vmul.f32 %v2728_v22, %v2664_v54 }
 0x2ad   : > { %v2730_v60 = vsub.f32 1.0, %v4731_v15  ;;  %v1932_v53 = vadd.f32 %v6821_v50, %v6797_v1  ;;  %v1933_v33 = vadd.f32 %v6885_v30, %v6852_v0  ;;  %v1934_v25 = vadd.f32 %v6873_v32, %v6840_v62 }
 0x2ae   : > { %2759 = vst.msk [vmem:[#allocation5 + $0x60] sm:$0xff] %vm862_vm4, %v2743_v10  ;;  %v2745_v36 = vmul.f32 %v2729_v11, %v2665_v46  ;;  %v2010_v18 = vmul.f32 %v1994_v2, %v6871_v17  ;;  %2760 = vst.msk [vmem:[#allocation5 + $0x68] sm:$0xff] %vm862_vm4, %v2744_v41  ;;  %vm1947_vm14 = vcmp.ge.f32.partialorder %v1931_v29, 1.0  ;;  %vm2795_vm2 = vcmask 523264   ;;  %v3025_v46 = vld [vmem:[%s7604_s8 + $0x18] sm:$0xff]  ;;  %v3309_v11 = vld [vmem:[#allocation6 + $0x8] sm:$0xff] }
 0x2af   : > { %v2746_v51 = vmul.f32 %v2730_v60, %v2666_v37  ;;  %vm1948_vm15 = vcmp.ge.f32.partialorder %v1932_v53, 1.0  ;;  %v7035_v1 = vsel %vm1947_vm14, 1.0, %v5619_v43  ;;  %vm1949_vm0 = vcmp.ge.f32.partialorder %v1933_v33, 1.0  ;;  %v3308_v41 = vld [vmem:[#allocation6] sm:$0xff] }
 0x2b0   : > { %2761 = vst.msk [vmem:[#allocation5 + $0x70] sm:$0xff] %vm862_vm4, %v2745_v36  ;;  %2026 = vst.msk [vmem:[#allocation3 + $0x58] sm:$0xff] %vm862_vm4, %v2010_v18  ;;  %v7038_v38 = vsel %vm1948_vm15, 1.0, %v5619_v43  ;;  %vm1950_vm1 = vcmp.ge.f32.partialorder %v1934_v25, 1.0  ;;  %v1995_v50 = vsub.f32 1.0, %v7035_v1  ;;  %v7044_v62 = vsel %vm1949_vm0, 1.0, %v5619_v43 }
 0x2b1   : > { %2762 = vst.msk [vmem:[#allocation5 + $0x78] sm:$0xff] %vm862_vm4, %v2746_v51  ;;  %v1996_v5 = vsub.f32 1.0, %v7038_v38  ;;  %v7047_v0 = vsel %vm1950_vm1, 1.0, %v5619_v43  ;;  %v1997_v17 = vsub.f32 1.0, %v7044_v62  ;;  %v3311_v18 = vld [vmem:[#allocation6 + $0x18] sm:$0xff] }
 0x2b2   : > { %v1998_v32 = vsub.f32 1.0, %v7047_v0  ;;  %v2011_v30 = vmul.f32 %v1995_v50, %v1931_v29 }
 0x2b3   : > { %v2012_v31 = vmul.f32 %v1996_v5, %v1932_v53  ;;  %v2013_v58 = vmul.f32 %v1997_v17, %v1933_v33 }
 0x2b4   : > { %v2014_v20 = vmul.f32 %v1998_v32, %v1934_v25  ;;  %2027 = vst.msk [vmem:[#allocation3 + $0x60] sm:$0xff] %vm862_vm4, %v2011_v30  ;;  %v3313_v30 = vld [vmem:[#allocation6 + $0x28] sm:$0xff] }
 0x2b5   : > { %2028 = vst.msk [vmem:[#allocation3 + $0x68] sm:$0xff] %vm862_vm4, %v2012_v31  ;;  %2029 = vst.msk [vmem:[#allocation3 + $0x70] sm:$0xff] %vm862_vm4, %v2013_v58 }
 0x2b6   : > { %2030 = vst.msk [vmem:[#allocation3 + $0x78] sm:$0xff] %vm862_vm4, %v2014_v20 }
 0x2d1   : > { %v2779_v34 = vpop.trf.xlu0 }
 0x2d2   : > { %5230 = vmatprep.mubr.msk.f32.mxu0 %vm2795_vm2, %v2779_v34  ;;  %v3312_v34 = vld [vmem:[#allocation6 + $0x20] sm:$0xff] }
 0x2d5   : > { %v2780_v9 = vpop.trf.xlu0 }
 0x2d6   : > { %5231 = vmatmul.mubr.msk.f32.vlgmr.msra.gmra.mrb[32].mxu0 %vm2795_vm2, %v2780_v9 }
 0x2d7   : > { %5461 = vmatpush3.bf16.msk.msra.mxu0 %vm6981_vm3, %v5620_v48 }
 0x2d8   : > { %5463 = vmatprep.subr.msk.bf16.mxu0 %vm6991_vm7, %v5620_v48 }
 0x2d9   : > { %v2781_v3 = vpop.trf.xlu0 }
 0x2da   : > { %5233 = vmatprep.mubr.msk.f32.mxu0 %vm2795_vm2, %v2781_v3 }
 0x2db   : > { %5465 = vmatpush3.bf16.msk.msra.mxu0 %vm6991_vm7, %v5620_v48 }
 0x2dc   : > { %5467 = vmatprep.subr.msk.bf16.mxu0 %vm7002_vm10, %v5620_v48 }
 0x2dd   : > { %v2782_v23 = vpop.trf.xlu0 }
 0x2de   : > { %5234 = vmatmul.mubr.msk.f32.gmra.mrb[34].mxu0 %vm2795_vm2, %v2782_v23 }
 0x2df   : > { %5469 = vmatpush3.bf16.msk.msra.mxu0 %vm7002_vm10, %v5620_v48 }
 0x2e0   : > { %5471 = vmatprep.subr.msk.bf16.mxu0 %vm7016_vm13, %v5620_v48 }
 0x2e3   : > { %5473 = vmatpush3.bf16.msk.msra.mxu0 %vm7016_vm13, %v5620_v48  ;;  %v3022_v48 = vld [vmem:[%s7604_s8] sm:$0xff] }
 0x2f3   : > { %v2909_v59 = vpop.trf.xlu1 }
 0x2f4   : > { %5252 = vmatprep.mubr.msk.f32.mxu0 %vm2795_vm2, %v2909_v59 }
 0x2f7   : > { %v2910_v21 = vpop.trf.xlu1 }
 0x2f8   : > { %5253 = vmatmul.mubr.msk.f32.vlgmr.msra.gmra.mrb[36].mxu0 %vm2795_vm2, %v2910_v21 }
 0x2fb   : > { %v2911_v13 = vpop.trf.xlu1 }
 0x2fc   : > { %5255 = vmatprep.mubr.msk.f32.mxu0 %vm2795_vm2, %v2911_v13 }
 0x2ff   : > { %v2912_v49 = vpop.trf.xlu1 }
 0x300   : > { %5256 = vmatmul.mubr.msk.f32.gmra.mrb[38].mxu0 %vm2795_vm2, %v2912_v49 }
 0x301   : > { %5286 = vmatprep.mubr.msk.f32.mxu0 %vm862_vm4, %v6778_v40  ;;  %v3024_v40 = vld [vmem:[%s7604_s8 + $0x10] sm:$0xff] }
 0x3a9   : > { %v5232_v55 = vpop.f32.mrb[32].mxu0 }
 0x3aa   : > { %v3027_v4 = vmul.f32 %v5232_v55, %v3023_v42  ;;  %v2874_v12 = vpop.f32.mrb[33].mxu0 }
 0x3ab   : > { %v3026_v54 = vmul.f32 %v3022_v48, %v2874_v12 }
 0x3ad   : > { %v5474_v26 = vpack.c.bf16 %v3027_v4, %v3026_v54  ;;  %v3315_v4 = vld [vmem:[#allocation6 + $0x38] sm:$0xff] }
 0x3af   : > { %5475 = vmatprep.subr.bf16.mxu1 %v5474_v26 }
 0x3b0   : > { %5477 = vmatpush3.bf16.msra.mxu1 %v5474_v26 }
 0x3b1   : > { %v5235_v37 = vpop.f32.mrb[34].mxu0 }
 0x3b2   : > { %v3029_v35 = vmul.f32 %v5235_v37, %v3025_v46  ;;  %v2884_v39 = vpop.f32.mrb[35].mxu0  ;;  %v3314_v37 = vld [vmem:[#allocation6 + $0x30] sm:$0xff] }
 0x3b3   : > { %v3028_v24 = vmul.f32 %v3024_v40, %v2884_v39 }
 0x3b5   : > { %v5478_v45 = vpack.c.bf16 %v3029_v35, %v3028_v24 }
 0x3b7   : > { %5479 = vmatprep.subr.bf16.mxu1 %v5478_v45 }
 0x3b8   : > { %5481 = vmatpush3.bf16.msra.mxu1 %v5478_v45 }
 0x3bb   : > { %5267 = vmatmul.mubr.msk.f32.vlgmr.msra.gmra.mrb[32].mxu1 %vm862_vm4, %v6676_v8 }
 0x3bc   : > { %5269 = vmatprep.mubr.msk.f32.mxu1 %vm862_vm4, %v6694_v57 }
 0x3bf   : > { %5270 = vmatmul.mubr.msk.f32.gmra.mrb[34].mxu1 %vm862_vm4, %v6700_v61 }
 0x3c0   : > { %5272 = vmatprep.mubr.msk.f32.mxu1 %vm862_vm4, %v6726_v27 }
 0x3c3   : > { %5273 = vmatmul.mubr.msk.f32.gmra.mrb[36].mxu1 %vm862_vm4, %v6745_v47  ;;  %v3468_v47 = vld [vmem:[%s7605_s9] sm:$0xff] }
 0x3c4   : > { %5275 = vmatprep.mubr.msk.f32.mxu1 %vm862_vm4, %v6791_v7  ;;  %v3469_v7 = vld [vmem:[%s7605_s9 + $0x8] sm:$0xff] }
 0x3c7   : > { %5276 = vmatmul.mubr.msk.f32.gmra.mrb[38].mxu1 %vm862_vm4, %v6818_v28  ;;  %v5490_v28 = vpack.c.bf16 %v3469_v7, %v3468_v47 }
 0x3c9   : > { %5491 = vmatprep.subr.bf16.mxu1 %v5490_v28 }
 0x3ca   : > { %5493 = vmatpush3.bf16.msra.mxu1 %v5490_v28 }
 0x3cb   : > { %v5254_v52 = vpop.f32.mrb[36].mxu0 }
 0x3cc   : > { %v3031_v8 = vmul.f32 %v5254_v52, %v3023_v42  ;;  %v3003_v16 = vpop.f32.mrb[37].mxu0 }
 0x3cd   : > { %v3030_v14 = vmul.f32 %v3022_v48, %v3003_v16 }
 0x3cf   : > { %v5482_v57 = vpack.c.bf16 %v3031_v8, %v3030_v14 }
 0x3d1   : > { %5483 = vmatprep.subr.bf16.mxu0 %v5482_v57 }
 0x3d2   : > { %5485 = vmatpush3.bf16.msra.mxu0 %v5482_v57 }
 0x3d3   : > { %v5257_v61 = vpop.f32.mrb[38].mxu0 }
 0x3d4   : > { %v3033_v22 = vmul.f32 %v5257_v61, %v3025_v46  ;;  %v3013_v56 = vpop.f32.mrb[39].mxu0 }
 0x3d5   : > { %v3032_v27 = vmul.f32 %v3024_v40, %v3013_v56 }
 0x3d7   : > { %v5486_v10 = vpack.c.bf16 %v3033_v22, %v3032_v27 }
 0x3d9   : > { %5487 = vmatprep.subr.bf16.mxu0 %v5486_v10 }
 0x3da   : > { %5489 = vmatpush3.bf16.msra.mxu0 %v5486_v10 }
 0x3dd   : > { %5287 = vmatmul.mubr.msk.f32.vlgmr.msra.gmra.mrb[40].mxu0 %vm862_vm4, %v6826_v44  ;;  %v3470_v44 = vld [vmem:[%s7605_s9 + $0x10] sm:$0xff] }
 0x3de   : > { %5289 = vmatprep.mubr.msk.f32.mxu0 %vm862_vm4, %v6883_v63  ;;  %v3471_v63 = vld [vmem:[%s7605_s9 + $0x18] sm:$0xff] }
 0x3e1   : > { %5290 = vmatmul.mubr.msk.f32.gmra.mrb[42].mxu0 %vm862_vm4, %v7012_v6  ;;  %v5494_v6 = vpack.c.bf16 %v3471_v63, %v3470_v44 }
 0x3e2   : > { %5292 = vmatprep.mubr.msk.f32.mxu0 %vm862_vm4, %v7035_v1  ;;  %v3310_v1 = vld [vmem:[#allocation6 + $0x10] sm:$0xff] }
 0x3e3   : > { %5495 = vmatprep.subr.bf16.mxu1 %v5494_v6 }
 0x3e4   : > { %5497 = vmatpush3.bf16.msra.mxu1 %v5494_v6 }
 0x3e5   : > { %5293 = vmatmul.mubr.msk.f32.gmra.mrb[44].mxu0 %vm862_vm4, %v7038_v38 }
 0x3e6   : > { %5295 = vmatprep.mubr.msk.f32.mxu0 %vm862_vm4, %v7044_v62 }
 0x3e9   : > { %5296 = vmatmul.mubr.msk.f32.gmra.mrb[46].mxu0 %vm862_vm4, %v7047_v0 }
 0x48e   : > { %v5268_v15 = vpop.f32.mrb[32].mxu1 }
 0x48f   : > { %v3293_v19 = vmul.f32 0.125, %v5268_v15  ;;  %v3124_v2 = vpop.f32.mrb[33].mxu1 }
 0x490   : > { %v3292_v60 = vmul.f32 0.125, %v3124_v2 }
 0x491   : > { %v3325_v29 = vsub.f32 %v3293_v19, %v3309_v11 }
 0x492   : > { %v3324_v53 = vsub.f32 %v3292_v60, %v3308_v41  ;;  %v5271_v36 = vpop.f32.mrb[34].mxu1 }
 0x493   : > { %v3341_v33 = vmul.f32 0.5, %v3325_v29  ;;  %v3295_v25 = vmul.f32 0.125, %v5271_v36  ;;  %v3134_v51 = vpop.f32.mrb[35].mxu1 }
 0x494   : > { %v3340_v38 = vmul.f32 0.5, %v3324_v53  ;;  %v3294_v50 = vmul.f32 0.125, %v3134_v51 }
 0x495   : > { %v3357_v5 = vadd.f32 %v3341_v33, %v3309_v11  ;;  %v3327_v62 = vsub.f32 %v3295_v25, %v3311_v18  ;;  %v3317_v33 = vld [vmem:[#allocation6 + $0x48] sm:$0xff] }
 0x496   : > { %v3356_v0 = vadd.f32 %v3340_v38, %v3308_v41  ;;  %v3326_v17 = vsub.f32 %v3294_v50, %v3310_v1  ;;  %v5274_v32 = vpop.f32.mrb[36].mxu1 }
 0x497   : > { %vm3373_vm3 = vcmp.ge.f32.partialorder %v3357_v5, 0.5  ;;  %v3343_v31 = vmul.f32 0.5, %v3327_v62  ;;  %v3297_v58 = vmul.f32 0.125, %v5274_v32  ;;  %v3144_v20 = vpop.f32.mrb[37].mxu1 }
 0x498   : > { %v4773_v9 = vsel %vm3373_vm3, 1.0, %v5619_v43  ;;  %v3342_v3 = vmul.f32 0.5, %v3326_v17  ;;  %v3296_v23 = vmul.f32 0.125, %v3144_v20  ;;  %vm3372_vm5 = vcmp.ge.f32.partialorder %v3356_v0, 0.5 }
 0x499   : > { %v3421_v59 = vsub.f32 1.0, %v4773_v9  ;;  %v3359_v21 = vadd.f32 %v3343_v31, %v3311_v18  ;;  %v3329_v13 = vsub.f32 %v3297_v58, %v3313_v30  ;;  %v4772_v49 = vsel %vm3372_vm5, 1.0, %v5619_v43  ;;  %v3318_v31 = vld [vmem:[#allocation6 + $0x50] sm:$0xff] }
 0x49a   : > { %v3358_v42 = vadd.f32 %v3342_v3, %v3310_v1  ;;  %v3328_v48 = vsub.f32 %v3296_v23, %v3312_v34  ;;  %v5277_v55 = vpop.f32.mrb[38].mxu1  ;;  %v3420_v12 = vsub.f32 1.0, %v4772_v49  ;;  %5306 = vmatprep.mubr.msk.f32.mxu1 %vm862_vm4, %v4772_v49  ;;  %v3316_v1 = vld [vmem:[#allocation6 + $0x40] sm:$0xff] }
 0x49b   : > { %v3437_v54 = vmul.f32 %v3421_v59, %v3357_v5  ;;  %v3345_v26 = vmul.f32 0.5, %v3329_v13  ;;  %v3299_v46 = vmul.f32 0.125, %v5277_v55  ;;  %v3154_v40 = vpop.f32.mrb[39].mxu1  ;;  %5307 = vmatmul.mubr.msk.f32.vlgmr.msra.gmra.mrb[40].mxu1 %vm862_vm4, %v4773_v9  ;;  %vm3375_vm6 = vcmp.ge.f32.partialorder %v3359_v21, 0.5 }
 0x49c   : > { %v3344_v35 = vmul.f32 0.5, %v3328_v48  ;;  %v3436_v39 = vmul.f32 %v3420_v12, %v3356_v0  ;;  %v3298_v24 = vmul.f32 0.125, %v3154_v40  ;;  %vm3374_vm7 = vcmp.ge.f32.partialorder %v3358_v42, 0.5  ;;  %v3319_v0 = vld [vmem:[#allocation6 + $0x58] sm:$0xff]  ;;  %v3320_v48 = vld [vmem:[#allocation6 + $0x60] sm:$0xff] }
 0x49d   : > { %3453 = vst.msk [vmem:[#allocation6 + $0x8] sm:$0xff] %vm862_vm4, %v3437_v54  ;;  %v3361_v45 = vadd.f32 %v3345_v26, %v3313_v30  ;;  %v3331_v52 = vsub.f32 %v3299_v46, %v3315_v4  ;;  %v4774_v8 = vsel %vm3374_vm7, 1.0, %v5619_v43  ;;  %v4775_v16 = vsel %vm3375_vm6, 1.0, %v5619_v43 }
 0x49e   : > { %v3360_v14 = vadd.f32 %v3344_v35, %v3312_v34  ;;  %3452 = vst.msk [vmem:[#allocation6] sm:$0xff] %vm862_vm4, %v3436_v39  ;;  %v3330_v57 = vsub.f32 %v3298_v24, %v3314_v37  ;;  %v3422_v61 = vsub.f32 1.0, %v4774_v8  ;;  %5309 = vmatprep.mubr.msk.f32.mxu1 %vm862_vm4, %v4774_v8  ;;  %v3423_v22 = vsub.f32 1.0, %v4775_v16  ;;  %v3323_v24 = vld [vmem:[#allocation6 + $0x78] sm:$0xff] }
 0x49f   : > { %v3347_v56 = vmul.f32 0.5, %v3331_v52  ;;  %5310 = vmatmul.mubr.msk.f32.gmra.mrb[42].mxu1 %vm862_vm4, %v4775_v16  ;;  %vm3377_vm8 = vcmp.ge.f32.partialorder %v3361_v45, 0.5 }
 0x4a0   : > { %v3346_v27 = vmul.f32 0.5, %v3330_v57  ;;  %v3438_v10 = vmul.f32 %v3422_v61, %v3358_v42  ;;  %v3439_v47 = vmul.f32 %v3423_v22, %v3359_v21  ;;  %vm3376_vm9 = vcmp.ge.f32.partialorder %v3360_v14, 0.5  ;;  %v3321_v21 = vld [vmem:[#allocation6 + $0x68] sm:$0xff] }
 0x4a1   : > { %v3363_v7 = vadd.f32 %v3347_v56, %v3315_v4  ;;  %v4776_v28 = vsel %vm3376_vm9, 1.0, %v5619_v43  ;;  %v4777_v44 = vsel %vm3377_vm8, 1.0, %v5619_v43 }
 0x4a2   : > { %v3362_v63 = vadd.f32 %v3346_v27, %v3314_v37  ;;  %3454 = vst.msk [vmem:[#allocation6 + $0x10] sm:$0xff] %vm862_vm4, %v3438_v10  ;;  %3455 = vst.msk [vmem:[#allocation6 + $0x18] sm:$0xff] %vm862_vm4, %v3439_v47  ;;  %v3424_v6 = vsub.f32 1.0, %v4776_v28  ;;  %5312 = vmatprep.mubr.msk.f32.mxu1 %vm862_vm4, %v4776_v28  ;;  %v3425_v15 = vsub.f32 1.0, %v4777_v44 }
 0x4a3   : > { %5313 = vmatmul.mubr.msk.f32.gmra.mrb[44].mxu1 %vm862_vm4, %v4777_v44  ;;  %vm3379_vm10 = vcmp.ge.f32.partialorder %v3363_v7, 0.5 }
 0x4a4   : > { %v3440_v11 = vmul.f32 %v3424_v6, %v3360_v14  ;;  %v3441_v19 = vmul.f32 %v3425_v15, %v3361_v45  ;;  %vm3378_vm11 = vcmp.ge.f32.partialorder %v3362_v63, 0.5  ;;  %v4779_v2 = vsel %vm3379_vm10, 1.0, %v5619_v43  ;;  %v3322_v14 = vld [vmem:[#allocation6 + $0x70] sm:$0xff] }
 0x4a5   : > { %v4778_v41 = vsel %vm3378_vm11, 1.0, %v5619_v43  ;;  %v3427_v60 = vsub.f32 1.0, %v4779_v2 }
 0x4a6   : > { %3456 = vst.msk [vmem:[#allocation6 + $0x20] sm:$0xff] %vm862_vm4, %v3440_v11  ;;  %3457 = vst.msk [vmem:[#allocation6 + $0x28] sm:$0xff] %vm862_vm4, %v3441_v19  ;;  %v3426_v29 = vsub.f32 1.0, %v4778_v41  ;;  %5315 = vmatprep.mubr.msk.f32.mxu1 %vm862_vm4, %v4778_v41 }
 0x4a7   : > { %v3443_v53 = vmul.f32 %v3427_v60, %v3363_v7  ;;  %5316 = vmatmul.mubr.msk.f32.gmra.mrb[46].mxu1 %vm862_vm4, %v4779_v2 }
 0x4a8   : > { %v3442_v36 = vmul.f32 %v3426_v29, %v3362_v63 }
 0x4a9   : > { %3459 = vst.msk [vmem:[#allocation6 + $0x38] sm:$0xff] %vm862_vm4, %v3443_v53 }
 0x4aa   : > { %3458 = vst.msk [vmem:[#allocation6 + $0x30] sm:$0xff] %vm862_vm4, %v3442_v36 }
 0x4b0   : > { %v5288_v18 = vpop.f32.mrb[40].mxu0 }
 0x4b1   : > { %v3301_v25 = vmul.f32 0.125, %v5288_v18  ;;  %v3253_v51 = vpop.f32.mrb[41].mxu0 }
 0x4b2   : > { %v3300_v38 = vmul.f32 0.125, %v3253_v51 }
 0x4b3   : > { %v3333_v50 = vsub.f32 %v3301_v25, %v3317_v33 }
 0x4b4   : > { %v3332_v5 = vsub.f32 %v3300_v38, %v3316_v1  ;;  %v5291_v62 = vpop.f32.mrb[42].mxu0 }
 0x4b5   : > { %v3349_v17 = vmul.f32 0.5, %v3333_v50  ;;  %v3303_v32 = vmul.f32 0.125, %v5291_v62  ;;  %v3263_v30 = vpop.f32.mrb[43].mxu0 }
 0x4b6   : > { %v3348_v58 = vmul.f32 0.5, %v3332_v5  ;;  %v3302_v20 = vmul.f32 0.125, %v3263_v30  ;;  %v4211_v30 = vld [vmem:[%s7609_s13 + $0x18] sm:$0xff] }
 0x4b7   : > { %v3365_v34 = vadd.f32 %v3349_v17, %v3317_v33  ;;  %v3335_v9 = vsub.f32 %v3303_v32, %v3319_v0  ;;  %v4210_v32 = vld [vmem:[%s7609_s13 + $0x10] sm:$0xff] }
 0x4b8   : > { %v3364_v3 = vadd.f32 %v3348_v58, %v3316_v1  ;;  %v3334_v23 = vsub.f32 %v3302_v20, %v3318_v31  ;;  %v5294_v59 = vpop.f32.mrb[44].mxu0  ;;  %v7201_v58 = vld [vmem:[%s7606_s10] ss:$0 sm:$0xff] }
 0x4b9   : > { %v3351_v13 = vmul.f32 0.5, %v3335_v9  ;;  %v3305_v49 = vmul.f32 0.125, %v5294_v59  ;;  %v3273_v42 = vpop.f32.mrb[45].mxu0  ;;  %vm3381_vm12 = vcmp.ge.f32.partialorder %v3365_v34, 0.5  ;;  %v3728_v9 = vld [vmem:[#allocation8] sm:$0xff] }
 0x4ba   : > { %v3350_v55 = vmul.f32 0.5, %v3334_v23  ;;  %v3304_v4 = vmul.f32 0.125, %v3273_v42  ;;  %vm3380_vm13 = vcmp.ge.f32.partialorder %v3364_v3, 0.5  ;;  %v4781_v12 = vsel %vm3381_vm12, 1.0, %v5619_v43  ;;  %v7212_v59 = vld [vmem:[%s7608_s12] ss:$0 sm:$0xff] }
 0x4bb   : > { %v3367_v54 = vadd.f32 %v3351_v13, %v3319_v0  ;;  %v3337_v26 = vsub.f32 %v3305_v49, %v3321_v21  ;;  %v4780_v46 = vsel %vm3380_vm13, 1.0, %v5619_v43  ;;  %v3429_v40 = vsub.f32 1.0, %v4781_v12  ;;  %v4209_v0 = vld [vmem:[%s7609_s13 + $0x8] sm:$0xff]  ;;  %v7217_v13 = vld [vmem:[%s7608_s12 + $0x1] ss:$0 sm:$0xff] }
 0x4bc   : > { %v3366_v37 = vadd.f32 %v3350_v55, %v3318_v31  ;;  %v3336_v35 = vsub.f32 %v3304_v4, %v3320_v48  ;;  %v5297_v39 = vpop.f32.mrb[46].mxu0  ;;  %v3428_v45 = vsub.f32 1.0, %v4780_v46  ;;  %5318 = vmatprep.mubr.msk.f32.mxu1 %vm862_vm4, %v4780_v46  ;;  %v5502_v31 = vpack.c.bf16 %v4211_v30, %v4210_v32  ;;  %v3834_v46 = vld [vmem:[#allocation8 + $0x2] sm:$0xff] }
 0x4bd   : > { %v3353_v52 = vmul.f32 0.5, %v3337_v26  ;;  %v3307_v8 = vmul.f32 0.125, %v5297_v39  ;;  %v3283_v16 = vpop.f32.mrb[47].mxu0  ;;  %v3445_v57 = vmul.f32 %v3429_v40, %v3365_v34  ;;  %5319 = vmatmul.mubr.msk.f32.gmra.mrb[48].mxu1 %vm862_vm4, %v4781_v12  ;;  %vm3383_vm14 = vcmp.ge.f32.partialorder %v3367_v54, 0.5  ;;  %v7206_v34 = vld [vmem:[%s7607_s11] ss:$0 sm:$0xff] }
 0x4be   : > { %v3352_v61 = vmul.f32 0.5, %v3336_v35  ;;  %v3444_v22 = vmul.f32 %v3428_v45, %v3364_v3  ;;  %v3306_v56 = vmul.f32 0.125, %v3283_v16  ;;  %vm3382_vm15 = vcmp.ge.f32.partialorder %v3366_v37, 0.5  ;;  %v7229_v40 = vld [vmem:[%s7608_s12 + $0x2] ss:$0 sm:$0xff] }
 0x4bf   : > { %v3369_v27 = vadd.f32 %v3353_v52, %v3321_v21  ;;  %v3339_v10 = vsub.f32 %v3307_v8, %v3323_v24  ;;  %3461 = vst.msk [vmem:[#allocation6 + $0x48] sm:$0xff] %vm862_vm4, %v3445_v57  ;;  %v4782_v47 = vsel %vm3382_vm15, 1.0, %v5619_v43  ;;  %v4783_v7 = vsel %vm3383_vm14, 1.0, %v5619_v43  ;;  %v3781_v21 = vld [vmem:[#allocation8 + $0x1] sm:$0xff] }
 0x4c0   : > { %v3368_v28 = vadd.f32 %v3352_v61, %v3320_v48  ;;  %3460 = vst.msk [vmem:[#allocation6 + $0x40] sm:$0xff] %vm862_vm4, %v3444_v22  ;;  %v3338_v44 = vsub.f32 %v3306_v56, %v3322_v14  ;;  %v3430_v63 = vsub.f32 1.0, %v4782_v47  ;;  %5321 = vmatprep.mubr.msk.f32.mxu1 %vm862_vm4, %v4782_v47  ;;  %v3431_v6 = vsub.f32 1.0, %v4783_v7  ;;  %v3736_v39 = vld [vmem:[#allocation8 + $0xa0] sm:$0xff]  ;;  %v4055_v22 = vld [vmem:[#allocation8 + $0x90] sm:$0xff] }
 0x4c1   : > { %v3355_v15 = vmul.f32 0.5, %v3339_v10  ;;  %5322 = vmatmul.mubr.msk.f32.gmra.mrb[50].mxu1 %vm862_vm4, %v4783_v7  ;;  %vm3385_vm0 = vcmp.ge.f32.partialorder %v3369_v27, 0.5  ;;  %v3749_v4 = vmul.f32 %v7212_v59, %v3728_v9  ;;  %v3802_v12 = vmul.f32 %v7217_v13, %v3781_v21  ;;  %v7246_v47 = vld [vmem:[%s7608_s12 + $0x4] ss:$0 sm:$0xff]  ;;  %v7251_v7 = vld [vmem:[%s7608_s12 + $0x5] ss:$0 sm:$0xff] }
 0x4c2   : > { %v3354_v11 = vmul.f32 0.5, %v3338_v44  ;;  %v3446_v19 = vmul.f32 %v3430_v63, %v3366_v37  ;;  %v3447_v2 = vmul.f32 %v3431_v6, %v3367_v54  ;;  %vm3384_vm1 = vcmp.ge.f32.partialorder %v3368_v28, 0.5 }
 0x4c3   : > { %v3371_v41 = vadd.f32 %v3355_v15, %v3323_v24  ;;  %v4784_v60 = vsel %vm3384_vm1, 1.0, %v5619_v43  ;;  %v4785_v29 = vsel %vm3385_vm0, 1.0, %v5619_v43  ;;  %v3789_v24 = vld [vmem:[#allocation8 + $0xa1] sm:$0xff]  ;;  %v3818_v8 = vadd.f32 %v3802_v12, %v3749_v4 }
 0x4c4   : > { %v3370_v53 = vadd.f32 %v3354_v11, %v3322_v14  ;;  %3462 = vst.msk [vmem:[#allocation6 + $0x50] sm:$0xff] %vm862_vm4, %v3446_v19  ;;  %3463 = vst.msk [vmem:[#allocation6 + $0x58] sm:$0xff] %vm862_vm4, %v3447_v2  ;;  %v3432_v36 = vsub.f32 1.0, %v4784_v60  ;;  %5324 = vmatprep.mubr.msk.f32.mxu1 %vm862_vm4, %v4784_v60  ;;  %v3433_v18 = vsub.f32 1.0, %v4785_v29  ;;  %v3855_v16 = vmul.f32 %v7229_v40, %v3834_v46  ;;  %v7257_v11 = vld [vmem:[%s7608_s12 + $0x8] ss:$0 sm:$0xff] }
 0x4c5   : > { %5325 = vmatmul.mubr.msk.f32.gmra.mrb[52].mxu1 %vm862_vm4, %v4785_v29  ;;  %vm3387_vm2 = vcmp.ge.f32.partialorder %v3371_v41, 0.5  ;;  %v3757_v56 = vmul.f32 %v7212_v59, %v3736_v39  ;;  %v7262_v19 = vld [vmem:[%s7608_s12 + $0x9] ss:$0 sm:$0xff] }
 0x4c6   : > { %v3448_v33 = vmul.f32 %v3432_v36, %v3368_v28  ;;  %v3449_v25 = vmul.f32 %v3433_v18, %v3369_v27  ;;  %vm3386_vm3 = vcmp.ge.f32.partialorder %v3370_v53, 0.5  ;;  %v4787_v51 = vsel %vm3387_vm2, 1.0, %v5619_v43  ;;  %v3842_v28 = vld [vmem:[#allocation8 + $0xa2] sm:$0xff] }
 0x4c7   : > { %v4786_v1 = vsel %vm3386_vm3, 1.0, %v5619_v43  ;;  %v3435_v38 = vsub.f32 1.0, %v4787_v51  ;;  %v4208_v43 = vld [vmem:[%s7609_s13] sm:$0xff]  ;;  %v3810_v27 = vmul.f32 %v7217_v13, %v3789_v24  ;;  %v3871_v6 = vadd.f32 %v3855_v16, %v3818_v8 }
 0x4c8   : > { %3464 = vst.msk [vmem:[#allocation6 + $0x60] sm:$0xff] %vm862_vm4, %v3448_v33  ;;  %3465 = vst.msk [vmem:[#allocation6 + $0x68] sm:$0xff] %vm862_vm4, %v3449_v25  ;;  %v3434_v50 = vsub.f32 1.0, %v4786_v1  ;;  %5327 = vmatprep.mubr.msk.f32.mxu1 %vm862_vm4, %v4786_v1  ;;  %v5498_v17 = vpack.c.bf16 %v4209_v0, %v4208_v43  ;;  %v7267_v36 = vmul.f32 %v7257_v11, %v4055_v22  ;;  %v7287_v43 = vld [vmem:[%s7608_s12 + $0xa] ss:$0 sm:$0xff] }
 0x4c9   : > { %v3451_v5 = vmul.f32 %v3435_v38, %v3371_v41  ;;  %5328 = vmatmul.mubr.msk.f32.gmra.mrb[54].mxu1 %vm862_vm4, %v4787_v51  ;;  %v7272_v51 = vadd.f32 %v3810_v27, %v3757_v56  ;;  %v7275_v1 = vmul.f32 %v7229_v40, %v3842_v28 }
 0x4ca   : > { %v3450_v62 = vmul.f32 %v3434_v50, %v3370_v53  ;;  %5499 = vmatprep.subr.bf16.mxu0 %v5498_v17  ;;  %5506 = vmatprep.subr.bf16.mxu1 %v5498_v17  ;;  %v7281_v50 = vld [vmem:[%s7608_s12 + $0x6] ss:$0 sm:$0xff] }
 0x4cb   : > { %3467 = vst.msk [vmem:[#allocation6 + $0x78] sm:$0xff] %vm862_vm4, %v3451_v5  ;;  %5501 = vmatpush3.bf16.msra.mxu0 %v5498_v17  ;;  %5508 = vmatpush3.bf16.msra.mxu1 %v5498_v17 }
 0x4cc   : > { %3466 = vst.msk [vmem:[#allocation6 + $0x70] sm:$0xff] %vm862_vm4, %v3450_v62  ;;  %5503 = vmatprep.subr.bf16.mxu0 %v5502_v31  ;;  %5507 = vmatprep.subr.bf16.mxu1 %v5502_v31 }
 0x4cf   : > { %5505 = vmatpush3.bf16.msra.mxu0 %v5502_v31  ;;  %5509 = vmatpush3.bf16.msra.mxu1 %v5502_v31 }
 0x56e   : > { %v5308_v20 = vpop.f32.mrb[40].mxu1 }
 0x56f   : > { %v3673_v3 = vmul.f32 %v5308_v20, %v7201_v58  ;;  %v3586_v23 = vpop.f32.mrb[41].mxu1 }
 0x570   : > { %v3672_v49 = vmul.f32 %v7201_v58, %v3586_v23 }
 0x571   : > { %v3696_v42 = vadd.f32 %v7206_v34, %v3673_v3 }
 0x572   : > { %v3695_v48 = vadd.f32 %v7206_v34, %v3672_v49  ;;  %v5311_v55 = vpop.f32.mrb[42].mxu1 }
 0x573   : > { %3713 = vst.msk [vmem:[#allocation8 + $0x21] sm:$0xff] %vm862_vm4, %v3696_v42  ;;  %v3675_v54 = vmul.f32 %v5311_v55, %v7201_v58  ;;  %v3596_v26 = vpop.f32.mrb[43].mxu1 }
 0x574   : > { %3712 = vst.msk [vmem:[#allocation8 + $0x11] sm:$0xff] %vm862_vm4, %v3695_v48  ;;  %v3674_v37 = vmul.f32 %v7201_v58, %v3596_v26 }
 0x575   : > { %v3698_v35 = vadd.f32 %v7206_v34, %v3675_v54 }
 0x576   : > { %v3697_v45 = vadd.f32 %v7206_v34, %v3674_v37  ;;  %v5314_v52 = vpop.f32.mrb[44].mxu1 }
 0x577   : > { %3715 = vst.msk [vmem:[#allocation8 + $0x41] sm:$0xff] %vm862_vm4, %v3698_v35  ;;  %v3677_v14 = vmul.f32 %v5314_v52, %v7201_v58  ;;  %v3606_v57 = vpop.f32.mrb[45].mxu1 }
 0x578   : > { %3714 = vst.msk [vmem:[#allocation8 + $0x31] sm:$0xff] %vm862_vm4, %v3697_v45  ;;  %v3676_v61 = vmul.f32 %v7201_v58, %v3606_v57 }
 0x579   : > { %v3700_v10 = vadd.f32 %v7206_v34, %v3677_v14 }
 0x57a   : > { %v3699_v44 = vadd.f32 %v7206_v34, %v3676_v61  ;;  %v5317_v63 = vpop.f32.mrb[46].mxu1  ;;  %v4048_v15 = vld [vmem:[#allocation8 + $0x20] sm:$0xff] }
 0x57b   : > { %3717 = vst.msk [vmem:[#allocation8 + $0x61] sm:$0xff] %vm862_vm4, %v3700_v10  ;;  %v3679_v2 = vmul.f32 %v5317_v63, %v7201_v58  ;;  %v3616_v41 = vpop.f32.mrb[47].mxu1  ;;  %v3887_v60 = vld [vmem:[#allocation8 + $0x10] sm:$0xff]  ;;  %v4102_v53 = vld [vmem:[#allocation8 + $0x21] sm:$0xff]  ;;  %v4070_v5 = vmul.f32 %v7257_v11, %v4048_v15  ;;  %v3751_v21 = vmul.f32 %v7212_v59, %v4048_v15  ;;  %v3910_v4 = vmul.f32 %v7246_v47, %v4048_v15 }
 0x57c   : > { %v3941_v29 = vld [vmem:[#allocation8 + $0x11] sm:$0xff]  ;;  %3716 = vst.msk [vmem:[#allocation8 + $0x51] sm:$0xff] %vm862_vm4, %v3699_v44  ;;  %v3678_v18 = vmul.f32 %v7201_v58, %v3616_v41  ;;  %v3909_v33 = vmul.f32 %v7246_v47, %v3887_v60  ;;  %v4155_v62 = vld [vmem:[#allocation8 + $0x22] sm:$0xff]  ;;  %v3750_v0 = vmul.f32 %v7212_v59, %v3887_v60  ;;  %v4123_v20 = vmul.f32 %v7262_v19, %v4102_v53 }
 0x57d   : > { %v3994_v25 = vld [vmem:[#allocation8 + $0x12] sm:$0xff]  ;;  %v3702_v38 = vadd.f32 %v7206_v34, %v3679_v2  ;;  %v3803_v17 = vmul.f32 %v7217_v13, %v3941_v29  ;;  %v3962_v31 = vmul.f32 %v7251_v7, %v3941_v29  ;;  %v3804_v49 = vmul.f32 %v7217_v13, %v4102_v53 }
 0x57e   : > { %v3701_v32 = vadd.f32 %v7206_v34, %v3678_v18  ;;  %v3925_v30 = vadd.f32 %v3909_v33, %v3871_v6  ;;  %v3856_v3 = vmul.f32 %v7229_v40, %v3994_v25  ;;  %v4015_v48 = vmul.f32 %v7281_v50, %v3994_v25  ;;  %v4050_v8 = vld [vmem:[#allocation8 + $0x40] sm:$0xff] }
 0x57f   : > { %3719 = vst.msk [vmem:[#allocation8 + $0x81] sm:$0xff] %vm862_vm4, %v3702_v38  ;;  %v3819_v9 = vadd.f32 %v3803_v17, %v3750_v0  ;;  %v4049_v23 = vld [vmem:[#allocation8 + $0x30] sm:$0xff]  ;;  %v4176_v55 = vmul.f32 %v7287_v43, %v4155_v62  ;;  %v3820_v46 = vadd.f32 %v3804_v49, %v3751_v21  ;;  %v3857_v37 = vmul.f32 %v7229_v40, %v4155_v62  ;;  %v4104_v22 = vld [vmem:[#allocation8 + $0x41] sm:$0xff] }
 0x580   : > { %3718 = vst.msk [vmem:[#allocation8 + $0x71] sm:$0xff] %vm862_vm4, %v3701_v32  ;;  %v3978_v42 = vadd.f32 %v3962_v31, %v3925_v30  ;;  %v4103_v12 = vld [vmem:[#allocation8 + $0x31] sm:$0xff]  ;;  %v3911_v35 = vmul.f32 %v7246_v47, %v4049_v23  ;;  %v3963_v24 = vmul.f32 %v7251_v7, %v4102_v53  ;;  %v4016_v45 = vmul.f32 %v7281_v50, %v4155_v62  ;;  %v4157_v10 = vld [vmem:[#allocation8 + $0x42] sm:$0xff] }
 0x581   : > { %v4156_v54 = vld [vmem:[#allocation8 + $0x32] sm:$0xff]  ;;  %v3872_v26 = vadd.f32 %v3856_v3, %v3819_v9  ;;  %v4071_v52 = vmul.f32 %v7257_v11, %v4049_v23  ;;  %v4124_v14 = vmul.f32 %v7262_v19, %v4103_v12  ;;  %v3873_v61 = vadd.f32 %v3857_v37, %v3820_v46 }
 0x582   : > { %v4031_v39 = vadd.f32 %v4015_v48, %v3978_v42  ;;  %v4177_v57 = vmul.f32 %v7287_v43, %v4156_v54  ;;  %v3964_v27 = vmul.f32 %v7251_v7, %v4103_v12  ;;  %v3752_v28 = vmul.f32 %v7212_v59, %v4049_v23 }
 0x583   : > { %v3926_v16 = vadd.f32 %v3910_v4, %v3872_v26  ;;  %v3805_v44 = vmul.f32 %v7217_v13, %v4103_v12  ;;  %v3927_v6 = vadd.f32 %v3911_v35, %v3873_v61  ;;  %v4017_v15 = vmul.f32 %v7281_v50, %v4156_v54  ;;  %v4105_v17 = vld [vmem:[#allocation8 + $0x51] sm:$0xff]  ;;  %v4052_v26 = vld [vmem:[#allocation8 + $0x60] sm:$0xff] }
 0x584   : > { %v4086_v56 = vadd.f32 %v4070_v5, %v4031_v39  ;;  %v4072_v2 = vmul.f32 %v7257_v11, %v4050_v8  ;;  %v4125_v60 = vmul.f32 %v7262_v19, %v4104_v22  ;;  %v3858_v53 = vmul.f32 %v7229_v40, %v4156_v54  ;;  %v4051_v5 = vld [vmem:[#allocation8 + $0x50] sm:$0xff]  ;;  %v4106_v39 = vld [vmem:[#allocation8 + $0x61] sm:$0xff] }
 0x585   : > { %v3979_v63 = vadd.f32 %v3963_v24, %v3926_v16  ;;  %v3821_v29 = vadd.f32 %v3805_v44, %v3752_v28  ;;  %v3980_v33 = vadd.f32 %v3964_v27, %v3927_v6  ;;  %v4178_v25 = vmul.f32 %v7287_v43, %v4157_v10  ;;  %v4158_v23 = vld [vmem:[#allocation8 + $0x52] sm:$0xff]  ;;  %v4159_v28 = vld [vmem:[#allocation8 + $0x62] sm:$0xff] }
 0x586   : > { %v4139_v41 = vadd.f32 %v4123_v20, %v4086_v56  ;;  %v3912_v38 = vmul.f32 %v7246_v47, %v4050_v8  ;;  %v3753_v32 = vmul.f32 %v7212_v59, %v4050_v8  ;;  %v3806_v30 = vmul.f32 %v7217_v13, %v4104_v22 }
 0x587   : > { %v4032_v18 = vadd.f32 %v4016_v45, %v3979_v63  ;;  %v3874_v0 = vadd.f32 %v3858_v53, %v3821_v29  ;;  %v4033_v20 = vadd.f32 %v4017_v15, %v3980_v33  ;;  %v3965_v9 = vmul.f32 %v7251_v7, %v4104_v22 }
 0x588   : > { %v4192_v62 = vadd.f32 %v4176_v55, %v4139_v41  ;;  %v4018_v3 = vmul.f32 %v7281_v50, %v4157_v10  ;;  %v3822_v49 = vadd.f32 %v3806_v30, %v3753_v32  ;;  %v3859_v42 = vmul.f32 %v7229_v40, %v4157_v10  ;;  %v4107_v30 = vld [vmem:[#allocation8 + $0x71] sm:$0xff] }
 0x589   : > { %v4087_v31 = vadd.f32 %v4071_v52, %v4032_v18  ;;  %v3928_v21 = vadd.f32 %v3912_v38, %v3874_v0  ;;  %v3913_v48 = vmul.f32 %v7246_v47, %v4051_v5  ;;  %v4088_v4 = vadd.f32 %v4072_v2, %v4033_v20 }
 0x58a   : > { %5338 = vmatprep.mubr.msk.f32.mxu0 %vm862_vm4, %v4192_v62  ;;  %v4073_v12 = vmul.f32 %v7257_v11, %v4051_v5  ;;  %v4126_v54 = vmul.f32 %v7262_v19, %v4105_v17  ;;  %v4179_v37 = vmul.f32 %v7287_v43, %v4158_v23  ;;  %v3875_v35 = vadd.f32 %v3859_v42, %v3822_v49 }
 0x58b   : > { %v4140_v55 = vadd.f32 %v4124_v14, %v4087_v31  ;;  %v3981_v46 = vadd.f32 %v3965_v9, %v3928_v21  ;;  %v3754_v24 = vmul.f32 %v7212_v59, %v4051_v5  ;;  %v4141_v52 = vadd.f32 %v4125_v60, %v4088_v4  ;;  %v4053_v60 = vld [vmem:[#allocation8 + $0x70] sm:$0xff] }
 0x58c   : > { %v3966_v8 = vmul.f32 %v7251_v7, %v4105_v17  ;;  %v3807_v16 = vmul.f32 %v7217_v13, %v4105_v17  ;;  %v3929_v61 = vadd.f32 %v3913_v48, %v3875_v35  ;;  %v4019_v22 = vmul.f32 %v7281_v50, %v4158_v23  ;;  %v4160_v35 = vld [vmem:[#allocation8 + $0x72] sm:$0xff] }
 0x58d   : > { %v4193_v45 = vadd.f32 %v4177_v57, %v4140_v55  ;;  %v4034_v14 = vadd.f32 %v4018_v3, %v3981_v46  ;;  %v4074_v56 = vmul.f32 %v7257_v11, %v4052_v26  ;;  %v4194_v27 = vadd.f32 %v4178_v25, %v4141_v52 }
 0x58e   : > { %v4127_v10 = vmul.f32 %v7262_v19, %v4106_v39  ;;  %v3823_v44 = vadd.f32 %v3807_v16, %v3754_v24  ;;  %v3860_v57 = vmul.f32 %v7229_v40, %v4158_v23  ;;  %v3982_v15 = vadd.f32 %v3966_v8, %v3929_v61  ;;  %v4054_v61 = vld [vmem:[#allocation8 + $0x80] sm:$0xff] }
 0x58f   : > { %5339 = vmatmul.mubr.msk.f32.vlgmr.msra.gmra.mrb[48].mxu0 %vm862_vm4, %v4193_v45  ;;  %v4089_v6 = vadd.f32 %v4073_v12, %v4034_v14  ;;  %v3914_v2 = vmul.f32 %v7246_v47, %v4052_v26  ;;  %v3967_v41 = vmul.f32 %v7251_v7, %v4106_v39  ;;  %v3755_v33 = vmul.f32 %v7212_v59, %v4052_v26 }
 0x590   : > { %v5320_v63 = vpop.f32.mrb[48].mxu1  ;;  %5341 = vmatprep.mubr.msk.f32.mxu0 %vm862_vm4, %v4194_v27  ;;  %v3876_v18 = vadd.f32 %v3860_v57, %v3823_v44  ;;  %v3808_v25 = vmul.f32 %v7217_v13, %v4106_v39  ;;  %v4035_v62 = vadd.f32 %v4019_v22, %v3982_v15  ;;  %v3861_v0 = vmul.f32 %v7229_v40, %v4159_v28  ;;  %v4108_v15 = vld [vmem:[#allocation8 + $0x81] sm:$0xff] }
 0x591   : > { %v3681_v29 = vmul.f32 %v5320_v63, %v7201_v58  ;;  %v3626_v53 = vpop.f32.mrb[49].mxu1  ;;  %v4142_v5 = vadd.f32 %v4126_v54, %v4089_v6  ;;  %v3915_v20 = vmul.f32 %v7246_v47, %v4053_v60  ;;  %v4180_v49 = vmul.f32 %v7287_v43, %v4159_v28 }
 0x592   : > { %v3680_v38 = vmul.f32 %v7201_v58, %v3626_v53  ;;  %v3930_v32 = vadd.f32 %v3914_v2, %v3876_v18  ;;  %v3824_v31 = vadd.f32 %v3808_v25, %v3755_v33  ;;  %v4090_v21 = vadd.f32 %v4074_v56, %v4035_v62 }
 0x593   : > { %v3704_v17 = vadd.f32 %v7206_v34, %v3681_v29  ;;  %v4195_v23 = vadd.f32 %v4179_v37, %v4142_v5  ;;  %v4020_v4 = vmul.f32 %v7281_v50, %v4159_v28  ;;  %v4075_v46 = vmul.f32 %v7257_v11, %v4053_v60 }
 0x594   : > { %v3703_v9 = vadd.f32 %v7206_v34, %v3680_v38  ;;  %v5323_v3 = vpop.f32.mrb[50].mxu1  ;;  %v3983_v55 = vadd.f32 %v3967_v41, %v3930_v32  ;;  %v3877_v12 = vadd.f32 %v3861_v0, %v3824_v31  ;;  %v4143_v26 = vadd.f32 %v4127_v10, %v4090_v21  ;;  %v4161_v38 = vld [vmem:[#allocation8 + $0x82] sm:$0xff] }
 0x595   : > { %3721 = vst.msk [vmem:[#allocation8 + $0xc1] sm:$0xff] %vm862_vm4, %v3704_v17  ;;  %v3683_v42 = vmul.f32 %v5323_v3, %v7201_v58  ;;  %v3636_v48 = vpop.f32.mrb[51].mxu1  ;;  %5342 = vmatmul.mubr.msk.f32.gmra.mrb[50].mxu0 %vm862_vm4, %v4195_v23  ;;  %v4128_v37 = vmul.f32 %v7262_v19, %v4107_v30  ;;  %v3968_v52 = vmul.f32 %v7251_v7, %v4107_v30 }
 0x596   : > { %3720 = vst.msk [vmem:[#allocation8 + $0xb1] sm:$0xff] %vm862_vm4, %v3703_v9  ;;  %v3682_v54 = vmul.f32 %v7201_v58, %v3636_v48  ;;  %v4036_v24 = vadd.f32 %v4020_v4, %v3983_v55  ;;  %v3931_v45 = vadd.f32 %v3915_v20, %v3877_v12  ;;  %v4196_v14 = vadd.f32 %v4180_v49, %v4143_v26  ;;  %v4109_v4 = vld [vmem:[#allocation8 + $0x91] sm:$0xff] }
 0x597   : > { %v3706_v39 = vadd.f32 %v7206_v34, %v3683_v42  ;;  %v3756_v22 = vmul.f32 %v7212_v59, %v4053_v60  ;;  %v3809_v56 = vmul.f32 %v7217_v13, %v4107_v30  ;;  %v4021_v57 = vmul.f32 %v7281_v50, %v4160_v35 }
 0x598   : > { %v3705_v8 = vadd.f32 %v7206_v34, %v3682_v54  ;;  %v5326_v16 = vpop.f32.mrb[52].mxu1  ;;  %v4091_v28 = vadd.f32 %v4075_v46, %v4036_v24  ;;  %v3984_v44 = vadd.f32 %v3968_v52, %v3931_v45  ;;  %5344 = vmatprep.mubr.msk.f32.mxu0 %vm862_vm4, %v4196_v14  ;;  %v4181_v6 = vmul.f32 %v7287_v43, %v4160_v35 }
 0x599   : > { %3723 = vst.msk [vmem:[#allocation8 + $0xe1] sm:$0xff] %vm862_vm4, %v3706_v39  ;;  %v3685_v27 = vmul.f32 %v5326_v16, %v7201_v58  ;;  %v3646_v10 = vpop.f32.mrb[53].mxu1  ;;  %v3825_v2 = vadd.f32 %v3809_v56, %v3756_v22  ;;  %v3862_v41 = vmul.f32 %v7229_v40, %v4160_v35  ;;  %v4076_v18 = vmul.f32 %v7257_v11, %v4054_v61 }
 0x59a   : > { %3722 = vst.msk [vmem:[#allocation8 + $0xd1] sm:$0xff] %vm862_vm4, %v3705_v8  ;;  %v3684_v63 = vmul.f32 %v7201_v58, %v3646_v10  ;;  %v4144_v29 = vadd.f32 %v4128_v37, %v4091_v28  ;;  %v4037_v53 = vadd.f32 %v4021_v57, %v3984_v44  ;;  %v3916_v62 = vmul.f32 %v7246_v47, %v4054_v61 }
 0x59b   : > { %v3708_v60 = vadd.f32 %v7206_v34, %v3685_v27  ;;  %v3878_v5 = vadd.f32 %v3862_v41, %v3825_v2  ;;  %v3879_v0 = vadd.f32 %v7275_v1, %v7272_v51  ;;  %v4129_v20 = vmul.f32 %v7262_v19, %v4108_v15 }
 0x59c   : > { %v3707_v33 = vadd.f32 %v7206_v34, %v3684_v63  ;;  %v5329_v25 = vpop.f32.mrb[54].mxu1  ;;  %v4197_v30 = vadd.f32 %v4181_v6, %v4144_v29  ;;  %v4092_v31 = vadd.f32 %v4076_v18, %v4037_v53  ;;  %v3969_v49 = vmul.f32 %v7251_v7, %v4108_v15  ;;  %v4056_v39 = vld [vmem:[#allocation8 + $0xc0] sm:$0xff] }
 0x59d   : > { %3725 = vst.msk [vmem:[#allocation8 + $0x101] sm:$0xff] %vm862_vm4, %v3708_v60  ;;  %v3687_v17 = vmul.f32 %v5329_v25, %v7201_v58  ;;  %v3656_v32 = vpop.f32.mrb[55].mxu1  ;;  %v3895_v9 = vld [vmem:[#allocation8 + $0xb0] sm:$0xff]  ;;  %v3932_v21 = vadd.f32 %v3916_v62, %v3878_v5  ;;  %v4182_v48 = vmul.f32 %v7287_v43, %v4161_v38  ;;  %v4022_v55 = vmul.f32 %v7281_v50, %v4161_v38  ;;  %v4110_v14 = vld [vmem:[#allocation8 + $0xc1] sm:$0xff] }
 0x59e   : > { %v3949_v3 = vld [vmem:[#allocation8 + $0xb1] sm:$0xff]  ;;  %3724 = vst.msk [vmem:[#allocation8 + $0xf1] sm:$0xff] %vm862_vm4, %v3707_v33  ;;  %v3686_v23 = vmul.f32 %v7201_v58, %v3656_v32  ;;  %v3917_v51 = vmul.f32 %v7246_v47, %v3895_v9  ;;  %5345 = vmatmul.mubr.msk.f32.gmra.mrb[52].mxu0 %vm862_vm4, %v4197_v30  ;;  %v4145_v42 = vadd.f32 %v4129_v20, %v4092_v31  ;;  %v4163_v44 = vld [vmem:[#allocation8 + $0xc2] sm:$0xff] }
 0x59f   : > { %v3710_v1 = vadd.f32 %v7206_v34, %v3687_v17  ;;  %v4002_v12 = vld [vmem:[#allocation8 + $0xb2] sm:$0xff]  ;;  %v3985_v26 = vadd.f32 %v3969_v49, %v3932_v21  ;;  %v3970_v37 = vmul.f32 %v7251_v7, %v3949_v3  ;;  %v3758_v24 = vmul.f32 %v7212_v59, %v3895_v9 }
 0x5a0   : > { %v3709_v54 = vadd.f32 %v7206_v34, %v3686_v23  ;;  %v4162_v58 = vld [vmem:[#allocation8 + $0x92] sm:$0xff]  ;;  %v3933_v46 = vadd.f32 %v3917_v51, %v3879_v0  ;;  %v4198_v35 = vadd.f32 %v4182_v48, %v4145_v42  ;;  %v3811_v45 = vmul.f32 %v7217_v13, %v3949_v3  ;;  %v4058_v9 = vld [vmem:[#allocation8 + $0xe0] sm:$0xff] }
 0x5a1   : > { %3727 = vst.msk [vmem:[#allocation8 + $0x121] sm:$0xff] %vm862_vm4, %v3710_v1  ;;  %v4038_v52 = vadd.f32 %v4022_v55, %v3985_v26  ;;  %v4130_v8 = vmul.f32 %v7262_v19, %v4109_v4  ;;  %v4023_v34 = vmul.f32 %v7281_v50, %v4002_v12  ;;  %v4183_v61 = vmul.f32 %v7287_v43, %v4162_v58  ;;  %v4057_v57 = vld [vmem:[#allocation8 + $0xd0] sm:$0xff]  ;;  %v4112_v3 = vld [vmem:[#allocation8 + $0xe1] sm:$0xff] }
 0x5a2   : > { %3726 = vst.msk [vmem:[#allocation8 + $0x111] sm:$0xff] %vm862_vm4, %v3709_v54  ;;  %v3986_v16 = vadd.f32 %v3970_v37, %v3933_v46  ;;  %5347 = vmatprep.mubr.msk.f32.mxu0 %vm862_vm4, %v4198_v35  ;;  %v3827_v22 = vadd.f32 %v3811_v45, %v3758_v24  ;;  %v3864_v56 = vmul.f32 %v7229_v40, %v4002_v12  ;;  %v4111_v18 = vld [vmem:[#allocation8 + $0xd1] sm:$0xff]  ;;  %v4165_v55 = vld [vmem:[#allocation8 + $0xe2] sm:$0xff] }
 0x5a3   : > { %v4093_v27 = vadd.f32 %v7267_v36, %v4038_v52  ;;  %v4078_v28 = vmul.f32 %v7257_v11, %v4056_v39  ;;  %v3759_v63 = vmul.f32 %v7212_v59, %v4056_v39  ;;  %v3918_v15 = vmul.f32 %v7246_v47, %v4056_v39  ;;  %v4164_v17 = vld [vmem:[#allocation8 + $0xd2] sm:$0xff] }
 0x5a4   : > { %v4039_v10 = vadd.f32 %v4023_v34, %v3986_v16  ;;  %v3880_v6 = vadd.f32 %v3864_v56, %v3827_v22  ;;  %v3812_v2 = vmul.f32 %v7217_v13, %v4110_v14  ;;  %v4131_v29 = vmul.f32 %v7262_v19, %v4110_v14 }
 0x5a5   : > { %v4146_v41 = vadd.f32 %v4130_v8, %v4093_v27  ;;  %v3971_v53 = vmul.f32 %v7251_v7, %v4110_v14  ;;  %v3865_v25 = vmul.f32 %v7229_v40, %v4163_v44  ;;  %v3919_v38 = vmul.f32 %v7246_v47, %v4057_v57  ;;  %v4059_v54 = vld [vmem:[#allocation8 + $0xf0] sm:$0xff] }
 0x5a6   : > { %v4094_v60 = vadd.f32 %v4078_v28, %v4039_v10  ;;  %v3934_v36 = vadd.f32 %v3918_v15, %v3880_v6  ;;  %v3828_v33 = vadd.f32 %v3812_v2, %v3759_v63  ;;  %v4184_v0 = vmul.f32 %v7287_v43, %v4163_v44  ;;  %v4113_v8 = vld [vmem:[#allocation8 + $0xf1] sm:$0xff] }
 0x5a7   : > { %v4199_v5 = vadd.f32 %v4183_v61, %v4146_v41  ;;  %v3760_v32 = vmul.f32 %v7212_v59, %v4057_v57  ;;  %v4024_v31 = vmul.f32 %v7281_v50, %v4163_v44  ;;  %v3813_v23 = vmul.f32 %v7217_v13, %v4111_v18  ;;  %v4166_v44 = vld [vmem:[#allocation8 + $0xf2] sm:$0xff]  ;;  %v4060_v41 = vld [vmem:[#allocation8 + $0x100] sm:$0xff] }
 0x5a8   : > { %v4147_v62 = vadd.f32 %v4131_v29, %v4094_v60  ;;  %v3987_v30 = vadd.f32 %v3971_v53, %v3934_v36  ;;  %v3881_v20 = vadd.f32 %v3865_v25, %v3828_v33  ;;  %v4079_v49 = vmul.f32 %v7257_v11, %v4057_v57 }
 0x5a9   : > { %5348 = vmatmul.mubr.msk.f32.gmra.mrb[54].mxu0 %vm862_vm4, %v4199_v5  ;;  %v4132_v51 = vmul.f32 %v7262_v19, %v4111_v18  ;;  %v3972_v1 = vmul.f32 %v7251_v7, %v4111_v18  ;;  %v3829_v4 = vadd.f32 %v3813_v23, %v3760_v32  ;;  %v3866_v12 = vmul.f32 %v7229_v40, %v4164_v17  ;;  %v4061_v23 = vld [vmem:[#allocation8 + $0x110] sm:$0xff] }
 0x5aa   : > { %v4200_v21 = vadd.f32 %v4184_v0, %v4147_v62  ;;  %v4040_v42 = vadd.f32 %v4024_v31, %v3987_v30  ;;  %v3935_v48 = vadd.f32 %v3919_v38, %v3881_v20  ;;  %v4185_v26 = vmul.f32 %v7287_v43, %v4164_v17  ;;  %v4114_v38 = vld [vmem:[#allocation8 + $0x101] sm:$0xff] }
 0x5ab   : > { %v4025_v58 = vmul.f32 %v7281_v50, %v4164_v17  ;;  %v3761_v46 = vmul.f32 %v7212_v59, %v4058_v9  ;;  %v3814_v37 = vmul.f32 %v7217_v13, %v4112_v3  ;;  %v3882_v24 = vadd.f32 %v3866_v12, %v3829_v4 }
 0x5ac   : > { %5350 = vmatprep.mubr.msk.f32.mxu0 %vm862_vm4, %v4200_v21  ;;  %v4095_v35 = vadd.f32 %v4079_v49, %v4040_v42  ;;  %v3988_v39 = vadd.f32 %v3972_v1, %v3935_v48  ;;  %v3920_v45 = vmul.f32 %v7246_v47, %v4058_v9  ;;  %v4080_v52 = vmul.f32 %v7257_v11, %v4058_v9  ;;  %v4167_v9 = vld [vmem:[#allocation8 + $0x102] sm:$0xff] }
 0x5ad   : > { %v3830_v16 = vadd.f32 %v3814_v37, %v3761_v46  ;;  %v3867_v34 = vmul.f32 %v7229_v40, %v4165_v55  ;;  %v3921_v14 = vmul.f32 %v7246_v47, %v4059_v54  ;;  %v3973_v27 = vmul.f32 %v7251_v7, %v4112_v3 }
 0x5ae   : > { %v4148_v61 = vadd.f32 %v4132_v51, %v4095_v35  ;;  %v4041_v22 = vadd.f32 %v4025_v58, %v3988_v39  ;;  %v3936_v56 = vadd.f32 %v3920_v45, %v3882_v24  ;;  %v4133_v10 = vmul.f32 %v7262_v19, %v4112_v3  ;;  %v4168_v45 = vld [vmem:[#allocation8 + $0x112] sm:$0xff] }
 0x5af   : > { %v4026_v28 = vmul.f32 %v7281_v50, %v4165_v55  ;;  %v3883_v57 = vadd.f32 %v3867_v34, %v3830_v16  ;;  %v3762_v63 = vmul.f32 %v7212_v59, %v4059_v54  ;;  %v3815_v60 = vmul.f32 %v7217_v13, %v4113_v8 }
 0x5b0   : > { %v4201_v6 = vadd.f32 %v4185_v26, %v4148_v61  ;;  %v4096_v15 = vadd.f32 %v4080_v52, %v4041_v22  ;;  %v3989_v2 = vadd.f32 %v3973_v27, %v3936_v56  ;;  %v4186_v29 = vmul.f32 %v7287_v43, %v4165_v55  ;;  %v4062_v27 = vld [vmem:[#allocation8 + $0x120] sm:$0xff] }
 0x5b1   : > { %v4081_v53 = vmul.f32 %v7257_v11, %v4059_v54  ;;  %v3937_v18 = vadd.f32 %v3921_v14, %v3883_v57  ;;  %v3974_v36 = vmul.f32 %v7251_v7, %v4113_v8  ;;  %v3831_v5 = vadd.f32 %v3815_v60, %v3762_v63  ;;  %v4115_v54 = vld [vmem:[#allocation8 + $0x111] sm:$0xff] }
 0x5b2   : > { %5351 = vmatmul.mubr.msk.f32.gmra.mrb[56].mxu0 %vm862_vm4, %v4201_v6  ;;  %v4149_v33 = vadd.f32 %v4133_v10, %v4096_v15  ;;  %v4042_v25 = vadd.f32 %v4026_v28, %v3989_v2  ;;  %v3868_v62 = vmul.f32 %v7229_v40, %v4166_v44  ;;  %v4134_v0 = vmul.f32 %v7262_v19, %v4113_v8  ;;  %v4116_v6 = vld [vmem:[#allocation8 + $0x121] sm:$0xff]  ;;  %v4063_v60 = vld [vmem:[#allocation8 + $0x130] sm:$0xff] }
 0x5b3   : > { %v3990_v17 = vadd.f32 %v3974_v36, %v3937_v18  ;;  %v4027_v32 = vmul.f32 %v7281_v50, %v4166_v44  ;;  %v3922_v30 = vmul.f32 %v7246_v47, %v4060_v41  ;;  %v3763_v21 = vmul.f32 %v7212_v59, %v4060_v41  ;;  %v4169_v18 = vld [vmem:[#allocation8 + $0x122] sm:$0xff] }
 0x5b4   : > { %v4202_v31 = vadd.f32 %v4186_v29, %v4149_v33  ;;  %v4097_v20 = vadd.f32 %v4081_v53, %v4042_v25  ;;  %v3884_v3 = vadd.f32 %v3868_v62, %v3831_v5  ;;  %v4187_v49 = vmul.f32 %v7287_v43, %v4166_v44  ;;  %v4117_v62 = vld [vmem:[#allocation8 + $0x131] sm:$0xff] }
 0x5b5   : > { %v4043_v51 = vadd.f32 %v4027_v32, %v3990_v17  ;;  %v4082_v1 = vmul.f32 %v7257_v11, %v4060_v41  ;;  %v3816_v42 = vmul.f32 %v7217_v13, %v4114_v38  ;;  %v4135_v55 = vmul.f32 %v7262_v19, %v4114_v38 }
 0x5b6   : > { %5353 = vmatprep.mubr.msk.f32.mxu0 %vm862_vm4, %v4202_v31  ;;  %v4150_v48 = vadd.f32 %v4134_v0, %v4097_v20  ;;  %v3938_v4 = vadd.f32 %v3922_v30, %v3884_v3  ;;  %v3975_v12 = vmul.f32 %v7251_v7, %v4114_v38  ;;  %v3869_v46 = vmul.f32 %v7229_v40, %v4167_v9  ;;  %v4170_v30 = vld [vmem:[#allocation8 + $0x132] sm:$0xff] }
 0x5b7   : > { %v4098_v26 = vadd.f32 %v4082_v1, %v4043_v51  ;;  %v3832_v58 = vadd.f32 %v3816_v42, %v3763_v21  ;;  %v3923_v37 = vmul.f32 %v7246_v47, %v4061_v23  ;;  %v4028_v24 = vmul.f32 %v7281_v50, %v4167_v9 }
 0x5b8   : > { %v4203_v35 = vadd.f32 %v4187_v49, %v4150_v48  ;;  %v3991_v39 = vadd.f32 %v3975_v12, %v3938_v4  ;;  %v3764_v52 = vmul.f32 %v7212_v59, %v4061_v23  ;;  %v4188_v16 = vmul.f32 %v7287_v43, %v4167_v9 }
 0x5b9   : > { %v4151_v8 = vadd.f32 %v4135_v55, %v4098_v26  ;;  %v3885_v34 = vadd.f32 %v3869_v46, %v3832_v58  ;;  %v3817_v14 = vmul.f32 %v7217_v13, %v4115_v54  ;;  %v4083_v22 = vmul.f32 %v7257_v11, %v4061_v23 }
 0x5ba   : > { %5354 = vmatmul.mubr.msk.f32.gmra.mrb[58].mxu0 %vm862_vm4, %v4203_v35  ;;  %v4044_v61 = vadd.f32 %v4028_v24, %v3991_v39  ;;  %v3976_v56 = vmul.f32 %v7251_v7, %v4115_v54  ;;  %v3870_v57 = vmul.f32 %v7229_v40, %v4168_v45  ;;  %v4136_v63 = vmul.f32 %v7262_v19, %v4115_v54 }
 0x5bb   : > { %v4204_v10 = vadd.f32 %v4188_v16, %v4151_v8  ;;  %v3939_v28 = vadd.f32 %v3923_v37, %v3885_v34  ;;  %v3833_v44 = vadd.f32 %v3817_v14, %v3764_v52  ;;  %v4029_v15 = vmul.f32 %v7281_v50, %v4168_v45 }
 0x5bc   : > { %v4099_v59 = vadd.f32 %v4083_v22, %v4044_v61  ;;  %v3924_v41 = vmul.f32 %v7246_v47, %v4062_v27  ;;  %v4189_v53 = vmul.f32 %v7287_v43, %v4168_v45  ;;  %v4084_v40 = vmul.f32 %v7257_v11, %v4062_v27 }
 0x5bd   : > { %5356 = vmatprep.mubr.msk.f32.mxu0 %vm862_vm4, %v4204_v10  ;;  %v3992_v13 = vadd.f32 %v3976_v56, %v3939_v28  ;;  %v3886_v2 = vadd.f32 %v3870_v57, %v3833_v44  ;;  %v3977_v25 = vmul.f32 %v7251_v7, %v4116_v6  ;;  %v4085_v5 = vmul.f32 %v7257_v11, %v4063_v60 }
 0x5be   : > { %v4152_v29 = vadd.f32 %v4136_v63, %v4099_v59  ;;  %v4137_v17 = vmul.f32 %v7262_v19, %v4116_v6  ;;  %v4030_v47 = vmul.f32 %v7281_v50, %v4169_v18  ;;  %v4190_v20 = vmul.f32 %v7287_v43, %v4169_v18  ;;  %v7473_v50 = vld [vmem:[%s7610_s14] ss:$0 sm:$0xff] }
 0x5bf   : > { %v4045_v36 = vadd.f32 %v4029_v15, %v3992_v13  ;;  %v3940_v33 = vadd.f32 %v3924_v41, %v3886_v2  ;;  %v4138_v3 = vmul.f32 %v7262_v19, %v4117_v62  ;;  %v4191_v23 = vmul.f32 %v7287_v43, %v4170_v30  ;;  %v7478_v19 = vld [vmem:[%s7611_s15] ss:$0 sm:$0xff] }
 0x5c0   : > { %v4205_v38 = vadd.f32 %v4189_v53, %v4152_v29 }
 0x5c1   : > { %v4100_v0 = vadd.f32 %v4084_v40, %v4045_v36  ;;  %v3993_v32 = vadd.f32 %v3977_v25, %v3940_v33 }
 0x5c2   : > { %5357 = vmatmul.mubr.msk.f32.gmra.mrb[60].mxu0 %vm862_vm4, %v4205_v38 }
 0x5c3   : > { %v4153_v31 = vadd.f32 %v4137_v17, %v4100_v0  ;;  %v4046_v9 = vadd.f32 %v4030_v47, %v3993_v32 }
 0x5c5   : > { %v4206_v7 = vadd.f32 %v4190_v20, %v4153_v31  ;;  %v4101_v11 = vadd.f32 %v4085_v5, %v4046_v9 }
 0x5c7   : > { %5359 = vmatprep.mubr.msk.f32.mxu1 %vm862_vm4, %v4206_v7  ;;  %v4154_v21 = vadd.f32 %v4138_v3, %v4101_v11 }
 0x5c9   : > { %v4207_v49 = vadd.f32 %v4191_v23, %v4154_v21 }
 0x5cb   : > { %5360 = vmatmul.mubr.msk.f32.vlgmr.msra.gmra.mrb[56].mxu1 %vm862_vm4, %v4207_v49 }
 0x662   : > { %v5340_v51 = vpop.f32.mrb[48].mxu0 }
 0x663   : > { %v4413_v43 = vmul.f32 %v5340_v51, %v7473_v50  ;;  %v4326_v1 = vpop.f32.mrb[49].mxu0 }
 0x664   : > { %v4412_v42 = vmul.f32 %v7473_v50, %v4326_v1 }
 0x665   : > { %v4436_v48 = vadd.f32 %v7478_v19, %v4413_v43 }
 0x666   : > { %v4435_v55 = vadd.f32 %v7478_v19, %v4412_v42 }
 0x667   : > { %4452 = vst.msk [vmem:[%s5767_s27 + $0x8] sm:$0xff] %vm862_vm4, %v4436_v48 }
 0x668   : > { %4451 = vst.msk [vmem:[%s5767_s27] sm:$0xff] %vm862_vm4, %v4435_v55  ;;  %v5343_v4 = vpop.f32.mrb[50].mxu0 }
 0x669   : > { %v4415_v12 = vmul.f32 %v5343_v4, %v7473_v50  ;;  %v4336_v54 = vpop.f32.mrb[51].mxu0 }
 0x66a   : > { %v4414_v26 = vmul.f32 %v7473_v50, %v4336_v54 }
 0x66b   : > { %v4438_v58 = vadd.f32 %v7478_v19, %v4415_v12 }
 0x66c   : > { %v4437_v46 = vadd.f32 %v7478_v19, %v4414_v26 }
 0x66d   : > { %4454 = vst.msk [vmem:[%s5767_s27 + $0x18] sm:$0xff] %vm862_vm4, %v4438_v58 }
 0x66e   : > { %4453 = vst.msk [vmem:[%s5767_s27 + $0x10] sm:$0xff] %vm862_vm4, %v4437_v46 }
 0x671   : > { %v5346_v37 = vpop.f32.mrb[52].mxu0 }
 0x672   : > { %v4417_v35 = vmul.f32 %v5346_v37, %v7473_v50  ;;  %v4346_v39 = vpop.f32.mrb[53].mxu0 }
 0x673   : > { %v4416_v24 = vmul.f32 %v7473_v50, %v4346_v39 }
 0x674   : > { %v4440_v45 = vadd.f32 %v7478_v19, %v4417_v35 }
 0x675   : > { %v4439_v52 = vadd.f32 %v7478_v19, %v4416_v24 }
 0x676   : > { %4456 = vst.msk [vmem:[%s5767_s27 + $0x28] sm:$0xff] %vm862_vm4, %v4440_v45 }
 0x677   : > { %4455 = vst.msk [vmem:[%s5767_s27 + $0x20] sm:$0xff] %vm862_vm4, %v4439_v52 }
 0x67c   : > { %v5349_v8 = vpop.f32.mrb[54].mxu0 }
 0x67d   : > { %v4419_v16 = vmul.f32 %v5349_v8, %v7473_v50  ;;  %v4356_v34 = vpop.f32.mrb[55].mxu0 }
 0x67e   : > { %v4418_v14 = vmul.f32 %v7473_v50, %v4356_v34 }
 0x67f   : > { %v4442_v61 = vadd.f32 %v7478_v19, %v4419_v16 }
 0x680   : > { %v4441_v22 = vadd.f32 %v7478_v19, %v4418_v14 }
 0x681   : > { %4458 = vst.msk [vmem:[%s5767_s27 + $0x38] sm:$0xff] %vm862_vm4, %v4442_v61 }
 0x682   : > { %4457 = vst.msk [vmem:[%s5767_s27 + $0x30] sm:$0xff] %vm862_vm4, %v4441_v22 }
 0x685   : > { %v5352_v56 = vpop.f32.mrb[56].mxu0 }
 0x686   : > { %v4421_v27 = vmul.f32 %v5352_v56, %v7473_v50  ;;  %v4366_v10 = vpop.f32.mrb[57].mxu0 }
 0x687   : > { %v4420_v28 = vmul.f32 %v7473_v50, %v4366_v10 }
 0x688   : > { %v4444_v44 = vadd.f32 %v7478_v19, %v4421_v27 }
 0x689   : > { %v4443_v57 = vadd.f32 %v7478_v19, %v4420_v28 }
 0x68a   : > { %4460 = vst.msk [vmem:[%s5767_s27 + $0x48] sm:$0xff] %vm862_vm4, %v4444_v44 }
 0x68b   : > { %4459 = vst.msk [vmem:[%s5767_s27 + $0x40] sm:$0xff] %vm862_vm4, %v4443_v57 }
 0x68d   : > { %v5355_v59 = vpop.f32.mrb[58].mxu0 }
 0x68e   : > { %v4423_v63 = vmul.f32 %v5355_v59, %v7473_v50  ;;  %v4376_v6 = vpop.f32.mrb[59].mxu0 }
 0x68f   : > { %v4422_v13 = vmul.f32 %v7473_v50, %v4376_v6 }
 0x690   : > { %v4446_v15 = vadd.f32 %v7478_v19, %v4423_v63 }
 0x691   : > { %v4445_v2 = vadd.f32 %v7478_v19, %v4422_v13 }
 0x692   : > { %4462 = vst.msk [vmem:[%s5767_s27 + $0x58] sm:$0xff] %vm862_vm4, %v4446_v15 }
 0x693   : > { %4461 = vst.msk [vmem:[%s5767_s27 + $0x50] sm:$0xff] %vm862_vm4, %v4445_v2 }
 0x695   : > { %v5358_v41 = vpop.f32.mrb[60].mxu0 }
 0x696   : > { %v4425_v60 = vmul.f32 %v5358_v41, %v7473_v50  ;;  %v4386_v29 = vpop.f32.mrb[61].mxu0 }
 0x697   : > { %v4424_v53 = vmul.f32 %v7473_v50, %v4386_v29 }
 0x698   : > { %v4448_v18 = vadd.f32 %v7478_v19, %v4425_v60 }
 0x699   : > { %v4447_v36 = vadd.f32 %v7478_v19, %v4424_v53 }
 0x69a   : > { %4464 = vst.msk [vmem:[%s5767_s27 + $0x68] sm:$0xff] %vm862_vm4, %v4448_v18 }
 0x69b   : > { %4463 = vst.msk [vmem:[%s5767_s27 + $0x60] sm:$0xff] %vm862_vm4, %v4447_v36 }
 0x69e   : > { %v5361_v40 = vpop.f32.mrb[56].mxu1 }
 0x69f   : > { %v4427_v33 = vmul.f32 %v5361_v40, %v7473_v50  ;;  %v4396_v25 = vpop.f32.mrb[57].mxu1 }
 0x6a0   : > { %v4426_v38 = vmul.f32 %v7473_v50, %v4396_v25 }
 0x6a1   : > { %v4450_v5 = vadd.f32 %v7478_v19, %v4427_v33 }
 0x6a2   : > { %v4449_v62 = vadd.f32 %v7478_v19, %v4426_v38 }
 0x6a3   : > { %4466 = vst.msk [vmem:[%s5767_s27 + $0x78] sm:$0xff] %vm862_vm4, %v4450_v5 }
 0x6a4   : > { %4465 = vst.msk [vmem:[%s5767_s27 + $0x70] sm:$0xff] %vm862_vm4, %v4449_v62 }
 0x6a5   : > { %5567 = shalt.err (!%p5564_p4)
}
 0x6a6   : > { %s5568_s27 = scalar_lea.hbm %s7544_s21, 2048  ;;  %s5572_s29 = scalar_lea.hbm %s7612_s16, 4096 }
 0x6a7   : > { %p5569_p7 = scmp.ne.s32.totalorder %s7544_s21, %s5568_s27  ;;  %p5573_p10 = scmp.lt.u32.totalorder %s7544_s21, %s7612_s16 }
 0x6a8   : > { %p5574_p11 = scmp.lt.u32.totalorder %s5572_s29, %s5568_s27  ;;  %p5576_p13 = scmp.lt.u32.totalorder %s5568_s27, %s7544_s21 }
 0x6a9   : > { %p5570_p8 = pnand %p5569_p7, %p5747_p5 }
 0x6aa   : > { %p5575_p12 = por %p5574_p11, %p5573_p10 }
 0x6ab   : > { %p5571_p9 = pneg %p5570_p8 }
 0x6ac   : > { %p5577_p0 = por %p5576_p13, %p5575_p12 }
 0x6ae   : > { %p5578_p1 = pnand %p5577_p0, %p5571_p9 }
 0x6b0   : > { %5581 = shalt.err (!%p5578_p1)
}
 0x6b1   : > { %s5622_s23 = smov 128   ;;  %s5623_s18 = smov 8  }
 0x6b2   : > { %5510 = dma.vmem_to_hbm [thread:$0]  (%p5747_p5), %s7546_s26, 2048, %s7544_s21, %s7555_s30, %s5622_s23, %s5622_s23, %s5623_s18  }
 0x6b3 PF: > { %s7637_s19 = sld [smem:[#allocation12_spill]]  ;;  %p5516_p2 = scmp.ge.s32.totalorder %s5616_s24, 2 }
 0x6b5   : > { %p5513_p3 = pnand %p5516_p2, %p5751_p6 }
 0x6b9   : > { %s4496_s28 = sand.u32 1, %s7637_s19  }
 0x6ba   : > { %s4497_s27 = scalar_lea.sflag [#allocation10], %s4496_s28 }
 0x6bb   : > { %5599 = dma.done.wait (!%p5513_p3), %s4497_s27, 2048  }
 0x6bc   : > { %5601 = vsyncadd (!%p5513_p3), %s4497_s27, 4294965248  ;;  %s7639_s24 = sld [smem:[#allocation14_spill]]  ;;  %s7640_s29 = sld [smem:[#allocation13_spill]] }
 0x6bd   : > { %s7641_s23 = sld [smem:[#allocation15_spill]]  ;;  %s7642_s21 = smov %s5608_s22 }
 0x6c2   : > { %p26_p4 = scmp.ge.s32.totalorder %s7639_s24, 4   ;;  %s7643_s22 = smov %s7640_s29 }
 0x6c4   :  { %28 = sbr.rel (!%p26_p4) target bundleno = 5 (0x5), region = 137 }
 0x6cb   :  { %4502 = vsyncpa [#allocation10], 1 }
 0x6cc   :  { %4504 = vsyncpa [#allocation10 + $0x1], 1 }

</bundles_post_ra>
